<compile_context>
chip_gen: v7x
topology: tpu7x:2x2x1
jax: 0.10.0
libtpu: 0.0.40
codegen_flags: <defaults>
</compile_context>

<pallas_src>
import math

import numpy as np
import jax
import jax.numpy as jnp
from jax import lax
from jax.experimental import pallas as pl
from jax.experimental.pallas import tpu as pltpu

# ---------------- config (small, consistent with the module) ----------------
BATCH = 2
SEQ = 16
HIDDEN = 256
NUM_HEADS = 2
HEAD_DIM = HIDDEN // NUM_HEADS          # 128
HALF = HEAD_DIM // 2                    # 64
INTERMEDIATE = 512
NUM_LAYERS = 2
LN_EPS = 1e-5                           # nn.LayerNorm default
BS = BATCH * SEQ                        # 32 rows after batch collapse
_INV_SQRT2 = 1.0 / math.sqrt(2.0)

# ---------------- exact-GELU helper (erf via f32 rational approx) -----------
_ERF_ALPHA = (-2.72614225801306e-10, 2.77068142495902e-08, -2.10102402082508e-06,
              -5.69250639462346e-05, -7.34990630326855e-04, -2.95459980854025e-03,
              -1.60960333262415e-02)
_ERF_BETA = (-1.45660718464996e-05, -2.13374055278905e-04, -1.68282697438203e-03,
             -7.37332916720468e-03, -1.42647390514189e-02)


def _erf(x, recip=None):
  x = jnp.clip(x, -4.0, 4.0)
  t = x * x
  p = jnp.full_like(x, _ERF_ALPHA[0])
  for c in _ERF_ALPHA[1:]:
    p = p * t + c
  p = p * x
  q = jnp.full_like(x, _ERF_BETA[0])
  for c in _ERF_BETA[1:]:
    q = q * t + c
  if recip is None:
    return p / q
  return p * recip(q)


def _gelu_exact(x, recip=None):
  return 0.5 * x * (1.0 + _erf(x * _INV_SQRT2, recip=recip))


def _layernorm(v, w, b):
  mu = jnp.mean(v, axis=-1, keepdims=True)
  var = jnp.mean((v - mu) ** 2, axis=-1, keepdims=True)
  return (v - mu) * lax.rsqrt(var + LN_EPS) * w + b


def _mm(a, b, dims=(((1,), (0,)), ((), ()))):
  # bf16 MXU operands, f32 accumulation.
  return lax.dot_general(a.astype(jnp.bfloat16), b.astype(jnp.bfloat16), dims,
                         preferred_element_type=jnp.float32)


# ---------------- the Pallas kernel: all layers, grid over layer -------------
def encoder_kernel(x_ref, cos_ref, sin_ref, bias_ref,
                   ln1w_ref, ln1b_ref, wqkv_ref, bqkv_ref, wo_ref, bo_ref,
                   ln2w_ref, ln2b_ref, w1_ref, b1_ref, w2_ref, b2_ref,
                   out_ref):
  layer = pl.program_id(0)
  approx_recip = lambda v: pl.reciprocal(v, approx=True)

  @pl.when(layer == 0)
  def _():
    out_ref[...] = x_ref[...]           # seed the VMEM-resident activation carry

  x = out_ref[...]                      # (BS, H) f32, resident across layer steps
  cosm = cos_ref[...]                   # (BS, HEAD_DIM) = [cos | cos]
  sinm = sin_ref[...]                   # (BS, HEAD_DIM) = [-sin | sin]
  bias = bias_ref[...]                  # (BS, BS) block-diagonal batch mask (0 / -1e30)

  # ---- self-attention block ----
  h = _layernorm(x, ln1w_ref[...], ln1b_ref[...])
  qkv = _mm(h, wqkv_ref[...]) + bqkv_ref[...]        # fused QKV, (BS, 3H)
  q = qkv[:, :HIDDEN]                   # planar (re|im) per-head layout, pre-scaled
  k = qkv[:, HIDDEN:2 * HIDDEN]         # planar (re|im) per-head layout
  v = qkv[:, 2 * HIDDEN:]               # original layout

  heads = []
  for hh in range(NUM_HEADS):
    lo = hh * HEAD_DIM
    q_h = q[:, lo:lo + HEAD_DIM]        # lane-aligned 128-wide head tile
    k_h = k[:, lo:lo + HEAD_DIM]
    # RoPE: rotate-half via XLU roll, two FMAs against full-width cos/sin maps.
    q_rot = q_h * cosm + pltpu.roll(q_h, shift=HALF, axis=1) * sinm
    k_rot = k_h * cosm + pltpu.roll(k_h, shift=HALF, axis=1) * sinm
    # scores: single K=128 matmul (scale already folded into wq/bq), f32 acc.
    scores = _mm(q_rot, k_rot, (((1,), (1,)), ((), ()))) + bias     # (BS, BS)
    m = jnp.max(scores, axis=-1, keepdims=True)
    e = jnp.exp(scores - m)
    probs = e * approx_recip(jnp.sum(e, axis=-1, keepdims=True))
    heads.append(_mm(probs, v[:, lo:lo + HEAD_DIM]))                # (BS, HEAD_DIM)
  attn_cat = jnp.concatenate(heads, axis=-1)                        # (BS, H)
  attn = _mm(attn_cat, wo_ref[...]) + bo_ref[...]                   # single K=256 o-proj
  x = x + attn                                                      # residual

  # ---- MLP block ----
  h2 = _layernorm(x, ln2w_ref[...], ln2b_ref[...])
  m1 = _gelu_exact(_mm(h2, w1_ref[...]) + b1_ref[...], recip=approx_recip)
  out_ref[...] = x + _mm(m1, w2_ref[...]) + b2_ref[...]             # residual + carry


# ---------------- wrapper -----------------------------------------------------
def _cspec(shape):                       # constant (layer-invariant) input
  n = len(shape)
  return pl.BlockSpec(shape, lambda l, _n=n: (0,) * _n)


def _wspec(shape):                       # per-layer stacked weight, leading dim squeezed
  n = len(shape)
  return pl.BlockSpec((None,) + shape, lambda l, _n=n: (l,) + (0,) * _n)


def encoder_pallas_call(x2d, cos_map, sin_map, attn_bias, sp):
  H, I = HIDDEN, INTERMEDIATE
  in_specs = [
      _cspec((BS, H)),                   # x
      _cspec((BS, HEAD_DIM)),            # cos map  [cos | cos]
      _cspec((BS, HEAD_DIM)),            # sin map  [-sin | sin]
      _cspec((BS, BS)),                  # block-diagonal attention bias
      _wspec((1, H)), _wspec((1, H)),    # input layernorm
      _wspec((H, 3 * H)), _wspec((1, 3 * H)),   # fused qkv
      _wspec((H, H)), _wspec((1, H)),    # o_proj
      _wspec((1, H)), _wspec((1, H)),    # post-attn layernorm
      _wspec((H, I)), _wspec((1, I)),    # fc1
      _wspec((I, H)), _wspec((1, H)),    # fc2
  ]
  return pl.pallas_call(
      encoder_kernel,
      out_shape=jax.ShapeDtypeStruct((BS, H), jnp.float32),
      grid_spec=pltpu.PrefetchScalarGridSpec(
          num_scalar_prefetch=0,
          grid=(NUM_LAYERS,),
          in_specs=in_specs,
          out_specs=pl.BlockSpec((BS, H), lambda l: (0, 0)),
          scratch_shapes=[]),
      compiler_params=pltpu.CompilerParams(
          dimension_semantics=("arbitrary",)),
  )(x2d, cos_map, sin_map, attn_bias,
    sp["ln1_w"], sp["ln1_b"], sp["wqkv"], sp["bqkv"], sp["wo"], sp["bo"],
    sp["ln2_w"], sp["ln2_b"], sp["w1"], sp["b1"], sp["w2"], sp["b2"])


@jax.jit
def encoder_pallas(x, cos_map, sin_map, attn_bias, stacked):
  y = encoder_pallas_call(x.reshape(BS, HIDDEN), cos_map, sin_map, attn_bias, stacked)
  return y.reshape(BATCH, SEQ, HIDDEN)


# ---------------- host-side parameter preparation -----------------------------
# de-interleave (re, im) pairs into planar (re | im) per head for q/k columns
_PLANAR_IDX = np.concatenate([
    np.concatenate([np.arange(h * HEAD_DIM, (h + 1) * HEAD_DIM, 2),
                    np.arange(h * HEAD_DIM + 1, (h + 1) * HEAD_DIM, 2)])
    for h in range(NUM_HEADS)])

PARAM_KEYS = ("ln1_w", "ln1_b", "wqkv", "bqkv", "wo", "bo",
              "ln2_w", "ln2_b", "w1", "b1", "w2", "b2")


def prepare_kernel_params(all_params):
  scale = 1.0 / math.sqrt(HEAD_DIM)      # fold attention scaling into q projection
  stacked = {k: [] for k in PARAM_KEYS}
  for p in all_params:
    wq = (p["wq"] * scale)[:, _PLANAR_IDX]
    bq = (p["bq"] * scale)[:, _PLANAR_IDX]
    wk = p["wk"][:, _PLANAR_IDX]
    bk = p["bk"][:, _PLANAR_IDX]
    stacked["wqkv"].append(jnp.concatenate([wq, wk, p["wv"]], axis=1))
    stacked["bqkv"].append(jnp.concatenate([bq, bk, p["bv"]], axis=1))
    stacked["wo"].append(p["wo"]); stacked["bo"].append(p["bo"])
    stacked["ln1_w"].append(p["ln1_w"]); stacked["ln1_b"].append(p["ln1_b"])
    stacked["ln2_w"].append(p["ln2_w"]); stacked["ln2_b"].append(p["ln2_b"])
    stacked["w1"].append(p["w1"]); stacked["b1"].append(p["b1"])
    stacked["w2"].append(p["w2"]); stacked["b2"].append(p["b2"])
  out = {}
  for k, vals in stacked.items():
    arr = jnp.stack(vals, axis=0)
    if k in ("wqkv", "wo", "w1", "w2"):
      arr = arr.astype(jnp.bfloat16)      # MXU operands in bf16 (halves weight DMA)
    out[k] = arr
  return out


def make_attn_bias():
  bm = (np.arange(BS)[:, None] // SEQ) == (np.arange(BS)[None, :] // SEQ)
  return jnp.asarray(np.where(bm, 0.0, -1e30), dtype=jnp.float32)


# ---------------- pure-JAX reference (mirrors the torch forward) --------------
def encoder_reference(x, cos, sin, all_params):
  HI = lax.Precision.HIGHEST

  def lin(v, w, b):
    return jnp.einsum("bsh,ho->bso", v, w, precision=HI) + b

  def rope(t):
    B_, S_, N_, D_ = t.shape
    tr = t.reshape(B_, S_, N_, D_ // 2, 2)
    re, im = tr[..., 0], tr[..., 1]
    c = cos[None, :, None, :]
    s = sin[None, :, None, :]
    out_r = re * c - im * s
    out_i = re * s + im * c
    return jnp.stack([out_r, out_i], axis=-1).reshape(B_, S_, N_, D_)

  for p in all_params:
    residual = x
    h = _layernorm(x, p["ln1_w"], p["ln1_b"])
    q = lin(h, p["wq"], p["bq"]).reshape(BATCH, SEQ, NUM_HEADS, HEAD_DIM)
    k = lin(h, p["wk"], p["bk"]).reshape(BATCH, SEQ, NUM_HEADS, HEAD_DIM)
    v = lin(h, p["wv"], p["bv"]).reshape(BATCH, SEQ, NUM_HEADS, HEAD_DIM)
    q, k = rope(q), rope(k)
    q = q.transpose(0, 2, 1, 3)
    k = k.transpose(0, 2, 1, 3)
    v = v.transpose(0, 2, 1, 3)
    scores = jnp.einsum("bhqd,bhkd->bhqk", q, k, precision=HI) / math.sqrt(HEAD_DIM)
    m = jnp.max(scores, axis=-1, keepdims=True)
    e = jnp.exp(scores - m)
    probs = e / jnp.sum(e, axis=-1, keepdims=True)
    attn = jnp.einsum("bhqk,bhkd->bhqd", probs, v, precision=HI)
    attn = attn.transpose(0, 2, 1, 3).reshape(BATCH, SEQ, HIDDEN)
    attn = lin(attn, p["wo"], p["bo"])
    x = residual + attn

    residual = x
    h2 = _layernorm(x, p["ln2_w"], p["ln2_b"])
    m1 = _gelu_exact(lin(h2, p["w1"], p["b1"]))
    m2 = lin(m1, p["w2"], p["b2"])
    x = residual + m2
  return x


# ---------------- deterministic parameter / freqs construction ---------------
def init_params(key):
  def dense(k, fan_in, fan_out, scale=0.02):
    kw, kb = jax.random.split(k)
    w = (scale * jax.random.normal(kw, (fan_in, fan_out))).astype(jnp.float32)
    b = (scale * jax.random.normal(kb, (1, fan_out))).astype(jnp.float32)
    return w, b

  layers = []
  for l in range(NUM_LAYERS):
    ks = jax.random.split(jax.random.fold_in(key, l), 8)
    wq, bq = dense(ks[0], HIDDEN, HIDDEN)
    wk, bk = dense(ks[1], HIDDEN, HIDDEN)
    wv, bv = dense(ks[2], HIDDEN, HIDDEN)
    wo, bo = dense(ks[3], HIDDEN, HIDDEN)
    w1, b1 = dense(ks[4], HIDDEN, INTERMEDIATE)
    w2, b2 = dense(ks[5], INTERMEDIATE, HIDDEN)
    ln1_w = (1.0 + 0.1 * jax.random.normal(ks[6], (1, HIDDEN))).astype(jnp.float32)
    ln2_w = (1.0 + 0.1 * jax.random.normal(ks[7], (1, HIDDEN))).astype(jnp.float32)
    layers.append(dict(
        ln1_w=ln1_w, ln1_b=jnp.zeros((1, HIDDEN), jnp.float32),
        wq=wq, bq=bq, wk=wk, bk=bk, wv=wv, bv=bv, wo=wo, bo=bo,
        ln2_w=ln2_w, ln2_b=jnp.zeros((1, HIDDEN), jnp.float32),
        w1=w1, b1=b1, w2=w2, b2=b2))
  return tuple(layers)


def make_freqs():
  inv_freq = 1.0 / (10000.0 ** (jnp.arange(HALF, dtype=jnp.float32) / HALF))
  ang = jnp.arange(SEQ, dtype=jnp.float32)[:, None] * inv_freq[None, :]
  cos = jnp.cos(ang).astype(jnp.float32)            # (S, HEAD_DIM//2)
  sin = jnp.sin(ang).astype(jnp.float32)
  cos_bs = jnp.tile(cos, (BATCH, 1))                # (B*S, HEAD_DIM//2)
  sin_bs = jnp.tile(sin, (BATCH, 1))
  # lane-dense, full-head-width maps for the planar roll-based RoPE:
  #   rotated = head * [cos|cos] + roll(head, 64) * [-sin|sin]
  cos_map = jnp.concatenate([cos_bs, cos_bs], axis=-1)     # (B*S, HEAD_DIM)
  sin_map = jnp.concatenate([-sin_bs, sin_bs], axis=-1)    # (B*S, HEAD_DIM)
  return cos, sin, cos_map, sin_map


if __name__ == "__main__":
  key = jax.random.PRNGKey(0)
  kx, kp = jax.random.split(key)
  x = jax.random.normal(kx, (BATCH, SEQ, HIDDEN), dtype=jnp.float32)
  params = init_params(kp)
  cos, sin, cos_map, sin_map = make_freqs()
  stacked = prepare_kernel_params(params)
  attn_bias = make_attn_bias()

  out = jax.block_until_ready(encoder_pallas(x, cos_map, sin_map, attn_bias, stacked))

  ref = encoder_reference(x, cos, sin, params)
  np.testing.assert_allclose(np.asarray(out), np.asarray(ref), rtol=2e-2, atol=2e-2)
  print("KERNEL_OK")
</pallas_src>

<mosaic_0001>
module attributes {stable_mosaic.version = 11 : i64} {
  func.func @encoder_kernel(%arg0: i32, %arg1: memref<32x256xf32, #tpu.memory_space<vmem>>, %arg2: memref<32x128xf32, #tpu.memory_space<vmem>>, %arg3: memref<32x128xf32, #tpu.memory_space<vmem>>, %arg4: memref<32x32xf32, #tpu.memory_space<vmem>>, %arg5: memref<1x1x256xf32, #tpu.memory_space<vmem>>, %arg6: memref<1x1x256xf32, #tpu.memory_space<vmem>>, %arg7: memref<1x256x768xbf16, #tpu.memory_space<vmem>>, %arg8: memref<1x1x768xf32, #tpu.memory_space<vmem>>, %arg9: memref<1x256x256xbf16, #tpu.memory_space<vmem>>, %arg10: memref<1x1x256xf32, #tpu.memory_space<vmem>>, %arg11: memref<1x1x256xf32, #tpu.memory_space<vmem>>, %arg12: memref<1x1x256xf32, #tpu.memory_space<vmem>>, %arg13: memref<1x256x512xbf16, #tpu.memory_space<vmem>>, %arg14: memref<1x1x512xf32, #tpu.memory_space<vmem>>, %arg15: memref<1x512x256xbf16, #tpu.memory_space<vmem>>, %arg16: memref<1x1x256xf32, #tpu.memory_space<vmem>>, %arg17: memref<32x256xf32, #tpu.memory_space<vmem>>) attributes {dimension_semantics = [#tpu.dimension_semantics<arbitrary>], iteration_bounds = array<i64: 2>, scalar_prefetch = 0 : i64, scratch_operands = 0 : i64, tpu.core_type = #tpu.core_type<tc>, window_params = [{pipeline_mode = #tpu.pipeline_mode<synchronous>, transform_indices = @transform_0, window_bounds = array<i64: 32, 256>}, {pipeline_mode = #tpu.pipeline_mode<synchronous>, transform_indices = @transform_1, window_bounds = array<i64: 32, 128>}, {pipeline_mode = #tpu.pipeline_mode<synchronous>, transform_indices = @transform_2, window_bounds = array<i64: 32, 128>}, {pipeline_mode = #tpu.pipeline_mode<synchronous>, transform_indices = @transform_3, window_bounds = array<i64: 32, 32>}, {transform_indices = @transform_4, window_bounds = array<i64: 1, 1, 256>}, {transform_indices = @transform_5, window_bounds = array<i64: 1, 1, 256>}, {transform_indices = @transform_6, window_bounds = array<i64: 1, 256, 768>}, {transform_indices = @transform_7, window_bounds = array<i64: 1, 1, 768>}, {transform_indices = @transform_8, window_bounds = array<i64: 1, 256, 256>}, {transform_indices = @transform_9, window_bounds = array<i64: 1, 1, 256>}, {transform_indices = @transform_10, window_bounds = array<i64: 1, 1, 256>}, {transform_indices = @transform_11, window_bounds = array<i64: 1, 1, 256>}, {transform_indices = @transform_12, window_bounds = array<i64: 1, 256, 512>}, {transform_indices = @transform_13, window_bounds = array<i64: 1, 1, 512>}, {transform_indices = @transform_14, window_bounds = array<i64: 1, 512, 256>}, {transform_indices = @transform_15, window_bounds = array<i64: 1, 1, 256>}, {pipeline_mode = #tpu.pipeline_mode<synchronous>, transform_indices = @transform_16, window_bounds = array<i64: 32, 256>}]} {
    %c0_i32 = arith.constant 0 : i32
    %0 = arith.cmpi eq, %arg0, %c0_i32 : i32
    %1 = arith.extui %0 : i1 to i32
    %c0_i32_0 = arith.constant 0 : i32
    %2 = arith.cmpi ne, %1, %c0_i32_0 : i32
    scf.if %2 {
      %c0_87 = arith.constant 0 : index
      %c0_88 = arith.constant 0 : index
      %201 = vector.load %arg1[%c0_87, %c0_88] : memref<32x256xf32, #tpu.memory_space<vmem>>, vector<32x256xf32>
      %c0_89 = arith.constant 0 : index
      %c0_90 = arith.constant 0 : index
      %202 = vector.load %arg17[%c0_89, %c0_90] : memref<32x256xf32, #tpu.memory_space<vmem>>, vector<32x256xf32>
      tpu.vector_store %arg17[%c0_89, %c0_90], %201 {strides = array<i32>} : memref<32x256xf32, #tpu.memory_space<vmem>>, vector<32x256xf32>,
    } else {
    }
    %c0 = arith.constant 0 : index
    %c0_1 = arith.constant 0 : index
    %3 = vector.load %arg17[%c0, %c0_1] : memref<32x256xf32, #tpu.memory_space<vmem>>, vector<32x256xf32>
    %c0_2 = arith.constant 0 : index
    %c0_3 = arith.constant 0 : index
    %4 = vector.load %arg2[%c0_2, %c0_3] : memref<32x128xf32, #tpu.memory_space<vmem>>, vector<32x128xf32>
    %c0_4 = arith.constant 0 : index
    %c0_5 = arith.constant 0 : index
    %5 = vector.load %arg3[%c0_4, %c0_5] : memref<32x128xf32, #tpu.memory_space<vmem>>, vector<32x128xf32>
    %c0_6 = arith.constant 0 : index
    %c0_7 = arith.constant 0 : index
    %6 = vector.load %arg4[%c0_6, %c0_7] : memref<32x32xf32, #tpu.memory_space<vmem>>, vector<32x32xf32>
    %c0_8 = arith.constant 0 : index
    %c0_9 = arith.constant 0 : index
    %c0_10 = arith.constant 0 : index
    %7 = vector.load %arg5[%c0_8, %c0_9, %c0_10] : memref<1x1x256xf32, #tpu.memory_space<vmem>>, vector<1x1x256xf32>
    %8 = vector.shape_cast %7 : vector<1x1x256xf32> to vector<1x256xf32>
    %c0_11 = arith.constant 0 : index
    %c0_12 = arith.constant 0 : index
    %c0_13 = arith.constant 0 : index
    %9 = vector.load %arg6[%c0_11, %c0_12, %c0_13] : memref<1x1x256xf32, #tpu.memory_space<vmem>>, vector<1x1x256xf32>
    %10 = vector.shape_cast %9 : vector<1x1x256xf32> to vector<1x256xf32>
    %cst = arith.constant dense<0.000000e+00> : vector<32xf32>
    %11 = vector.multi_reduction <add>, %3, %cst [1] : vector<32x256xf32> to vector<32xf32>
    %12 = vector.shape_cast %11 : vector<32xf32> to vector<32x1xf32>
    %cst_14 = arith.constant 2.560000e+02 : f32
    %13 = vector.broadcast %cst_14 : f32 to vector<32x1xf32>
    %14 = arith.divf %12, %13 : vector<32x1xf32>
    %15 = vector.broadcast %14 : vector<32x1xf32> to vector<32x256xf32>
    %16 = arith.subf %3, %15 : vector<32x256xf32>
    %17 = arith.mulf %16, %16 : vector<32x256xf32>
    %cst_15 = arith.constant dense<0.000000e+00> : vector<32xf32>
    %18 = vector.multi_reduction <add>, %17, %cst_15 [1] : vector<32x256xf32> to vector<32xf32>
    %19 = vector.shape_cast %18 : vector<32xf32> to vector<32x1xf32>
    %cst_16 = arith.constant 2.560000e+02 : f32
    %20 = vector.broadcast %cst_16 : f32 to vector<32x1xf32>
    %21 = arith.divf %19, %20 : vector<32x1xf32>
    %22 = vector.broadcast %14 : vector<32x1xf32> to vector<32x256xf32>
    %23 = arith.subf %3, %22 : vector<32x256xf32>
    %cst_17 = arith.constant 9.99999974E-6 : f32
    %24 = vector.broadcast %cst_17 : f32 to vector<32x1xf32>
    %25 = arith.addf %21, %24 : vector<32x1xf32>
    %26 = math.rsqrt %25 : vector<32x1xf32>
    %27 = vector.broadcast %26 : vector<32x1xf32> to vector<32x256xf32>
    %28 = arith.mulf %23, %27 : vector<32x256xf32>
    %29 = vector.broadcast %8 : vector<1x256xf32> to vector<32x256xf32>
    %30 = arith.mulf %28, %29 : vector<32x256xf32>
    %31 = vector.broadcast %10 : vector<1x256xf32> to vector<32x256xf32>
    %32 = arith.addf %30, %31 : vector<32x256xf32>
    %c0_18 = arith.constant 0 : index
    %c0_19 = arith.constant 0 : index
    %c0_20 = arith.constant 0 : index
    %33 = vector.load %arg7[%c0_18, %c0_19, %c0_20] : memref<1x256x768xbf16, #tpu.memory_space<vmem>>, vector<1x256x768xbf16>
    %34 = vector.shape_cast %33 : vector<1x256x768xbf16> to vector<256x768xbf16>
    %35 = arith.truncf %32 : vector<32x256xf32> to vector<32x256xbf16>
    %cst_21 = arith.constant dense<0.000000e+00> : vector<32x768xf32>
    %36 = tpu.matmul %35, %34, %cst_21 {dimension_numbers = #tpu.dot_dimension_numbers<[1], [0], [0], [1], [0, 0, 1, 1], [], []>} : vector<32x256xbf16>, vector<256x768xbf16>, vector<32x768xf32> -> vector<32x768xf32>
    %c0_22 = arith.constant 0 : index
    %c0_23 = arith.constant 0 : index
    %c0_24 = arith.constant 0 : index
    %37 = vector.load %arg8[%c0_22, %c0_23, %c0_24] : memref<1x1x768xf32, #tpu.memory_space<vmem>>, vector<1x1x768xf32>
    %38 = vector.shape_cast %37 : vector<1x1x768xf32> to vector<1x768xf32>
    %39 = vector.broadcast %38 : vector<1x768xf32> to vector<32x768xf32>
    %40 = arith.addf %36, %39 : vector<32x768xf32>
    %41 = vector.extract_strided_slice %40 {offsets = [0, 0], sizes = [32, 256], strides = [1, 1]} : vector<32x768xf32> to vector<32x256xf32>
    %42 = vector.extract_strided_slice %40 {offsets = [0, 256], sizes = [32, 256], strides = [1, 1]} : vector<32x768xf32> to vector<32x256xf32>
    %43 = vector.extract_strided_slice %40 {offsets = [0, 512], sizes = [32, 256], strides = [1, 1]} : vector<32x768xf32> to vector<32x256xf32>
    %44 = vector.extract_strided_slice %41 {offsets = [0, 0], sizes = [32, 128], strides = [1, 1]} : vector<32x256xf32> to vector<32x128xf32>
    %45 = vector.extract_strided_slice %42 {offsets = [0, 0], sizes = [32, 128], strides = [1, 1]} : vector<32x256xf32> to vector<32x128xf32>
    %46 = arith.mulf %44, %4 : vector<32x128xf32>
    %c64_i32 = arith.constant 64 : i32
    %47 = tpu.dynamic_rotate %44 by %c64_i32 dim 1 : vector<32x128xf32>, i32 -> vector<32x128xf32>
    %48 = arith.mulf %47, %5 : vector<32x128xf32>
    %49 = arith.addf %46, %48 : vector<32x128xf32>
    %50 = arith.mulf %45, %4 : vector<32x128xf32>
    %c64_i32_25 = arith.constant 64 : i32
    %51 = tpu.dynamic_rotate %45 by %c64_i32_25 dim 1 : vector<32x128xf32>, i32 -> vector<32x128xf32>
    %52 = arith.mulf %51, %5 : vector<32x128xf32>
    %53 = arith.addf %50, %52 : vector<32x128xf32>
    %54 = arith.truncf %49 : vector<32x128xf32> to vector<32x128xbf16>
    %55 = arith.truncf %53 : vector<32x128xf32> to vector<32x128xbf16>
    %cst_26 = arith.constant dense<0.000000e+00> : vector<32x32xf32>
    %56 = tpu.matmul %54, %55, %cst_26 {dimension_numbers = #tpu.dot_dimension_numbers<[1], [1], [0], [0], [0, 0, 1, 0], [], []>} : vector<32x128xbf16>, vector<32x128xbf16>, vector<32x32xf32> -> vector<32x32xf32>
    %57 = arith.addf %56, %6 : vector<32x32xf32>
    %cst_27 = arith.constant dense<0xFF800000> : vector<32xf32>
    %58 = vector.multi_reduction <maximumf>, %57, %cst_27 [1] : vector<32x32xf32> to vector<32xf32>
    %59 = vector.shape_cast %58 : vector<32xf32> to vector<32x1xf32>
    %60 = vector.broadcast %59 : vector<32x1xf32> to vector<32x32xf32>
    %61 = arith.subf %57, %60 : vector<32x32xf32>
    %62 = math.exp %61 : vector<32x32xf32>
    %cst_28 = arith.constant dense<0.000000e+00> : vector<32xf32>
    %63 = vector.multi_reduction <add>, %62, %cst_28 [1] : vector<32x32xf32> to vector<32xf32>
    %64 = vector.shape_cast %63 : vector<32xf32> to vector<32x1xf32>
    %65 = tpu.reciprocal %64 {approx = true} : vector<32x1xf32> -> vector<32x1xf32>
    %66 = vector.broadcast %65 : vector<32x1xf32> to vector<32x32xf32>
    %67 = arith.mulf %62, %66 : vector<32x32xf32>
    %68 = vector.extract_strided_slice %43 {offsets = [0, 0], sizes = [32, 128], strides = [1, 1]} : vector<32x256xf32> to vector<32x128xf32>
    %69 = arith.truncf %67 : vector<32x32xf32> to vector<32x32xbf16>
    %70 = arith.truncf %68 : vector<32x128xf32> to vector<32x128xbf16>
    %cst_29 = arith.constant dense<0.000000e+00> : vector<32x128xf32>
    %71 = tpu.matmul %69, %70, %cst_29 {dimension_numbers = #tpu.dot_dimension_numbers<[1], [0], [0], [1], [0, 0, 1, 1], [], []>} : vector<32x32xbf16>, vector<32x128xbf16>, vector<32x128xf32> -> vector<32x128xf32>
    %72 = vector.extract_strided_slice %41 {offsets = [0, 128], sizes = [32, 128], strides = [1, 1]} : vector<32x256xf32> to vector<32x128xf32>
    %73 = vector.extract_strided_slice %42 {offsets = [0, 128], sizes = [32, 128], strides = [1, 1]} : vector<32x256xf32> to vector<32x128xf32>
    %74 = arith.mulf %72, %4 : vector<32x128xf32>
    %c64_i32_30 = arith.constant 64 : i32
    %75 = tpu.dynamic_rotate %72 by %c64_i32_30 dim 1 : vector<32x128xf32>, i32 -> vector<32x128xf32>
    %76 = arith.mulf %75, %5 : vector<32x128xf32>
    %77 = arith.addf %74, %76 : vector<32x128xf32>
    %78 = arith.mulf %73, %4 : vector<32x128xf32>
    %c64_i32_31 = arith.constant 64 : i32
    %79 = tpu.dynamic_rotate %73 by %c64_i32_31 dim 1 : vector<32x128xf32>, i32 -> vector<32x128xf32>
    %80 = arith.mulf %79, %5 : vector<32x128xf32>
    %81 = arith.addf %78, %80 : vector<32x128xf32>
    %82 = arith.truncf %77 : vector<32x128xf32> to vector<32x128xbf16>
    %83 = arith.truncf %81 : vector<32x128xf32> to vector<32x128xbf16>
    %cst_32 = arith.constant dense<0.000000e+00> : vector<32x32xf32>
    %84 = tpu.matmul %82, %83, %cst_32 {dimension_numbers = #tpu.dot_dimension_numbers<[1], [1], [0], [0], [0, 0, 1, 0], [], []>} : vector<32x128xbf16>, vector<32x128xbf16>, vector<32x32xf32> -> vector<32x32xf32>
    %85 = arith.addf %84, %6 : vector<32x32xf32>
    %cst_33 = arith.constant dense<0xFF800000> : vector<32xf32>
    %86 = vector.multi_reduction <maximumf>, %85, %cst_33 [1] : vector<32x32xf32> to vector<32xf32>
    %87 = vector.shape_cast %86 : vector<32xf32> to vector<32x1xf32>
    %88 = vector.broadcast %87 : vector<32x1xf32> to vector<32x32xf32>
    %89 = arith.subf %85, %88 : vector<32x32xf32>
    %90 = math.exp %89 : vector<32x32xf32>
    %cst_34 = arith.constant dense<0.000000e+00> : vector<32xf32>
    %91 = vector.multi_reduction <add>, %90, %cst_34 [1] : vector<32x32xf32> to vector<32xf32>
    %92 = vector.shape_cast %91 : vector<32xf32> to vector<32x1xf32>
    %93 = tpu.reciprocal %92 {approx = true} : vector<32x1xf32> -> vector<32x1xf32>
    %94 = vector.broadcast %93 : vector<32x1xf32> to vector<32x32xf32>
    %95 = arith.mulf %90, %94 : vector<32x32xf32>
    %96 = vector.extract_strided_slice %43 {offsets = [0, 128], sizes = [32, 128], strides = [1, 1]} : vector<32x256xf32> to vector<32x128xf32>
    %97 = arith.truncf %95 : vector<32x32xf32> to vector<32x32xbf16>
    %98 = arith.truncf %96 : vector<32x128xf32> to vector<32x128xbf16>
    %cst_35 = arith.constant dense<0.000000e+00> : vector<32x128xf32>
    %99 = tpu.matmul %97, %98, %cst_35 {dimension_numbers = #tpu.dot_dimension_numbers<[1], [0], [0], [1], [0, 0, 1, 1], [], []>} : vector<32x32xbf16>, vector<32x128xbf16>, vector<32x128xf32> -> vector<32x128xf32>
    %100 = tpu.concatenate %71, %99 in 1 : vector<32x128xf32>, vector<32x128xf32> -> vector<32x256xf32>
    %c0_36 = arith.constant 0 : index
    %c0_37 = arith.constant 0 : index
    %c0_38 = arith.constant 0 : index
    %101 = vector.load %arg9[%c0_36, %c0_37, %c0_38] : memref<1x256x256xbf16, #tpu.memory_space<vmem>>, vector<1x256x256xbf16>
    %102 = vector.shape_cast %101 : vector<1x256x256xbf16> to vector<256x256xbf16>
    %103 = arith.truncf %100 : vector<32x256xf32> to vector<32x256xbf16>
    %cst_39 = arith.constant dense<0.000000e+00> : vector<32x256xf32>
    %104 = tpu.matmul %103, %102, %cst_39 {dimension_numbers = #tpu.dot_dimension_numbers<[1], [0], [0], [1], [0, 0, 1, 1], [], []>} : vector<32x256xbf16>, vector<256x256xbf16>, vector<32x256xf32> -> vector<32x256xf32>
    %c0_40 = arith.constant 0 : index
    %c0_41 = arith.constant 0 : index
    %c0_42 = arith.constant 0 : index
    %105 = vector.load %arg10[%c0_40, %c0_41, %c0_42] : memref<1x1x256xf32, #tpu.memory_space<vmem>>, vector<1x1x256xf32>
    %106 = vector.shape_cast %105 : vector<1x1x256xf32> to vector<1x256xf32>
    %107 = vector.broadcast %106 : vector<1x256xf32> to vector<32x256xf32>
    %108 = arith.addf %104, %107 : vector<32x256xf32>
    %109 = arith.addf %3, %108 : vector<32x256xf32>
    %c0_43 = arith.constant 0 : index
    %c0_44 = arith.constant 0 : index
    %c0_45 = arith.constant 0 : index
    %110 = vector.load %arg11[%c0_43, %c0_44, %c0_45] : memref<1x1x256xf32, #tpu.memory_space<vmem>>, vector<1x1x256xf32>
    %111 = vector.shape_cast %110 : vector<1x1x256xf32> to vector<1x256xf32>
    %c0_46 = arith.constant 0 : index
    %c0_47 = arith.constant 0 : index
    %c0_48 = arith.constant 0 : index
    %112 = vector.load %arg12[%c0_46, %c0_47, %c0_48] : memref<1x1x256xf32, #tpu.memory_space<vmem>>, vector<1x1x256xf32>
    %113 = vector.shape_cast %112 : vector<1x1x256xf32> to vector<1x256xf32>
    %cst_49 = arith.constant dense<0.000000e+00> : vector<32xf32>
    %114 = vector.multi_reduction <add>, %109, %cst_49 [1] : vector<32x256xf32> to vector<32xf32>
    %115 = vector.shape_cast %114 : vector<32xf32> to vector<32x1xf32>
    %cst_50 = arith.constant 2.560000e+02 : f32
    %116 = vector.broadcast %cst_50 : f32 to vector<32x1xf32>
    %117 = arith.divf %115, %116 : vector<32x1xf32>
    %118 = vector.broadcast %117 : vector<32x1xf32> to vector<32x256xf32>
    %119 = arith.subf %109, %118 : vector<32x256xf32>
    %120 = arith.mulf %119, %119 : vector<32x256xf32>
    %cst_51 = arith.constant dense<0.000000e+00> : vector<32xf32>
    %121 = vector.multi_reduction <add>, %120, %cst_51 [1] : vector<32x256xf32> to vector<32xf32>
    %122 = vector.shape_cast %121 : vector<32xf32> to vector<32x1xf32>
    %cst_52 = arith.constant 2.560000e+02 : f32
    %123 = vector.broadcast %cst_52 : f32 to vector<32x1xf32>
    %124 = arith.divf %122, %123 : vector<32x1xf32>
    %125 = vector.broadcast %117 : vector<32x1xf32> to vector<32x256xf32>
    %126 = arith.subf %109, %125 : vector<32x256xf32>
    %cst_53 = arith.constant 9.99999974E-6 : f32
    %127 = vector.broadcast %cst_53 : f32 to vector<32x1xf32>
    %128 = arith.addf %124, %127 : vector<32x1xf32>
    %129 = math.rsqrt %128 : vector<32x1xf32>
    %130 = vector.broadcast %129 : vector<32x1xf32> to vector<32x256xf32>
    %131 = arith.mulf %126, %130 : vector<32x256xf32>
    %132 = vector.broadcast %111 : vector<1x256xf32> to vector<32x256xf32>
    %133 = arith.mulf %131, %132 : vector<32x256xf32>
    %134 = vector.broadcast %113 : vector<1x256xf32> to vector<32x256xf32>
    %135 = arith.addf %133, %134 : vector<32x256xf32>
    %c0_54 = arith.constant 0 : index
    %c0_55 = arith.constant 0 : index
    %c0_56 = arith.constant 0 : index
    %136 = vector.load %arg13[%c0_54, %c0_55, %c0_56] : memref<1x256x512xbf16, #tpu.memory_space<vmem>>, vector<1x256x512xbf16>
    %137 = vector.shape_cast %136 : vector<1x256x512xbf16> to vector<256x512xbf16>
    %138 = arith.truncf %135 : vector<32x256xf32> to vector<32x256xbf16>
    %cst_57 = arith.constant dense<0.000000e+00> : vector<32x512xf32>
    %139 = tpu.matmul %138, %137, %cst_57 {dimension_numbers = #tpu.dot_dimension_numbers<[1], [0], [0], [1], [0, 0, 1, 1], [], []>} : vector<32x256xbf16>, vector<256x512xbf16>, vector<32x512xf32> -> vector<32x512xf32>
    %c0_58 = arith.constant 0 : index
    %c0_59 = arith.constant 0 : index
    %c0_60 = arith.constant 0 : index
    %140 = vector.load %arg14[%c0_58, %c0_59, %c0_60] : memref<1x1x512xf32, #tpu.memory_space<vmem>>, vector<1x1x512xf32>
    %141 = vector.shape_cast %140 : vector<1x1x512xf32> to vector<1x512xf32>
    %142 = vector.broadcast %141 : vector<1x512xf32> to vector<32x512xf32>
    %143 = arith.addf %139, %142 : vector<32x512xf32>
    %cst_61 = arith.constant 5.000000e-01 : f32
    %144 = vector.broadcast %cst_61 : f32 to vector<32x512xf32>
    %145 = arith.mulf %144, %143 : vector<32x512xf32>
    %cst_62 = arith.constant 0.707106769 : f32
    %146 = vector.broadcast %cst_62 : f32 to vector<32x512xf32>
    %147 = arith.mulf %143, %146 : vector<32x512xf32>
    %cst_63 = arith.constant -4.000000e+00 : f32
    %cst_64 = arith.constant 4.000000e+00 : f32
    %148 = vector.broadcast %cst_63 : f32 to vector<32x512xf32>
    %149 = arith.maximumf %148, %147 : vector<32x512xf32>
    %150 = vector.broadcast %cst_64 : f32 to vector<32x512xf32>
    %151 = arith.minimumf %150, %149 : vector<32x512xf32>
    %152 = arith.mulf %151, %151 : vector<32x512xf32>
    %cst_65 = arith.constant -2.72614237E-10 : f32
    %153 = vector.broadcast %cst_65 : f32 to vector<32x512xf32>
    %154 = arith.mulf %153, %152 : vector<32x512xf32>
    %cst_66 = arith.constant 2.77068146E-8 : f32
    %155 = vector.broadcast %cst_66 : f32 to vector<32x512xf32>
    %156 = arith.addf %154, %155 : vector<32x512xf32>
    %157 = arith.mulf %156, %152 : vector<32x512xf32>
    %cst_67 = arith.constant -2.10102394E-6 : f32
    %158 = vector.broadcast %cst_67 : f32 to vector<32x512xf32>
    %159 = arith.addf %157, %158 : vector<32x512xf32>
    %160 = arith.mulf %159, %152 : vector<32x512xf32>
    %cst_68 = arith.constant -5.69250624E-5 : f32
    %161 = vector.broadcast %cst_68 : f32 to vector<32x512xf32>
    %162 = arith.addf %160, %161 : vector<32x512xf32>
    %163 = arith.mulf %162, %152 : vector<32x512xf32>
    %cst_69 = arith.constant -7.34990637E-4 : f32
    %164 = vector.broadcast %cst_69 : f32 to vector<32x512xf32>
    %165 = arith.addf %163, %164 : vector<32x512xf32>
    %166 = arith.mulf %165, %152 : vector<32x512xf32>
    %cst_70 = arith.constant -2.954600e-03 : f32
    %167 = vector.broadcast %cst_70 : f32 to vector<32x512xf32>
    %168 = arith.addf %166, %167 : vector<32x512xf32>
    %169 = arith.mulf %168, %152 : vector<32x512xf32>
    %cst_71 = arith.constant -0.0160960332 : f32
    %170 = vector.broadcast %cst_71 : f32 to vector<32x512xf32>
    %171 = arith.addf %169, %170 : vector<32x512xf32>
    %172 = arith.mulf %171, %151 : vector<32x512xf32>
    %cst_72 = arith.constant -1.45660715E-5 : f32
    %173 = vector.broadcast %cst_72 : f32 to vector<32x512xf32>
    %174 = arith.mulf %173, %152 : vector<32x512xf32>
    %cst_73 = arith.constant -2.13374049E-4 : f32
    %175 = vector.broadcast %cst_73 : f32 to vector<32x512xf32>
    %176 = arith.addf %174, %175 : vector<32x512xf32>
    %177 = arith.mulf %176, %152 : vector<32x512xf32>
    %cst_74 = arith.constant -0.00168282702 : f32
    %178 = vector.broadcast %cst_74 : f32 to vector<32x512xf32>
    %179 = arith.addf %177, %178 : vector<32x512xf32>
    %180 = arith.mulf %179, %152 : vector<32x512xf32>
    %cst_75 = arith.constant -0.00737332925 : f32
    %181 = vector.broadcast %cst_75 : f32 to vector<32x512xf32>
    %182 = arith.addf %180, %181 : vector<32x512xf32>
    %183 = arith.mulf %182, %152 : vector<32x512xf32>
    %cst_76 = arith.constant -0.0142647391 : f32
    %184 = vector.broadcast %cst_76 : f32 to vector<32x512xf32>
    %185 = arith.addf %183, %184 : vector<32x512xf32>
    %186 = tpu.reciprocal %185 {approx = true} : vector<32x512xf32> -> vector<32x512xf32>
    %187 = arith.mulf %172, %186 : vector<32x512xf32>
    %cst_77 = arith.constant 1.000000e+00 : f32
    %188 = vector.broadcast %cst_77 : f32 to vector<32x512xf32>
    %189 = arith.addf %188, %187 : vector<32x512xf32>
    %190 = arith.mulf %145, %189 : vector<32x512xf32>
    %c0_78 = arith.constant 0 : index
    %c0_79 = arith.constant 0 : index
    %c0_80 = arith.constant 0 : index
    %191 = vector.load %arg15[%c0_78, %c0_79, %c0_80] : memref<1x512x256xbf16, #tpu.memory_space<vmem>>, vector<1x512x256xbf16>
    %192 = vector.shape_cast %191 : vector<1x512x256xbf16> to vector<512x256xbf16>
    %193 = arith.truncf %190 : vector<32x512xf32> to vector<32x512xbf16>
    %cst_81 = arith.constant dense<0.000000e+00> : vector<32x256xf32>
    %194 = tpu.matmul %193, %192, %cst_81 {dimension_numbers = #tpu.dot_dimension_numbers<[1], [0], [0], [1], [0, 0, 1, 1], [], []>} : vector<32x512xbf16>, vector<512x256xbf16>, vector<32x256xf32> -> vector<32x256xf32>
    %195 = arith.addf %109, %194 : vector<32x256xf32>
    %c0_82 = arith.constant 0 : index
    %c0_83 = arith.constant 0 : index
    %c0_84 = arith.constant 0 : index
    %196 = vector.load %arg16[%c0_82, %c0_83, %c0_84] : memref<1x1x256xf32, #tpu.memory_space<vmem>>, vector<1x1x256xf32>
    %197 = vector.shape_cast %196 : vector<1x1x256xf32> to vector<1x256xf32>
    %198 = vector.broadcast %197 : vector<1x256xf32> to vector<32x256xf32>
    %199 = arith.addf %195, %198 : vector<32x256xf32>
    %c0_85 = arith.constant 0 : index
    %c0_86 = arith.constant 0 : index
    %200 = vector.load %arg17[%c0_85, %c0_86] : memref<32x256xf32, #tpu.memory_space<vmem>>, vector<32x256xf32>
    tpu.vector_store %arg17[%c0_85, %c0_86], %199 {strides = array<i32>} : memref<32x256xf32, #tpu.memory_space<vmem>>, vector<32x256xf32>,
    return
  }
  func.func @transform_0(%arg0: i32) -> (i32, i32) {
    %c0_i32 = arith.constant 0 : i32
    %c0_i32_0 = arith.constant 0 : i32
    %c0_i32_1 = arith.constant 0 : i32
    return %c0_i32, %c0_i32_0 : i32, i32
  }
  func.func @transform_1(%arg0: i32) -> (i32, i32) {
    %c0_i32 = arith.constant 0 : i32
    %c0_i32_0 = arith.constant 0 : i32
    %c0_i32_1 = arith.constant 0 : i32
    return %c0_i32, %c0_i32_0 : i32, i32
  }
  func.func @transform_2(%arg0: i32) -> (i32, i32) {
    %c0_i32 = arith.constant 0 : i32
    %c0_i32_0 = arith.constant 0 : i32
    %c0_i32_1 = arith.constant 0 : i32
    return %c0_i32, %c0_i32_0 : i32, i32
  }
  func.func @transform_3(%arg0: i32) -> (i32, i32) {
    %c0_i32 = arith.constant 0 : i32
    %c0_i32_0 = arith.constant 0 : i32
    %c0_i32_1 = arith.constant 0 : i32
    return %c0_i32, %c0_i32_0 : i32, i32
  }
  func.func @transform_4(%arg0: i32) -> (i32, i32, i32) {
    %c0_i32 = arith.constant 0 : i32
    %c0_i32_0 = arith.constant 0 : i32
    %c0_i32_1 = arith.constant 0 : i32
    return %arg0, %c0_i32, %c0_i32_0 : i32, i32, i32
  }
  func.func @transform_5(%arg0: i32) -> (i32, i32, i32) {
    %c0_i32 = arith.constant 0 : i32
    %c0_i32_0 = arith.constant 0 : i32
    %c0_i32_1 = arith.constant 0 : i32
    return %arg0, %c0_i32, %c0_i32_0 : i32, i32, i32
  }
  func.func @transform_6(%arg0: i32) -> (i32, i32, i32) {
    %c0_i32 = arith.constant 0 : i32
    %c0_i32_0 = arith.constant 0 : i32
    %c0_i32_1 = arith.constant 0 : i32
    return %arg0, %c0_i32, %c0_i32_0 : i32, i32, i32
  }
  func.func @transform_7(%arg0: i32) -> (i32, i32, i32) {
    %c0_i32 = arith.constant 0 : i32
    %c0_i32_0 = arith.constant 0 : i32
    %c0_i32_1 = arith.constant 0 : i32
    return %arg0, %c0_i32, %c0_i32_0 : i32, i32, i32
  }
  func.func @transform_8(%arg0: i32) -> (i32, i32, i32) {
    %c0_i32 = arith.constant 0 : i32
    %c0_i32_0 = arith.constant 0 : i32
    %c0_i32_1 = arith.constant 0 : i32
    return %arg0, %c0_i32, %c0_i32_0 : i32, i32, i32
  }
  func.func @transform_9(%arg0: i32) -> (i32, i32, i32) {
    %c0_i32 = arith.constant 0 : i32
    %c0_i32_0 = arith.constant 0 : i32
    %c0_i32_1 = arith.constant 0 : i32
    return %arg0, %c0_i32, %c0_i32_0 : i32, i32, i32
  }
  func.func @transform_10(%arg0: i32) -> (i32, i32, i32) {
    %c0_i32 = arith.constant 0 : i32
    %c0_i32_0 = arith.constant 0 : i32
    %c0_i32_1 = arith.constant 0 : i32
    return %arg0, %c0_i32, %c0_i32_0 : i32, i32, i32
  }
  func.func @transform_11(%arg0: i32) -> (i32, i32, i32) {
    %c0_i32 = arith.constant 0 : i32
    %c0_i32_0 = arith.constant 0 : i32
    %c0_i32_1 = arith.constant 0 : i32
    return %arg0, %c0_i32, %c0_i32_0 : i32, i32, i32
  }
  func.func @transform_12(%arg0: i32) -> (i32, i32, i32) {
    %c0_i32 = arith.constant 0 : i32
    %c0_i32_0 = arith.constant 0 : i32
    %c0_i32_1 = arith.constant 0 : i32
    return %arg0, %c0_i32, %c0_i32_0 : i32, i32, i32
  }
  func.func @transform_13(%arg0: i32) -> (i32, i32, i32) {
    %c0_i32 = arith.constant 0 : i32
    %c0_i32_0 = arith.constant 0 : i32
    %c0_i32_1 = arith.constant 0 : i32
    return %arg0, %c0_i32, %c0_i32_0 : i32, i32, i32
  }
  func.func @transform_14(%arg0: i32) -> (i32, i32, i32) {
    %c0_i32 = arith.constant 0 : i32
    %c0_i32_0 = arith.constant 0 : i32
    %c0_i32_1 = arith.constant 0 : i32
    return %arg0, %c0_i32, %c0_i32_0 : i32, i32, i32
  }
  func.func @transform_15(%arg0: i32) -> (i32, i32, i32) {
    %c0_i32 = arith.constant 0 : i32
    %c0_i32_0 = arith.constant 0 : i32
    %c0_i32_1 = arith.constant 0 : i32
    return %arg0, %c0_i32, %c0_i32_0 : i32, i32, i32
  }
  func.func @transform_16(%arg0: i32) -> (i32, i32) {
    %c0_i32 = arith.constant 0 : i32
    %c0_i32_0 = arith.constant 0 : i32
    %c0_i32_1 = arith.constant 0 : i32
    return %c0_i32, %c0_i32_0 : i32, i32
  }
}

</mosaic_0001>

<bundles_post_ra>
// kernel: encoder_pallas.1
= control target key start
LH: loop header
LB: loop body
LE: loop exit
PB: predicated region body
PF: predicated region fallthrough
CT: control target
= control target key end

     0   :  { %s7299_s0 = inlined_call_operand.hbm [shape: f32[32,256], index: 0, kind: input, shape index: {}]   ;;  %s7300_s1 = inlined_call_operand.hbm [shape: f32[32,128], index: 1, kind: input, shape index: {}]   ;;  %s7301_s2 = inlined_call_operand.hbm [shape: f32[32,128], index: 2, kind: input, shape index: {}]   ;;  %s7302_s3 = inlined_call_operand.hbm [shape: f32[32,32], index: 3, kind: input, shape index: {}]   ;;  %s7303_s4 = inlined_call_operand.vmem [shape: f32[2,1,256], index: 4, kind: input, shape index: {}]   ;;  %s7304_s5 = inlined_call_operand.vmem [shape: f32[2,1,256], index: 5, kind: input, shape index: {}]   ;;  %s7305_s6 = inlined_call_operand.hbm [shape: bf16[2,256,768], index: 6, kind: input, shape index: {}]   ;;  %s7306_s7 = inlined_call_operand.vmem [shape: f32[2,1,768], index: 7, kind: input, shape index: {}]   ;;  %s7307_s8 = inlined_call_operand.hbm [shape: bf16[2,256,256], index: 8, kind: input, shape index: {}]   ;;  %s7308_s9 = inlined_call_operand.hbm [shape: f32[2,1,256], index: 9, kind: input, shape index: {}]   ;;  %s7309_s10 = inlined_call_operand.vmem [shape: f32[2,1,256], index: 10, kind: input, shape index: {}]   ;;  %s7310_s11 = inlined_call_operand.vmem [shape: f32[2,1,256], index: 11, kind: input, shape index: {}]   ;;  %s7311_s12 = inlined_call_operand.hbm [shape: bf16[2,256,512], index: 12, kind: input, shape index: {}]   ;;  %s7312_s13 = inlined_call_operand.vmem [shape: f32[2,1,512], index: 13, kind: input, shape index: {}]   ;;  %s7313_s14 = inlined_call_operand.hbm [shape: bf16[2,512,256], index: 14, kind: input, shape index: {}]   ;;  %s7314_s15 = inlined_call_operand.hbm [shape: f32[2,1,256], index: 15, kind: input, shape index: {}]   ;;  %s7315_s16 = inlined_call_operand.hbm [shape: f32[32,256], index: 16, kind: output, shape index: {}]  }
   0x1   :  { %7345 = sst [smem:[#allocation29_spill]] %s7299_s0 }
   0x2   :  { %7346 = sst [smem:[#allocation30_spill]] %s7300_s1 }
   0x3   :  { %7347 = sst [smem:[#allocation31_spill]] %s7301_s2 }
   0x4   :  { %7348 = sst [smem:[#allocation32_spill]] %s7302_s3 }
   0x5   :  { %7349 = sst [smem:[#allocation33_spill]] %s7303_s4 }
   0x6   :  { %7350 = sst [smem:[#allocation34_spill]] %s7304_s5 }
   0x7   :  { %7351 = sst [smem:[#allocation35_spill]] %s7305_s6 }
   0x8   :  { %7352 = sst [smem:[#allocation36_spill]] %s7306_s7 }
   0x9   :  { %7353 = sst [smem:[#allocation37_spill]] %s7307_s8 }
   0xa   :  { %7354 = sst [smem:[#allocation38_spill]] %s7308_s9 }
   0xb   :  { %7355 = sst [smem:[#allocation39_spill]] %s7309_s10 }
   0xc   :  { %7356 = sst [smem:[#allocation40_spill]] %s7310_s11 }
   0xd   :  { %7357 = sst [smem:[#allocation41_spill]] %s7311_s12 }
   0xe   :  { %7358 = sst [smem:[#allocation42_spill]] %s7312_s13 }
   0xf   :  { %7359 = sst [smem:[#allocation43_spill]] %s7315_s16 }
  0x10   :  { %21 = vsyncpa [#allocation3], 0 }
  0x11   :  { %22 = vsyncpa [#allocation6], 0 }
  0x12   :  { %23 = vsyncpa [#allocation9], 0 }
  0x13   :  { %24 = vsyncpa [#allocation4], 0  ;;  %s5801_s21 = smov 0   ;;  %s5803_s22 = smov 0  }
  0x14   :  { %s5805_s23 = smov 0   ;;  %s5807_s24 = smov 0  }
  0x15 LB: > { %7360 = sst [smem:[#allocation22_spill]] %s5686_s22  ;;  %s5820_s25 = sadd.s32 4294967295, %s5694_s24   ;;  %s5694_s24 = sphi %s5807_s24, %s7422_s24   ;;  %s5690_s23 = sphi %s5805_s23, %s7425_s23   ;;  %s5686_s22 = sphi %s5803_s22, %s7424_s22   ;;  %s5682_s21 = sphi %s5801_s21, %s7423_s21  }
  0x16   : > { %7361 = sst [smem:[#allocation23_spill]] %s5690_s23  ;;  %s5823_s26 = sadd.s32 1, %s5694_s24  }
  0x17   : > { %7362 = sst [smem:[#allocation24_spill]] %s5823_s26  ;;  %s170_s27 = ssub.s32 %s5694_s24, %s5823_s26 }
  0x18   : > { %s173_s28 = sadd.s32 1, %s5690_s23  ;;  %p171_p0 = scmp.eq.s32.totalorder %s170_s27, 0 }
  0x19   : > { %p180_p1 = scmp.ne.s32.totalorder %s5690_s23, %s5686_s22  ;;  %p181_p2 = scmp.eq.s32.totalorder %s5694_s24, 0 }
  0x1a   : > { %p186_p3 = scmp.ne.s32.totalorder %s5686_s22, %s5682_s21  ;;  %p7321_p5 = scmp.eq.s32.totalorder %s5820_s25, 0 }
  0x1b   : > { %s5833_s29 = scalar_select %p171_p0, %s5690_s23, %s173_s28  }
  0x1c   : > { %p5835_p4 = por %p181_p2, %p180_p1  ;;  %p4350_p6 = scmp.ge.s32.totalorder %s5694_s24, 1 }
  0x1d   : > { %7363 = sst [smem:[#allocation25_spill]] %s5833_s29  ;;  %p452_p7 = scmp.lt.s32.totalorder %s5694_s24, 3 }
  0x1e   : > { %s7364_s30 = scalar_select %p5835_p4, 1, 0 }
  0x1f   : > { %p5844_p8 = por %p7321_p5, %p186_p3  ;;  %p5849_p10 = pnand %p4350_p6, %p452_p7 }
  0x20   : > { %s5696_s18 = smov [#allocation2]   ;;  %s531_s21 = sand.u32 1, %s5694_s24  }
  0x21   : > { %s7365_s0 = scalar_select %p5844_p8, 1, 0 }
  0x22   : > { %s7367_s17 = scalar_select %p5849_p10, 1, 0 }
  0x23   : > { %7366 = sst [smem:[#allocation26_spill]] %s7365_s0  ;;  %s464_s19 = sshll.u32 %s5696_s18, 4  ;;  %s465_s19 = int_to_ptr.vmem [resolvable:$true] %s464_s19 }
  0x24   : > { %p4765_p11 = pneg %p5849_p10  ;;  %s5864_s27 = sand.u32 1, %s5690_s23  }
  0x25   : > { %s7369_s26 = sld [smem:[#allocation29_spill]] }
  0x26   : > { %p5857_p12 = pnand %p4765_p11, %p7321_p5 }
  0x28   : > { %s7368_s20 = scalar_select %p5857_p12, 1, 0 }
  0x29   : > { %p5874_p1 = pneg %p5857_p12 }
  0x2b   : > { %s5326_s16 = scalar_lea.hbm %s7369_s26, 1024 }
  0x2c   : > { %p5327_p0 = scmp.ne.s32.totalorder %s7369_s26, %s5326_s16  ;;  %p5333_p6 = scmp.lt.u32.totalorder %s5326_s16, %s7369_s26 }
  0x2d   : > { %s7370_s18 = scalar_select %p5874_p1, 1, 0 }
  0x2e   : > { %p5329_p2 = pnand %p5874_p1, %p5327_p0 }
  0x30   : > { %p5330_p3 = pneg %p5329_p2 }
  0x32   : > { %p5335_p7 = pnand %p5333_p6, %p5330_p3 }
  0x34   : > { %5338 = shalt.err (!%p5335_p7)
}
  0x35   : > { %s5339_s29 = scalar_lea.vmem %s465_s19, 1024  ;;  %p5347_p13 = scmp.lt.s32.totalorder %s465_s19, %s465_s19 }
  0x36   : > { %p5340_p11 = scmp.ne.s32.totalorder %s465_s19, %s5339_s29  ;;  %p5348_p8 = scmp.lt.s32.totalorder %s5339_s29, %s5339_s29 }
  0x38   : > { %p5342_p9 = pnand %p5340_p11, %p5874_p1  ;;  %p5349_p10 = por %p5348_p8, %p5347_p13 }
  0x3a   : > { %p5343_p5 = pneg %p5342_p9 }
  0x3c   : > { %p5350_p4 = pnand %p5349_p10, %p5343_p5 }
  0x3e   : > { %5353 = shalt.err (!%p5350_p4)
}
  0x3f   : > { %s7324_s11 = smov 256   ;;  %s7329_s10 = smov 16  }
  0x40   : > { %4768 = dma.hbm_to_vmem [thread:$0]  (!%p5857_p12), %s7369_s26, 1024, %s465_s19, [#allocation3], %s7324_s11, %s7324_s11, %s7329_s10  }
  0x41   : > { %s4729_s23 = smul.u32 768, %s5864_s27  ;;  %p7371_p9 = scmp.ne.s32.totalorder %s7364_s30, 0 }
  0x42   : > { %p7372_p8 = scmp.lt.s32.totalorder %s5694_s24, 2  ;;  %s4730_s29 = smul.u32 12288, %s5694_s24 }
  0x43   : > { %s7374_s6 = sld [smem:[#allocation35_spill]]  ;;  %s535_s13 = scalar_lea.vmem [#allocation10], %s4729_s23 }
  0x44   : > { %p5898_p5 = pnand %p7372_p8, %p7371_p9  ;;  %s542_s19 = sshll.u32 %s535_s13, 4  ;;  %s5908_s19 = int_to_ptr.vmem [resolvable:$true] %s542_s19 }
  0x45   : > { %s5910_s30 = scalar_lea.sflag [#allocation3], %s531_s21 }
  0x46   : > { %s7373_s28 = scalar_select %p5898_p5, 1, 0 }
  0x47   : > { %p5916_p10 = pneg %p5898_p5 }
  0x49   : > { %s5906_s4 = scalar_lea.hbm %s7374_s6, %s4730_s29  ;;  %s5359_s23 = scalar_lea.hbm %s7374_s6, 24576 }
  0x4a   : > { %s5354_s16 = scalar_lea.hbm %s5906_s4, 12288  ;;  %p5360_p2 = scmp.lt.u32.totalorder %s5906_s4, %s7374_s6 }
  0x4b   : > { %p5355_p4 = scmp.ne.s32.totalorder %s5906_s4, %s5354_s16  ;;  %p5361_p3 = scmp.lt.u32.totalorder %s5359_s23, %s5354_s16 }
  0x4c   : > { %s7375_s11 = scalar_select %p5916_p10, 1, 0 }
  0x4d   : > { %p5357_p13 = pnand %p5916_p10, %p5355_p4  ;;  %p5362_p6 = por %p5361_p3, %p5360_p2 }
  0x4e   : > { %p5363_p7 = scmp.lt.u32.totalorder %s5354_s16, %s5906_s4 }
  0x4f   : > { %p5358_p0 = pneg %p5357_p13 }
  0x50   : > { %p5364_p11 = por %p5363_p7, %p5362_p6 }
  0x52   : > { %p5365_p9 = pnand %p5364_p11, %p5358_p0 }
  0x54   : > { %5368 = shalt.err (!%p5365_p9)
}
  0x55   : > { %s5369_s21 = scalar_lea.vmem %s5908_s19, 12288  ;;  %s5699_s5 = smov [#allocation10]  }
  0x56   : > { %p5370_p8 = scmp.ne.s32.totalorder %s5908_s19, %s5369_s21  ;;  %s5374_s7 = sshll.u32 %s5699_s5, 4  ;;  %s5375_s7 = int_to_ptr.vmem [resolvable:$false] %s5374_s7 }
  0x57   : > { %s5376_s29 = scalar_lea.vmem %s5375_s7, 24576  ;;  %p5377_p12 = scmp.lt.s32.totalorder %s5908_s19, %s5375_s7 }
  0x58   : > { %p5372_p4 = pnand %p5370_p8, %p5916_p10  ;;  %p5378_p1 = scmp.lt.s32.totalorder %s5376_s29, %s5369_s21 }
  0x5a   : > { %p5373_p13 = pneg %p5372_p4  ;;  %p5379_p2 = por %p5378_p1, %p5377_p12 }
  0x5c   : > { %p5380_p3 = pnand %p5379_p2, %p5373_p13 }
  0x5e   : > { %5383 = shalt.err (!%p5380_p3)
}
  0x5f   : > { %s5700_s16 = smov 384   ;;  %s5701_s23 = smov 24  }
  0x60   : > { %4781 = dma.hbm_to_vmem [thread:$0]  (!%p5898_p5), %s5906_s4, 12288, %s5908_s19, %s5910_s30, %s5700_s16, %s5700_s16, %s5701_s23  }
  0x61   : > { %s4357_s13 = sshll.u32 %s5864_s27, 8  ;;  %s4668_s5 = sshll.u32 %s5694_s24, 12 }
  0x62   : > { %s7376_s8 = sld [smem:[#allocation37_spill]]  ;;  %s563_s29 = scalar_lea.vmem [#allocation11], %s4357_s13 }
  0x63   : > { %s570_s6 = sshll.u32 %s563_s29, 4  ;;  %s7336_s26 = sshll.u32 %s5864_s27, 1  ;;  %s5948_s6 = int_to_ptr.vmem [resolvable:$true] %s570_s6 }
  0x68   : > { %s5945_s21 = scalar_lea.hbm %s7376_s8, %s4668_s5  ;;  %s5389_s10 = scalar_lea.hbm %s7376_s8, 8192 }
  0x69   : > { %s5384_s0 = scalar_lea.hbm %s5945_s21, 4096  ;;  %p5390_p6 = scmp.lt.u32.totalorder %s5945_s21, %s7376_s8 }
  0x6a   : > { %p5385_p12 = scmp.ne.s32.totalorder %s5945_s21, %s5384_s0  ;;  %p5391_p7 = scmp.lt.u32.totalorder %s5389_s10, %s5384_s0 }
  0x6b   : > { %p5393_p9 = scmp.lt.u32.totalorder %s5384_s0, %s5945_s21 }
  0x6c   : > { %p5387_p1 = pnand %p5385_p12, %p5916_p10  ;;  %p5392_p11 = por %p5391_p7, %p5390_p6 }
  0x6e   : > { %p5388_p0 = pneg %p5387_p1  ;;  %p5394_p8 = por %p5393_p9, %p5392_p11 }
  0x70   : > { %p5395_p4 = pnand %p5394_p8, %p5388_p0 }
  0x72   : > { %5398 = shalt.err (!%p5395_p4)
}
  0x73   : > { %s5399_s13 = scalar_lea.vmem %s5948_s6, 4096  ;;  %s5702_s5 = smov [#allocation11]  }
  0x74   : > { %p5400_p13 = scmp.ne.s32.totalorder %s5948_s6, %s5399_s13  ;;  %s5404_s7 = sshll.u32 %s5702_s5, 4  ;;  %s5405_s7 = int_to_ptr.vmem [resolvable:$false] %s5404_s7 }
  0x75   : > { %s5406_s29 = scalar_lea.vmem %s5405_s7, 8192  ;;  %p5407_p12 = scmp.lt.s32.totalorder %s5948_s6, %s5405_s7 }
  0x76   : > { %p5402_p2 = pnand %p5400_p13, %p5916_p10  ;;  %p5408_p1 = scmp.lt.s32.totalorder %s5406_s29, %s5399_s13 }
  0x78   : > { %p5403_p3 = pneg %p5402_p2  ;;  %p5409_p6 = por %p5408_p1, %p5407_p12 }
  0x7a   : > { %p5410_p7 = pnand %p5409_p6, %p5403_p3 }
  0x7c   : > { %5413 = shalt.err (!%p5410_p7)
}
  0x7d   : > { %s5703_s0 = smov 128   ;;  %s5704_s4 = smov 8  }
  0x7e   : > { %4784 = dma.hbm_to_vmem [thread:$0]  (!%p5898_p5), %s5945_s21, 4096, %s5948_s6, %s5910_s30, %s5703_s0, %s5703_s0, %s5704_s4  }
  0x7f   : > { %s7337_s19 = sshll.u32 %s5694_s24, 5  ;;  %s584_s10 = scalar_lea.vmem [#allocation12], %s7336_s26 }
  0x80   : > { %s592_s16 = sshll.u32 %s584_s10, 4  ;;  %s7377_s9 = sld [smem:[#allocation38_spill]]  ;;  %s593_s16 = int_to_ptr.vmem [resolvable:$true] %s592_s16 }
  0x86   : > { %s590_s5 = scalar_lea.hbm %s7377_s9, %s7337_s19  ;;  %s5419_s22 = scalar_lea.hbm %s7377_s9, 64 }
  0x87   : > { %s5414_s7 = scalar_lea.hbm %s590_s5, 32  ;;  %p5420_p8 = scmp.lt.u32.totalorder %s590_s5, %s7377_s9 }
  0x88   : > { %p5415_p0 = scmp.ne.s32.totalorder %s590_s5, %s5414_s7  ;;  %p5421_p4 = scmp.lt.u32.totalorder %s5419_s22, %s5414_s7 }
  0x89   : > { %p5423_p2 = scmp.lt.u32.totalorder %s5414_s7, %s590_s5 }
  0x8a   : > { %p5417_p11 = pnand %p5415_p0, %p5916_p10  ;;  %p5422_p13 = por %p5421_p4, %p5420_p8 }
  0x8c   : > { %p5418_p9 = pneg %p5417_p11  ;;  %p5424_p3 = por %p5423_p2, %p5422_p13 }
  0x8e   : > { %p5425_p12 = pnand %p5424_p3, %p5418_p9 }
  0x90   : > { %5428 = shalt.err (!%p5425_p12)
}
  0x91   : > { %s5429_s10 = scalar_lea.vmem %s593_s16, 32  ;;  %s5705_s23 = smov [#allocation12]  }
  0x92   : > { %p5430_p1 = scmp.ne.s32.totalorder %s593_s16, %s5429_s10  ;;  %s5434_s13 = sshll.u32 %s5705_s23, 4  ;;  %s5435_s13 = int_to_ptr.vmem [resolvable:$false] %s5434_s13 }
  0x93   : > { %s5436_s8 = scalar_lea.vmem %s5435_s13, 64  ;;  %p5437_p0 = scmp.lt.s32.totalorder %s593_s16, %s5435_s13 }
  0x94   : > { %p5432_p6 = pnand %p5430_p1, %p5916_p10  ;;  %p5438_p11 = scmp.lt.s32.totalorder %s5436_s8, %s5429_s10 }
  0x96   : > { %p5433_p7 = pneg %p5432_p6  ;;  %p5439_p5 = por %p5438_p11, %p5437_p0 }
  0x98   : > { %p5440_p4 = pnand %p5439_p5, %p5433_p7 }
  0x9a   : > { %5443 = shalt.err (!%p5440_p4)
}
  0x9b   : > { %p7378_p8 = scmp.ne.s32.totalorder %s7373_s28, 0  ;;  %s7338_s22 = sshll.u32 %s5864_s27, 9 }
  0x9c   : > { %s7339_s7 = sshll.u32 %s5694_s24, 13  ;;  %s7379_s12 = sld [smem:[#allocation41_spill]] }
  0x9d   : > { %4787 = dma.hbm_to_vmem [thread:$0]  (!%p7378_p8), %s590_s5, 32, %s593_s16, %s5910_s30  }
  0x9e   : > { %s617_s10 = scalar_lea.vmem [#allocation13], %s7338_s22  ;;  %s5706_s13 = smov [#allocation5]  }
  0x9f   : > { %s624_s23 = sshll.u32 %s617_s10, 4  ;;  %s6009_s8 = sshll.u32 %s5706_s13, 4  ;;  %s6007_s23 = int_to_ptr.vmem [resolvable:$true] %s624_s23  ;;  %s478_s8 = int_to_ptr.vmem [resolvable:$true] %s6009_s8 }
  0xa2   : > { %s6003_s21 = scalar_lea.hbm %s7379_s12, %s7339_s7  ;;  %s5449_s6 = scalar_lea.hbm %s7379_s12, 16384 }
  0xa3   : > { %s5444_s16 = scalar_lea.hbm %s6003_s21, 8192  ;;  %p5450_p2 = scmp.lt.u32.totalorder %s6003_s21, %s7379_s12 }
  0xa4   : > { %p5445_p5 = scmp.ne.s32.totalorder %s6003_s21, %s5444_s16  ;;  %p5451_p3 = scmp.lt.u32.totalorder %s5449_s6, %s5444_s16 }
  0xa5   : > { %p5453_p1 = scmp.lt.u32.totalorder %s5444_s16, %s6003_s21 }
  0xa6   : > { %p5447_p9 = pnand %p5445_p5, %p5916_p10  ;;  %p5452_p12 = por %p5451_p3, %p5450_p2 }
  0xa8   : > { %p5448_p13 = pneg %p5447_p9  ;;  %p5454_p6 = por %p5453_p1, %p5452_p12 }
  0xaa   : > { %p5455_p7 = pnand %p5454_p6, %p5448_p13 }
  0xac   : > { %5458 = shalt.err (!%p5455_p7)
}
  0xad   : > { %s5459_s10 = scalar_lea.vmem %s6007_s23, 8192  ;;  %s5707_s13 = smov [#allocation13]  }
  0xae   : > { %p5460_p0 = scmp.ne.s32.totalorder %s6007_s23, %s5459_s10  ;;  %s5464_s5 = sshll.u32 %s5707_s13, 4  ;;  %s5465_s5 = int_to_ptr.vmem [resolvable:$false] %s5464_s5 }
  0xaf   : > { %s5466_s26 = scalar_lea.vmem %s5465_s5, 16384  ;;  %p5467_p5 = scmp.lt.s32.totalorder %s6007_s23, %s5465_s5 }
  0xb0   : > { %p5462_p11 = pnand %p5460_p0, %p5916_p10  ;;  %p5468_p9 = scmp.lt.s32.totalorder %s5466_s26, %s5459_s10 }
  0xb2   : > { %p5463_p4 = pneg %p5462_p11  ;;  %p5469_p2 = por %p5468_p9, %p5467_p5 }
  0xb4   : > { %p5470_p3 = pnand %p5469_p2, %p5463_p4 }
  0xb6   : > { %5473 = shalt.err (!%p5470_p3)
}
  0xb7   : > { %s7380_s19 = smov 16   ;;  %s7381_s16 = smov 256  }
  0xb8   : > { %4790 = dma.hbm_to_vmem [thread:$0]  (!%p7378_p8), %s6003_s21, 8192, %s6007_s23, %s5910_s30, %s7381_s16, %s7381_s16, %s7380_s19  }
  0xb9   : > { %s7382_s1 = sld [smem:[#allocation30_spill]]  ;;  %p7383_p12 = scmp.ne.s32.totalorder %s7370_s18, 0 }
  0xbf   : > { %s5474_s13 = scalar_lea.hbm %s7382_s1, 512 }
  0xc0   : > { %p5475_p13 = scmp.ne.s32.totalorder %s7382_s1, %s5474_s13  ;;  %p5481_p7 = scmp.lt.u32.totalorder %s5474_s13, %s7382_s1 }
  0xc2   : > { %p5477_p1 = pnand %p5475_p13, %p7383_p12 }
  0xc4   : > { %p5478_p6 = pneg %p5477_p1 }
  0xc6   : > { %p5483_p0 = pnand %p5481_p7, %p5478_p6 }
  0xc8   : > { %5486 = shalt.err (!%p5483_p0)
}
  0xc9   : > { %s5487_s7 = scalar_lea.vmem %s478_s8, 512  ;;  %p5495_p9 = scmp.lt.s32.totalorder %s478_s8, %s478_s8 }
  0xca   : > { %p5488_p11 = scmp.ne.s32.totalorder %s478_s8, %s5487_s7  ;;  %p5496_p2 = scmp.lt.s32.totalorder %s5487_s7, %s5487_s7 }
  0xcc   : > { %p5490_p4 = pnand %p5488_p11, %p7383_p12  ;;  %p5497_p3 = por %p5496_p2, %p5495_p9 }
  0xce   : > { %p5491_p5 = pneg %p5490_p4 }
  0xd0   : > { %p5498_p8 = pnand %p5497_p3, %p5491_p5 }
  0xd2   : > { %5501 = shalt.err (!%p5498_p8)
}
  0xd3   : > { %p7384_p13 = scmp.ne.s32.totalorder %s7368_s20, 0  ;;  %s7385_s23 = sshll.u32 %s5694_s24, 13 }
  0xd4   : > { %s6063_s7 = scalar_lea.hbm %s7313_s14, %s7385_s23  ;;  %s7386_s29 = sshll.u32 %s5864_s27, 9 }
  0xd5   : > { %4771 = dma.hbm_to_vmem [thread:$0]  (!%p7384_p13), %s7382_s1, 512, %s478_s8, [#allocation6], %s5703_s0, %s5703_s0, %s5704_s4  }
  0xd6   : > { %s645_s6 = scalar_lea.vmem [#allocation14], %s7386_s29  ;;  %s5502_s10 = scalar_lea.hbm %s6063_s7, 8192 }
  0xd7   : > { %s652_s13 = sshll.u32 %s645_s6, 4  ;;  %p5503_p8 = scmp.ne.s32.totalorder %s6063_s7, %s5502_s10  ;;  %s6067_s13 = int_to_ptr.vmem [resolvable:$true] %s652_s13 }
  0xd8   : > { %s5507_s26 = scalar_lea.hbm %s7313_s14, 16384  ;;  %p5508_p7 = scmp.lt.u32.totalorder %s6063_s7, %s7313_s14 }
  0xd9   : > { %p5505_p1 = pnand %p5503_p8, %p5916_p10  ;;  %p5509_p0 = scmp.lt.u32.totalorder %s5507_s26, %s5502_s10 }
  0xda   : > { %p5511_p4 = scmp.lt.u32.totalorder %s5502_s10, %s6063_s7 }
  0xdb   : > { %p5506_p6 = pneg %p5505_p1  ;;  %p5510_p11 = por %p5509_p0, %p5508_p7 }
  0xdd   : > { %p5512_p5 = por %p5511_p4, %p5510_p11 }
  0xdf   : > { %p5513_p9 = pnand %p5512_p5, %p5506_p6 }
  0xe1   : > { %5516 = shalt.err (!%p5513_p9)
}
  0xe2   : > { %s5517_s23 = scalar_lea.vmem %s6067_s13, 8192  ;;  %s5708_s19 = smov [#allocation14]  }
  0xe3   : > { %p5518_p2 = scmp.ne.s32.totalorder %s6067_s13, %s5517_s23  ;;  %s5522_s16 = sshll.u32 %s5708_s19, 4  ;;  %s5523_s16 = int_to_ptr.vmem [resolvable:$false] %s5522_s16 }
  0xe4   : > { %s5524_s29 = scalar_lea.vmem %s5523_s16, 16384  ;;  %p5525_p1 = scmp.lt.s32.totalorder %s6067_s13, %s5523_s16 }
  0xe5   : > { %p5520_p3 = pnand %p5518_p2, %p5916_p10  ;;  %p5526_p13 = scmp.lt.s32.totalorder %s5524_s29, %s5517_s23 }
  0xe7   : > { %p5521_p8 = pneg %p5520_p3  ;;  %p5527_p7 = por %p5526_p13, %p5525_p1 }
  0xe9   : > { %p5528_p0 = pnand %p5527_p7, %p5521_p8 }
  0xeb   : > { %5531 = shalt.err (!%p5528_p0)
}
  0xec   : > { %p7387_p6 = scmp.ne.s32.totalorder %s7373_s28, 0  ;;  %s5709_s6 = smov [#allocation7]  }
  0xed   : > { %s490_s10 = sshll.u32 %s5709_s6, 4  ;;  %s5710_s8 = smov [#allocation8]   ;;  %s491_s10 = int_to_ptr.vmem [resolvable:$true] %s490_s10 }
  0xee   : > { %4793 = dma.hbm_to_vmem [thread:$0]  (!%p7387_p6), %s6063_s7, 8192, %s6067_s13, %s5910_s30, %s5703_s0, %s5703_s0, %s5704_s4  }
  0xef   : > { %s503_s5 = sshll.u32 %s5710_s8, 4  ;;  %s7388_s2 = sld [smem:[#allocation31_spill]]  ;;  %s504_s5 = int_to_ptr.vmem [resolvable:$true] %s503_s5 }
  0xf5   : > { %s5532_s21 = scalar_lea.hbm %s7388_s2, 512 }
  0xf6   : > { %p5533_p13 = scmp.ne.s32.totalorder %s7388_s2, %s5532_s21  ;;  %p5539_p5 = scmp.lt.u32.totalorder %s5532_s21, %s7388_s2 }
  0xf8   : > { %p5535_p11 = pnand %p5533_p13, %p7383_p12 }
  0xfa   : > { %p5536_p4 = pneg %p5535_p11 }
  0xfc   : > { %p5541_p9 = pnand %p5539_p5, %p5536_p4 }
  0xfe   : > { %5544 = shalt.err (!%p5541_p9)
}
  0xff   : > { %s5545_s7 = scalar_lea.vmem %s491_s10, 512  ;;  %p5553_p1 = scmp.lt.s32.totalorder %s491_s10, %s491_s10 }
 0x100   : > { %p5546_p2 = scmp.ne.s32.totalorder %s491_s10, %s5545_s7  ;;  %p5554_p7 = scmp.lt.s32.totalorder %s5545_s7, %s5545_s7 }
 0x102   : > { %p5548_p3 = pnand %p5546_p2, %p7383_p12  ;;  %p5555_p0 = por %p5554_p7, %p5553_p1 }
 0x104   : > { %p5549_p8 = pneg %p5548_p3 }
 0x106   : > { %p5556_p6 = pnand %p5555_p0, %p5549_p8 }
 0x108   : > { %5559 = shalt.err (!%p5556_p6)
}
 0x109   : > { %p7389_p13 = scmp.ne.s32.totalorder %s7368_s20, 0  ;;  %s7390_s3 = sld [smem:[#allocation32_spill]] }
 0x10b   : > { %4774 = dma.hbm_to_vmem [thread:$0]  (!%p7389_p13), %s7388_s2, 512, %s491_s10, [#allocation6], %s5703_s0, %s5703_s0, %s5704_s4  }
 0x10f   : > { %s5560_s22 = scalar_lea.hbm %s7390_s3, 512 }
 0x110   : > { %p5561_p11 = scmp.ne.s32.totalorder %s7390_s3, %s5560_s22  ;;  %p5567_p5 = scmp.lt.u32.totalorder %s5560_s22, %s7390_s3 }
 0x112   : > { %p5563_p6 = pnand %p5561_p11, %p7383_p12 }
 0x114   : > { %p5564_p4 = pneg %p5563_p6 }
 0x116   : > { %p5569_p9 = pnand %p5567_p5, %p5564_p4 }
 0x118   : > { %5572 = shalt.err (!%p5569_p9)
}
 0x119   : > { %s5573_s29 = scalar_lea.vmem %s504_s5, 512  ;;  %p5581_p1 = scmp.lt.s32.totalorder %s504_s5, %s504_s5 }
 0x11a   : > { %p5574_p2 = scmp.ne.s32.totalorder %s504_s5, %s5573_s29  ;;  %p5582_p7 = scmp.lt.s32.totalorder %s5573_s29, %s5573_s29 }
 0x11c   : > { %p5576_p3 = pnand %p5574_p2, %p7383_p12  ;;  %p5583_p0 = por %p5582_p7, %p5581_p1 }
 0x11e   : > { %p5577_p8 = pneg %p5576_p3 }
 0x120   : > { %p5584_p10 = pnand %p5583_p0, %p5577_p8 }
 0x122   : > { %5587 = shalt.err (!%p5584_p10)
}
 0x123   : > { %4777 = dma.hbm_to_vmem [thread:$0]  (!%p7389_p13), %s7390_s3, 512, %s504_s5, [#allocation9], %s5703_s0, %s5703_s0, %s5704_s4  }
 0x124   : > { %s7391_s18 = sshll.u32 %s5694_s24, 5  ;;  %s7392_s26 = sshll.u32 %s5864_s27, 1 }
 0x125   : > { %s6141_s8 = scalar_lea.hbm %s7314_s15, %s7391_s18  ;;  %s666_s20 = scalar_lea.vmem [#allocation15], %s7392_s26 }
 0x126   : > { %s674_s22 = sshll.u32 %s666_s20, 4  ;;  %s5588_s21 = scalar_lea.hbm %s6141_s8, 32  ;;  %s675_s22 = int_to_ptr.vmem [resolvable:$true] %s674_s22 }
 0x127   : > { %p5589_p10 = scmp.ne.s32.totalorder %s6141_s8, %s5588_s21  ;;  %p7393_p12 = scmp.ne.s32.totalorder %s7375_s11, 0 }
 0x128   : > { %s5593_s4 = scalar_lea.hbm %s7314_s15, 64  ;;  %p5594_p13 = scmp.lt.u32.totalorder %s6141_s8, %s7314_s15 }
 0x129   : > { %p5591_p11 = pnand %p5589_p10, %p7393_p12  ;;  %p5595_p4 = scmp.lt.u32.totalorder %s5593_s4, %s5588_s21 }
 0x12a   : > { %p5597_p9 = scmp.lt.u32.totalorder %s5588_s21, %s6141_s8 }
 0x12b   : > { %p5592_p6 = pneg %p5591_p11  ;;  %p5596_p5 = por %p5595_p4, %p5594_p13 }
 0x12d   : > { %p5598_p2 = por %p5597_p9, %p5596_p5 }
 0x12f   : > { %p5599_p3 = pnand %p5598_p2, %p5592_p6 }
 0x131   : > { %5602 = shalt.err (!%p5599_p3)
}
 0x132   : > { %s5603_s27 = scalar_lea.vmem %s675_s22, 32  ;;  %s5711_s19 = smov [#allocation15]  }
 0x133   : > { %p5604_p8 = scmp.ne.s32.totalorder %s675_s22, %s5603_s27  ;;  %s5608_s16 = sshll.u32 %s5711_s19, 4  ;;  %s5609_s16 = int_to_ptr.vmem [resolvable:$false] %s5608_s16 }
 0x134   : > { %s5610_s29 = scalar_lea.vmem %s5609_s16, 64  ;;  %p5611_p0 = scmp.lt.s32.totalorder %s675_s22, %s5609_s16 }
 0x135   : > { %p5606_p1 = pnand %p5604_p8, %p7393_p12  ;;  %p5612_p10 = scmp.lt.s32.totalorder %s5610_s29, %s5603_s27 }
 0x137   : > { %p5607_p7 = pneg %p5606_p1  ;;  %p5613_p11 = por %p5612_p10, %p5611_p0 }
 0x139   : > { %p5614_p4 = pnand %p5613_p11, %p5607_p7 }
 0x13b   : > { %5617 = shalt.err (!%p5614_p4)
}
 0x13c   : > { %p7394_p13 = scmp.ne.s32.totalorder %s7373_s28, 0  ;;  %p7395_p6 = scmp.ne.s32.totalorder %s7367_s17, 0 }
 0x13e   : > { %4796 = dma.hbm_to_vmem [thread:$0]  (!%p7394_p13), %s6141_s8, 32, %s675_s22, %s5910_s30  }
 0x13f   : > { %683 = sbr.rel (%p7395_p6) target bundleno = 3034 (0xbda), region = 84 }
 0x146   : > { %p7396_p12 = scmp.eq.s32.totalorder %s5820_s25, 0 }
 0x148   : > { %5661 = dma.done.wait (%p7396_p12), [#allocation3], 1024   ;;  %p7397_p5 = pmov %p7396_p12 }
 0x14a   : > { %5663 = vsyncadd (%p7397_p5), [#allocation3], 4294966272  ;;  %p7398_p9 = pmov %p7397_p5 }
 0x14b   : > { %p7399_p2 = pmov %p7397_p5 }
 0x14c   : > { %5665 = dma.done.wait (%p7398_p9), [#allocation6], 1024  }
 0x14d   : > { %5667 = vsyncadd (%p7399_p2), [#allocation6], 4294966272  ;;  %p7400_p3 = pmov %p7399_p2 }
 0x14e   : > { %p7401_p8 = pmov %p7399_p2 }
 0x14f   : > { %5669 = dma.done.wait (%p7400_p3), [#allocation9], 512  }
 0x150   : > { %5671 = vsyncadd (%p7401_p8), [#allocation9], 4294966784  ;;  %s7402_s17 = sld [smem:[#allocation22_spill]]  ;;  %s7403_s11 = sld [smem:[#allocation26_spill]] }
 0x151   : > { %s701_s28 = sand.u32 1, %s5820_s25  }
 0x152   : > { %s702_s7 = scalar_lea.sflag [#allocation3], %s701_s28 }
 0x156   : > { %s703_s30 = sand.u32 1, %s7402_s17   ;;  %p7404_p1 = scmp.ne.s32.totalorder %s7403_s11, 0 }
 0x157   : > { %s4731_s10 = smul.u32 768, %s703_s30 }
 0x159   : > { %s6179_s18 = scalar_lea.vmem [#allocation10], %s4731_s10 }
 0x15a   : > { %5673 = dma.done.wait (%p7404_p1), %s702_s7, 32832  }
 0x15b   : > { %5675 = vsyncadd (%p7404_p1), %s702_s7, 4294934464  ;;  %s4377_s13 = sshll.u32 %s703_s30, 8  ;;  %s4378_s6 = sshll.u32 %s703_s30, 1 }
 0x15c   : > { %s4379_s8 = sshll.u32 %s703_s30, 9  ;;  %p843_p7 = scmp.lt.s32.totalorder %s5820_s25, 1 }
 0x15d   : > { %s7406_s27 = sld [smem:[#allocation34_spill]]  ;;  %s7407_s17 = sld [smem:[#allocation36_spill]] }
 0x15e   : > { %s844_s26 = scalar_select %p843_p7, %s5820_s25, 1 }
 0x15f   : > { %s7408_s10 = sld [smem:[#allocation39_spill]]  ;;  %s7409_s3 = sld [smem:[#allocation40_spill]] }
 0x160   : > { %s6187_s20 = sshll.u32 %s844_s26, 1  ;;  %s4732_s22 = smul.u32 6, %s844_s26 }
 0x161   : > { %s4386_s12 = sshll.u32 %s844_s26, 2  ;;  %s7410_s24 = sld [smem:[#allocation42_spill]] }
 0x162   : > { %s6215_s5 = scalar_lea.vmem [#allocation11], %s4377_s13  ;;  %s6217_s23 = scalar_lea.vmem [#allocation12], %s4378_s6 }
 0x163   : > { %s850_s19 = scalar_lea.vmem %s7406_s27, %s6187_s20  ;;  %s6200_s11 = scalar_lea.vmem %s7407_s17, %s4732_s22 }
 0x164   : > { %s6219_s22 = scalar_lea.vmem [#allocation13], %s4379_s8  ;;  %s6221_s27 = scalar_lea.vmem [#allocation14], %s4379_s8 }
 0x165   : > { %s858_s7 = scalar_lea.vmem %s7408_s10, %s6187_s20  ;;  %s862_s9 = scalar_lea.vmem %s7409_s3, %s6187_s20 }
 0x166   : > { %s6223_s16 = scalar_lea.vmem [#allocation15], %s4378_s6  ;;  %p7411_p0 = scmp.ne.s32.totalorder %s5820_s25, 0 }
 0x167   : > { %s6213_s4 = scalar_lea.vmem %s7410_s24, %s4386_s12  ;;  %v872_v0 = vld [vmem:[#allocation2] sm:$0xff] (!%p7411_p0)  ;;  %v873_v1 = vld [vmem:[#allocation2 + $0x8] sm:$0xff] (!%p7411_p0)  ;;  %v874_v2 = vld [vmem:[#allocation2 + $0x10] sm:$0xff] (!%p7411_p0) }
 0x168   : > { %871 = sbr.rel (%p7411_p0) target bundleno = 367 (0x16f), region = 128  ;;  %880 = vst [vmem:[#allocation16] sm:$0xff] (!%p7411_p0), %v872_v0  ;;  %881 = vst [vmem:[#allocation16 + $0x8] sm:$0xff] (!%p7411_p0), %v873_v1  ;;  %v875_v3 = vld [vmem:[#allocation2 + $0x18] sm:$0xff] (!%p7411_p0)  ;;  %v876_v4 = vld [vmem:[#allocation2 + $0x20] sm:$0xff] (!%p7411_p0) }
 0x169   : > { %882 = vst [vmem:[#allocation16 + $0x10] sm:$0xff] (!%p7411_p0), %v874_v2  ;;  %v877_v5 = vld [vmem:[#allocation2 + $0x28] sm:$0xff] (!%p7411_p0)  ;;  %883 = vst [vmem:[#allocation16 + $0x18] sm:$0xff] (!%p7411_p0), %v875_v3  ;;  %v878_v6 = vld [vmem:[#allocation2 + $0x30] sm:$0xff] (!%p7411_p0) }
 0x16a   : > { %884 = vst [vmem:[#allocation16 + $0x20] sm:$0xff] (!%p7411_p0), %v876_v4  ;;  %885 = vst [vmem:[#allocation16 + $0x28] sm:$0xff] (!%p7411_p0), %v877_v5  ;;  %v879_v7 = vld [vmem:[#allocation2 + $0x38] sm:$0xff] (!%p7411_p0) }
 0x16b   : > { %886 = vst [vmem:[#allocation16 + $0x30] sm:$0xff] (!%p7411_p0), %v878_v6  ;;  %887 = vst [vmem:[#allocation16 + $0x38] sm:$0xff] (!%p7411_p0), %v879_v7 }
 0x16f PF: > { %v6227_v8 = vld [vmem:[#allocation16] sm:$0xff]  ;;  %v6229_v9 = vld [vmem:[#allocation16 + $0x8] sm:$0xff]  ;;  %v4854_v20 = vld [vmem:[%s6179_s18 + $0x4] ss:$24 sps:$4 sm:$0xff]   ;;  %s7412_s3 = sld [smem:[#allocation33_spill]]  ;;  %vm1877_vm0 = vcmask 261120  }
 0x170   : > { %v910_v11 = vadd.f32 %v6229_v9, %v6227_v8  ;;  %v6237_v13 = vld [vmem:[#allocation16 + $0x10] sm:$0xff]  ;;  %v6239_v14 = vld [vmem:[#allocation16 + $0x18] sm:$0xff]  ;;  %v4857_v22 = vld [vmem:[%s6179_s18 + $0x14] ss:$24 sps:$4 sm:$0xff]   ;;  %1625 = vmatprep.subr.bf16.mxu1 %v4854_v20  ;;  %p4806_p10 = scmp.eq.s32.totalorder %s5820_s25, 1 }
 0x171   : > { %v6231_v10 = vld [vmem:[#allocation16 + $0x20] sm:$0xff]  ;;  %v6235_v12 = vld [vmem:[#allocation16 + $0x28] sm:$0xff]  ;;  %v913_v18 = vadd.f32 %v6239_v14, %v6237_v13  ;;  %v4856_v21 = vld [vmem:[%s6179_s18] ss:$24 sps:$4 sm:$0xff]   ;;  %1731 = vmatprep.subr.bf16.mxu0 %v4857_v22 }
 0x172   : > { %v916_v15 = vadd.f32 %v6235_v12, %v6231_v10  ;;  %v6243_v16 = vld [vmem:[#allocation16 + $0x30] sm:$0xff]  ;;  %v6245_v17 = vld [vmem:[#allocation16 + $0x38] sm:$0xff]  ;;  %911 = vadd.xlane.f32.xlu0 %v910_v11  ;;  %v4859_v23 = vld [vmem:[%s6179_s18 + $0x10] ss:$24 sps:$4 sm:$0xff]   ;;  %1626 = vmatpush1.bf16.msra.mxu1 %v4856_v21 }
 0x173   : > { %v919_v19 = vadd.f32 %v6245_v17, %v6243_v16  ;;  %v4860_v24 = vld [vmem:[%s6179_s18 + $0x34] ss:$24 sps:$4 sm:$0xff]   ;;  %v4863_v25 = vld [vmem:[%s6179_s18 + $0x44] ss:$24 sps:$4 sm:$0xff]   ;;  %1732 = vmatpush1.bf16.msra.mxu0 %v4859_v23  ;;  %v4862_v26 = vld [vmem:[%s6179_s18 + $0x30] ss:$24 sps:$4 sm:$0xff]  }
 0x174   : > { %917 = vadd.xlane.f32.xlu1 %v916_v15  ;;  %v4865_v27 = vld [vmem:[%s6179_s18 + $0x40] ss:$24 sps:$4 sm:$0xff]   ;;  %1627 = vmatprep.subr.bf16.mxu1 %v4860_v24  ;;  %v4866_v28 = vld [vmem:[%s6179_s18 + $0x64] ss:$24 sps:$4 sm:$0xff]   ;;  %v4869_v29 = vld [vmem:[%s6179_s18 + $0x74] ss:$24 sps:$4 sm:$0xff]  }
 0x175   : > { %1733 = vmatprep.subr.bf16.mxu0 %v4863_v25  ;;  %v4868_v30 = vld [vmem:[%s6179_s18 + $0x60] ss:$24 sps:$4 sm:$0xff]   ;;  %v4871_v31 = vld [vmem:[%s6179_s18 + $0x70] ss:$24 sps:$4 sm:$0xff]   ;;  %v4872_v32 = vld [vmem:[%s6179_s18 + $0x94] ss:$24 sps:$4 sm:$0xff]   ;;  %s7413_s12 = scalar_lea.vmem %s7412_s3, %s6187_s20 }
 0x176   : > { %914 = vadd.xlane.f32.xlu0 %v913_v18  ;;  %1628 = vmatpush1.bf16.msra.mxu1 %v4862_v26  ;;  %v4875_v33 = vld [vmem:[%s6179_s18 + $0xa4] ss:$24 sps:$4 sm:$0xff]   ;;  %v4874_v34 = vld [vmem:[%s6179_s18 + $0x90] ss:$24 sps:$4 sm:$0xff]   ;;  %v4877_v35 = vld [vmem:[%s6179_s18 + $0xa0] ss:$24 sps:$4 sm:$0xff]  }
 0x177   : > { %1734 = vmatpush1.bf16.msra.mxu0 %v4865_v27  ;;  %1629 = vmatprep.subr.bf16.mxu1 %v4866_v28  ;;  %v4878_v36 = vld [vmem:[%s6179_s18 + $0xc4] ss:$24 sps:$4 sm:$0xff]   ;;  %v4881_v37 = vld [vmem:[%s6179_s18 + $0xd4] ss:$24 sps:$4 sm:$0xff]   ;;  %v4880_v38 = vld [vmem:[%s6179_s18 + $0xc0] ss:$24 sps:$4 sm:$0xff]  }
 0x178   : > { %920 = vadd.xlane.f32.xlu1 %v919_v19  ;;  %1735 = vmatprep.subr.bf16.mxu0 %v4869_v29  ;;  %v4883_v39 = vld [vmem:[%s6179_s18 + $0xd0] ss:$24 sps:$4 sm:$0xff]   ;;  %v4884_v40 = vld [vmem:[%s6179_s18 + $0xf4] ss:$24 sps:$4 sm:$0xff]   ;;  %v4887_v41 = vld [vmem:[%s6179_s18 + $0x104] ss:$24 sps:$4 sm:$0xff]  }
 0x179   : > { %v4886_v42 = vld [vmem:[%s6179_s18 + $0xf0] ss:$24 sps:$4 sm:$0xff]   ;;  %v4889_v43 = vld [vmem:[%s6179_s18 + $0x100] ss:$24 sps:$4 sm:$0xff]   ;;  %v4890_v44 = vld [vmem:[%s6179_s18 + $0x124] ss:$24 sps:$4 sm:$0xff]  }
 0x17a   : > { %1630 = vmatpush1.bf16.msra.mxu1 %v4868_v30  ;;  %v4893_v45 = vld [vmem:[%s6179_s18 + $0x134] ss:$24 sps:$4 sm:$0xff]   ;;  %v4892_v46 = vld [vmem:[%s6179_s18 + $0x120] ss:$24 sps:$4 sm:$0xff]   ;;  %v4895_v47 = vld [vmem:[%s6179_s18 + $0x130] ss:$24 sps:$4 sm:$0xff]  }
 0x17b   : > { %1736 = vmatpush1.bf16.msra.mxu0 %v4871_v31  ;;  %1631 = vmatprep.subr.bf16.mxu1 %v4872_v32  ;;  %v4896_v48 = vld [vmem:[%s6179_s18 + $0x154] ss:$24 sps:$4 sm:$0xff]   ;;  %v4899_v49 = vld [vmem:[%s6179_s18 + $0x164] ss:$24 sps:$4 sm:$0xff]   ;;  %v4898_v50 = vld [vmem:[%s6179_s18 + $0x150] ss:$24 sps:$4 sm:$0xff]  }
 0x17c   : > { %1737 = vmatprep.subr.bf16.mxu0 %v4875_v33  ;;  %v4901_v51 = vld [vmem:[%s6179_s18 + $0x160] ss:$24 sps:$4 sm:$0xff]   ;;  %v4902_v52 = vld [vmem:[%s6179_s18 + $0x184] ss:$24 sps:$4 sm:$0xff]   ;;  %v4905_v53 = vld [vmem:[%s6179_s18 + $0x194] ss:$24 sps:$4 sm:$0xff]  }
 0x17d   : > { %v4904_v54 = vld [vmem:[%s6179_s18 + $0x180] ss:$24 sps:$4 sm:$0xff]   ;;  %v4907_v55 = vld [vmem:[%s6179_s18 + $0x190] ss:$24 sps:$4 sm:$0xff]   ;;  %v4908_v56 = vld [vmem:[%s6179_s18 + $0x1b4] ss:$24 sps:$4 sm:$0xff]  }
 0x17e   : > { %1632 = vmatpush1.bf16.msra.mxu1 %v4874_v34  ;;  %v4910_v21 = vld [vmem:[%s6179_s18 + $0x1b0] ss:$24 sps:$4 sm:$0xff]   ;;  %v4911_v22 = vld [vmem:[%s6179_s18 + $0x1c4] ss:$24 sps:$4 sm:$0xff]   ;;  %v4913_v23 = vld [vmem:[%s6179_s18 + $0x1c0] ss:$24 sps:$4 sm:$0xff]  }
 0x17f   : > { %1738 = vmatpush1.bf16.msra.mxu0 %v4877_v35  ;;  %1633 = vmatprep.subr.bf16.mxu1 %v4878_v36  ;;  %v4914_v24 = vld [vmem:[%s6179_s18 + $0x1e4] ss:$24 sps:$4 sm:$0xff]   ;;  %v4916_v25 = vld [vmem:[%s6179_s18 + $0x1e0] ss:$24 sps:$4 sm:$0xff]   ;;  %v4917_v26 = vld [vmem:[%s6179_s18 + $0x1f4] ss:$24 sps:$4 sm:$0xff]  }
 0x180   : > { %1739 = vmatprep.subr.bf16.mxu0 %v4881_v37  ;;  %v4919_v27 = vld [vmem:[%s6179_s18 + $0x1f0] ss:$24 sps:$4 sm:$0xff]   ;;  %v4920_v28 = vld [vmem:[%s6179_s18 + $0x214] ss:$24 sps:$4 sm:$0xff]   ;;  %v4923_v30 = vld [vmem:[%s6179_s18 + $0x224] ss:$24 sps:$4 sm:$0xff]  }
 0x181   : > { %v4922_v29 = vld [vmem:[%s6179_s18 + $0x210] ss:$24 sps:$4 sm:$0xff]   ;;  %v4925_v31 = vld [vmem:[%s6179_s18 + $0x220] ss:$24 sps:$4 sm:$0xff]   ;;  %v4926_v32 = vld [vmem:[%s6179_s18 + $0x244] ss:$24 sps:$4 sm:$0xff]  }
 0x182   : > { %1634 = vmatpush1.bf16.msra.mxu1 %v4880_v38  ;;  %v4928_v33 = vld [vmem:[%s6179_s18 + $0x240] ss:$24 sps:$4 sm:$0xff]   ;;  %v4929_v34 = vld [vmem:[%s6179_s18 + $0x254] ss:$24 sps:$4 sm:$0xff]   ;;  %v4931_v35 = vld [vmem:[%s6179_s18 + $0x250] ss:$24 sps:$4 sm:$0xff]  }
 0x183   : > { %1740 = vmatpush1.bf16.msra.mxu0 %v4883_v39  ;;  %1635 = vmatprep.subr.bf16.mxu1 %v4884_v40  ;;  %v4932_v36 = vld [vmem:[%s6179_s18 + $0x274] ss:$24 sps:$4 sm:$0xff]   ;;  %v4934_v37 = vld [vmem:[%s6179_s18 + $0x270] ss:$24 sps:$4 sm:$0xff]   ;;  %v4935_v38 = vld [vmem:[%s6179_s18 + $0x284] ss:$24 sps:$4 sm:$0xff]  }
 0x184   : > { %1741 = vmatprep.subr.bf16.mxu0 %v4887_v41  ;;  %v4937_v39 = vld [vmem:[%s6179_s18 + $0x280] ss:$24 sps:$4 sm:$0xff]   ;;  %v4938_v40 = vld [vmem:[%s6179_s18 + $0x2a4] ss:$24 sps:$4 sm:$0xff]   ;;  %v4941_v41 = vld [vmem:[%s6179_s18 + $0x2b4] ss:$24 sps:$4 sm:$0xff]  }
 0x186   : > { %1636 = vmatpush1.bf16.msra.mxu1 %v4886_v42  ;;  %v4940_v42 = vld [vmem:[%s6179_s18 + $0x2a0] ss:$24 sps:$4 sm:$0xff]  }
 0x187   : > { %1742 = vmatpush1.bf16.msra.mxu0 %v4889_v43  ;;  %1637 = vmatprep.subr.bf16.mxu1 %v4890_v44  ;;  %v4943_v43 = vld [vmem:[%s6179_s18 + $0x2b0] ss:$24 sps:$4 sm:$0xff]   ;;  %v4944_v44 = vld [vmem:[%s6179_s18 + $0x2d4] ss:$24 sps:$4 sm:$0xff]  }
 0x188   : > { %1743 = vmatprep.subr.bf16.mxu0 %v4893_v45  ;;  %v4947_v45 = vld [vmem:[%s6179_s18 + $0x2e4] ss:$24 sps:$4 sm:$0xff]  }
 0x18a   : > { %1638 = vmatpush1.bf16.msra.mxu1 %v4892_v46  ;;  %v4946_v46 = vld [vmem:[%s6179_s18 + $0x2d0] ss:$24 sps:$4 sm:$0xff]  }
 0x18b   : > { %1744 = vmatpush1.bf16.msra.mxu0 %v4895_v47  ;;  %1639 = vmatprep.subr.bf16.mxu1 %v4896_v48  ;;  %v4949_v47 = vld [vmem:[%s6179_s18 + $0x2e0] ss:$24 sps:$4 sm:$0xff]   ;;  %v4952_v48 = vld [vmem:[%s6179_s18 + $0xc] ss:$24 sps:$4 sm:$0xff]  }
 0x18c   : > { %1745 = vmatprep.subr.bf16.mxu0 %v4899_v49 }
 0x18e   : > { %1640 = vmatpush1.bf16.msra.mxu1 %v4898_v50 }
 0x18f   : > { %1746 = vmatpush1.bf16.msra.mxu0 %v4901_v51  ;;  %1641 = vmatprep.subr.bf16.mxu1 %v4902_v52  ;;  %v976_v52 = vlaneseq }
 0x190   : > { %1747 = vmatprep.subr.bf16.mxu0 %v4905_v53 }
 0x192   : > { %1642 = vmatpush1.bf16.msra.mxu1 %v4904_v54 }
 0x193   : > { %1748 = vmatpush1.bf16.msra.mxu0 %v4907_v55  ;;  %1643 = vmatprep.subr.bf16.mxu1 %v4908_v56 }
 0x194   : > { %1749 = vmatprep.subr.bf16.mxu0 %v4911_v22 }
 0x196   : > { %1644 = vmatpush1.bf16.msra.mxu1 %v4910_v21 }
 0x197   : > { %1750 = vmatpush1.bf16.msra.mxu0 %v4913_v23  ;;  %1645 = vmatprep.subr.bf16.mxu1 %v4914_v24 }
 0x198   : > { %1751 = vmatprep.subr.bf16.mxu0 %v4917_v26 }
 0x19a   : > { %1646 = vmatpush1.bf16.msra.mxu1 %v4916_v25 }
 0x19b   : > { %1752 = vmatpush1.bf16.msra.mxu0 %v4919_v27  ;;  %1647 = vmatprep.subr.bf16.mxu1 %v4920_v28 }
 0x19c   : > { %1753 = vmatprep.subr.bf16.mxu0 %v4923_v30 }
 0x19e   : > { %1648 = vmatpush1.bf16.msra.mxu1 %v4922_v29 }
 0x19f   : > { %1754 = vmatpush1.bf16.msra.mxu0 %v4925_v31  ;;  %1649 = vmatprep.subr.bf16.mxu1 %v4926_v32 }
 0x1a0   : > { %1755 = vmatprep.subr.bf16.mxu0 %v4929_v34 }
 0x1a2   : > { %1650 = vmatpush1.bf16.msra.mxu1 %v4928_v33 }
 0x1a3   : > { %1756 = vmatpush1.bf16.msra.mxu0 %v4931_v35  ;;  %1651 = vmatprep.subr.bf16.mxu1 %v4932_v36  ;;  %v4955_v35 = vld [vmem:[%s6179_s18 + $0x3c] ss:$24 sps:$4 sm:$0xff]  }
 0x1a4   : > { %1757 = vmatprep.subr.bf16.mxu0 %v4935_v38 }
 0x1a6   : > { %1652 = vmatpush1.bf16.msra.mxu1 %v4934_v37 }
 0x1a7   : > { %1758 = vmatpush1.bf16.msra.mxu0 %v4937_v39  ;;  %1653 = vmatprep.subr.bf16.mxu1 %v4938_v40  ;;  %v4958_v39 = vld [vmem:[%s6179_s18 + $0x6c] ss:$24 sps:$4 sm:$0xff]  }
 0x1a8   : > { %1759 = vmatprep.subr.bf16.mxu0 %v4941_v41 }
 0x1aa   : > { %1654 = vmatpush1.bf16.msra.mxu1 %v4940_v42  ;;  %v4956_v42 = vld [vmem:[%s6179_s18 + $0x68] ss:$24 sps:$4 sm:$0xff]  }
 0x1ab   : > { %1760 = vmatpush1.bf16.msra.mxu0 %v4943_v43  ;;  %1655 = vmatprep.subr.bf16.mxu1 %v4944_v44  ;;  %v4961_v44 = vld [vmem:[%s6179_s18 + $0x9c] ss:$24 sps:$4 sm:$0xff]  }
 0x1ac   : > { %1761 = vmatprep.subr.bf16.mxu0 %v4947_v45  ;;  %v4959_v45 = vld [vmem:[%s6179_s18 + $0x98] ss:$24 sps:$4 sm:$0xff]  }
 0x1ae   : > { %1656 = vmatpush1.bf16.msra.mxu1 %v4946_v46  ;;  %v4964_v46 = vld [vmem:[%s6179_s18 + $0xcc] ss:$24 sps:$4 sm:$0xff]  }
 0x1af   : > { %1762 = vmatpush1.bf16.msra.mxu0 %v4949_v47  ;;  %1678 = vmatprep.subr.bf16.mxu1 %v4952_v48  ;;  %v4962_v47 = vld [vmem:[%s6179_s18 + $0xc8] ss:$24 sps:$4 sm:$0xff]   ;;  %v4967_v48 = vld [vmem:[%s6179_s18 + $0xfc] ss:$24 sps:$4 sm:$0xff]  }
 0x1ff   : > { %v912_v57 = vpop.xlane.xlu0 %911 }
 0x200   : > { %v923_v58 = vmul.f32 0.00390625, %v912_v57 }
 0x201   : > { %v918_v59 = vpop.xlane.xlu1 %917 }
 0x202   : > { %v925_v60 = vmul.f32 0.00390625, %v918_v59  ;;  %v6289_v61 = vsub.f32 %v6227_v8, %v923_v58  ;;  %v6292_v62 = vsub.f32 %v6229_v9, %v923_v58  ;;  %v6356_v59 = vshrl.u32 %v976_v52, 7  ;;  %v4973_v52 = vld [vmem:[%s6179_s18 + $0x15c] ss:$24 sps:$4 sm:$0xff]  }
 0x203   : > { %v915_v1 = vpop.xlane.xlu0 %914 }
 0x204   : > { %v6295_v63 = vsub.f32 %v6231_v10, %v925_v60  ;;  %v6298_v0 = vsub.f32 %v6235_v12, %v925_v60  ;;  %v924_v2 = vmul.f32 0.00390625, %v915_v1  ;;  %v935_v4 = vmul.f32 %v6289_v61, %v6289_v61 }
 0x205   : > { %v921_v3 = vpop.xlane.xlu1 %920  ;;  %v936_v5 = vmul.f32 %v6292_v62, %v6292_v62 }
 0x206   : > { %v926_v6 = vmul.f32 0.00390625, %v921_v3  ;;  %v939_v7 = vmul.f32 %v6295_v63, %v6295_v63  ;;  %v940_v8 = vmul.f32 %v6298_v0, %v6298_v0  ;;  %v6309_v9 = vsub.f32 %v6237_v13, %v924_v2 }
 0x207   : > { %v6312_v10 = vsub.f32 %v6239_v14, %v924_v2  ;;  %v943_v11 = vadd.f32 %v936_v5, %v935_v4  ;;  %v6359_v3 = vsub.s32 1, %v6356_v59  ;;  %v6362_v4 = vsub.s32 0, %v6356_v59  ;;  %v908_v5 = vld [vmem:[%s7413_s12] sm:$0x3] }
 0x208   : > { %v6315_v12 = vsub.f32 %v6243_v16, %v926_v6  ;;  %v6318_v15 = vsub.f32 %v6245_v17, %v926_v6  ;;  %v949_v18 = vadd.f32 %v940_v8, %v939_v7  ;;  %v937_v13 = vmul.f32 %v6309_v9, %v6309_v9 }
 0x209   : > { %944 = vadd.xlane.f32.xlu0 %v943_v11  ;;  %v938_v19 = vmul.f32 %v6312_v10, %v6312_v10  ;;  %v983_v7 = vrot.slane %v908_v5, %v6359_v3  ;;  %v979_v8 = vrot.slane %v908_v5, %v6362_v4  ;;  %v909_v11 = vld [vmem:[%s850_s19] sm:$0x3]  ;;  %v4988_v5 = vld [vmem:[%s6179_s18 + $0x24c] ss:$24 sps:$4 sm:$0xff]  }
 0x20a   : > { %v941_v14 = vmul.f32 %v6315_v12, %v6315_v12  ;;  %v942_v16 = vmul.f32 %v6318_v15, %v6318_v15 }
 0x20b   : > { %v946_v17 = vadd.f32 %v938_v19, %v937_v13 }
 0x20c   : > { %v952_v20 = vadd.f32 %v942_v16, %v941_v14  ;;  %v1002_v16 = vrot.slane %v909_v11, %v6359_v3 }
 0x20d   : > { %950 = vadd.xlane.f32.xlu0 %v949_v18  ;;  %947 = vadd.xlane.f32.xlu1 %v946_v17 }
 0x211   : > { %953 = vadd.xlane.f32.xlu1 %v952_v20  ;;  %v998_v20 = vrot.slane %v909_v11, %v6362_v4  ;;  %v4994_v11 = vld [vmem:[%s6179_s18 + $0x2ac] ss:$24 sps:$4 sm:$0xff]  }
 0x296   : > { %v945_v49 = vpop.xlane.xlu0 %944 }
 0x297   : > { %v955_v50 = vmul.f32 0.00390625, %v945_v49  ;;  %v4965_v49 = vld [vmem:[%s6179_s18 + $0xf8] ss:$24 sps:$4 sm:$0xff]  }
 0x299   : > { %v959_v51 = vadd.f32 1e-05, %v955_v50  ;;  %v4970_v50 = vld [vmem:[%s6179_s18 + $0x12c] ss:$24 sps:$4 sm:$0xff]  }
 0x29a   : > { %v948_v53 = vpop.xlane.xlu1 %947  ;;  %v951_v54 = vpop.xlane.xlu0 %950 }
 0x29b   : > { %5238 = vrsqrt.f32 %v959_v51  ;;  %v956_v55 = vmul.f32 0.00390625, %v948_v53  ;;  %v957_v56 = vmul.f32 0.00390625, %v951_v54  ;;  %v4968_v51 = vld [vmem:[%s6179_s18 + $0x128] ss:$24 sps:$4 sm:$0xff]   ;;  %v4971_v53 = vld [vmem:[%s6179_s18 + $0x158] ss:$24 sps:$4 sm:$0xff]  }
 0x29c   : > { %v4976_v54 = vld [vmem:[%s6179_s18 + $0x18c] ss:$24 sps:$4 sm:$0xff]  }
 0x29d   : > { %v960_v57 = vadd.f32 1e-05, %v956_v55  ;;  %v961_v58 = vadd.f32 1e-05, %v957_v56  ;;  %v4974_v55 = vld [vmem:[%s6179_s18 + $0x188] ss:$24 sps:$4 sm:$0xff]  }
 0x29e   : > { %v954_v60 = vpop.xlane.xlu1 %953  ;;  %v4979_v56 = vld [vmem:[%s6179_s18 + $0x1bc] ss:$24 sps:$4 sm:$0xff]  }
 0x29f   : > { %5240 = vrsqrt.f32 %v960_v57  ;;  %v958_v1 = vmul.f32 0.00390625, %v954_v60  ;;  %v4977_v57 = vld [vmem:[%s6179_s18 + $0x1b8] ss:$24 sps:$4 sm:$0xff]   ;;  %v4980_v60 = vld [vmem:[%s6179_s18 + $0x1e8] ss:$24 sps:$4 sm:$0xff]  }
 0x2a0   : > { %5242 = vrsqrt.f32 %v961_v58  ;;  %v4982_v58 = vld [vmem:[%s6179_s18 + $0x1ec] ss:$24 sps:$4 sm:$0xff]  }
 0x2a1   : > { %v962_v2 = vadd.f32 1e-05, %v958_v1  ;;  %v4985_v1 = vld [vmem:[%s6179_s18 + $0x21c] ss:$24 sps:$4 sm:$0xff]  }
 0x2a3   : > { %5244 = vrsqrt.f32 %v962_v2  ;;  %v4983_v2 = vld [vmem:[%s6179_s18 + $0x218] ss:$24 sps:$4 sm:$0xff]  }
 0x2a5   : > { %v5239_v6 = vpop.eup %5238 }
 0x2a6   : > { %v968_v18 = vmul.f32 %v5239_v6, %v6292_v62  ;;  %v967_v13 = vmul.f32 %v5239_v6, %v6289_v61  ;;  %v4986_v6 = vld [vmem:[%s6179_s18 + $0x248] ss:$24 sps:$4 sm:$0xff]  }
 0x2a8   : > { %v987_v14 = vmul.f32 %v983_v7, %v968_v18  ;;  %v986_v17 = vmul.f32 %v979_v8, %v967_v13  ;;  %v4992_v18 = vld [vmem:[%s6179_s18 + $0x2a8] ss:$24 sps:$4 sm:$0xff]   ;;  %v4997_v13 = vld [vmem:[%s6179_s18 + $0x2dc] ss:$24 sps:$4 sm:$0xff]  }
 0x2a9   : > { %v5241_v19 = vpop.eup %5240 }
 0x2aa   : > { %v5243_v21 = vpop.eup %5242  ;;  %v970_v22 = vmul.f32 %v5241_v19, %v6312_v10  ;;  %v969_v23 = vmul.f32 %v5241_v19, %v6309_v9  ;;  %v1006_v61 = vadd.f32 %v1002_v16, %v987_v14  ;;  %v1005_v27 = vadd.f32 %v998_v20, %v986_v17  ;;  %v4950_v9 = vld [vmem:[%s6179_s18 + $0x8] ss:$24 sps:$4 sm:$0xff]   ;;  %v4995_v19 = vld [vmem:[%s6179_s18 + $0x2d8] ss:$24 sps:$4 sm:$0xff]  }
 0x2ab   : > { %v972_v24 = vmul.f32 %v5243_v21, %v6298_v0  ;;  %v971_v33 = vmul.f32 %v5243_v21, %v6295_v63  ;;  %v6428_v14 = vld [vmem:[%s6200_s11] sm:$0x3f]  ;;  %v1137_v17 = vsub.s32 5, %v6356_v59 }
 0x2ac   : > { %v989_v25 = vmul.f32 %v983_v7, %v970_v22  ;;  %v988_v62 = vmul.f32 %v979_v8, %v969_v23 }
 0x2ad   : > { %v5245_v26 = vpop.eup %5244  ;;  %v991_v28 = vmul.f32 %v983_v7, %v972_v24  ;;  %v990_v63 = vmul.f32 %v979_v8, %v971_v33  ;;  %v1138_v24 = vrot.slane %v6428_v14, %v1137_v17  ;;  %v900_v17 = vld [vmem:[#allocation7] sm:$0xff] }
 0x2ae   : > { %v1008_v29 = vadd.f32 %v1002_v16, %v989_v25  ;;  %v1007_v30 = vadd.f32 %v998_v20, %v988_v62  ;;  %v974_v31 = vmul.f32 %v5245_v26, %v6318_v15  ;;  %v973_v32 = vmul.f32 %v5245_v26, %v6315_v12  ;;  %v4953_v15 = vld [vmem:[%s6179_s18 + $0x38] ss:$24 sps:$4 sm:$0xff]  }
 0x2af   : > { %v1010_v37 = vadd.f32 %v1002_v16, %v991_v28  ;;  %v1009_v41 = vadd.f32 %v998_v20, %v990_v63 }
 0x2b0   : > { %v1110_v10 = vpack.c.bf16 %v1008_v29, %v1006_v61  ;;  %v6387_v0 = vpack.c.bf16 %v1007_v30, %v1005_v27  ;;  %v993_v34 = vmul.f32 %v983_v7, %v974_v31  ;;  %v992_v36 = vmul.f32 %v979_v8, %v973_v32  ;;  %v4991_v7 = vld [vmem:[%s6179_s18 + $0x27c] ss:$24 sps:$4 sm:$0xff]   ;;  %v4989_v8 = vld [vmem:[%s6179_s18 + $0x278] ss:$24 sps:$4 sm:$0xff]   ;;  %s5712_s18 = smov 64  }
 0x2b2   : > { %1657 = vmatprep.mubr.bf16.mxu1 %v1110_v10  ;;  %1763 = vmatprep.mubr.bf16.mxu0 %v1110_v10  ;;  %v1012_v38 = vadd.f32 %v1002_v16, %v993_v34  ;;  %v1011_v40 = vadd.f32 %v998_v20, %v992_v36  ;;  %v1133_v16 = vsub.s32 4, %v6356_v59  ;;  %v1122_v20 = vrot.slane %v6428_v14, %v6359_v3 }
 0x2b3   : > { %1658 = vmatmul.mubr.bf16.vlgmr.msra.gmra.mrb[0].mxu1 %v6387_v0  ;;  %1764 = vmatmul.mubr.bf16.vlgmr.msra.gmra.mrb[0].mxu0 %v6387_v0 }
 0x2b4   : > { %1679 = vmatpush1.bf16.msra.mxu1 %v4950_v9  ;;  %v6392_v12 = vpack.c.bf16 %v1012_v38, %v1010_v37  ;;  %v1111_v43 = vpack.c.bf16 %v1011_v40, %v1009_v41  ;;  %v1134_v21 = vrot.slane %v6428_v14, %v1133_v16 }
 0x2b5   : > { %1680 = vmatprep.subr.bf16.mxu1 %v4955_v35 }
 0x2b6   : > { %1667 = vmatprep.mubr.bf16.mxu1 %v6392_v12  ;;  %1773 = vmatprep.mubr.bf16.mxu0 %v6392_v12 }
 0x2b8   : > { %1681 = vmatpush1.bf16.msra.mxu1 %v4953_v15 }
 0x2b9   : > { %1682 = vmatprep.subr.bf16.mxu1 %v4958_v39 }
 0x2bb   : > { %1668 = vmatmul.mubr.bf16.gmra.mrb[4].mxu1 %v1111_v43  ;;  %1774 = vmatmul.mubr.bf16.gmra.mrb[4].mxu0 %v1111_v43 }
 0x2bc   : > { %1683 = vmatpush1.bf16.msra.mxu1 %v4956_v42  ;;  %1710 = vmatprep.mubr.bf16.mxu1 %v1110_v10 }
 0x2bd   : > { %1684 = vmatprep.subr.bf16.mxu1 %v4961_v44 }
 0x2c0   : > { %1685 = vmatpush1.bf16.msra.mxu1 %v4959_v45 }
 0x2c1   : > { %1686 = vmatprep.subr.bf16.mxu1 %v4964_v46 }
 0x2c4   : > { %1687 = vmatpush1.bf16.msra.mxu1 %v4962_v47  ;;  %v1125_v47 = vsub.s32 2, %v6356_v59 }
 0x2c5   : > { %1688 = vmatprep.subr.bf16.mxu1 %v4967_v48  ;;  %v1129_v48 = vsub.s32 3, %v6356_v59 }
 0x2c8   : > { %1689 = vmatpush1.bf16.msra.mxu1 %v4965_v49  ;;  %v1126_v49 = vrot.slane %v6428_v14, %v1125_v47 }
 0x2c9   : > { %1690 = vmatprep.subr.bf16.mxu1 %v4970_v50  ;;  %v1130_v50 = vrot.slane %v6428_v14, %v1129_v48 }
 0x2cc   : > { %1691 = vmatpush1.bf16.msra.mxu1 %v4968_v51 }
 0x2cd   : > { %1692 = vmatprep.subr.bf16.mxu1 %v4973_v52 }
 0x2d0   : > { %1693 = vmatpush1.bf16.msra.mxu1 %v4971_v53 }
 0x2d1   : > { %1694 = vmatprep.subr.bf16.mxu1 %v4976_v54 }
 0x2d4   : > { %1695 = vmatpush1.bf16.msra.mxu1 %v4974_v55 }
 0x2d5   : > { %1696 = vmatprep.subr.bf16.mxu1 %v4979_v56 }
 0x2d8   : > { %1697 = vmatpush1.bf16.msra.mxu1 %v4977_v57 }
 0x2d9   : > { %1698 = vmatprep.subr.bf16.mxu1 %v4982_v58 }
 0x2dc   : > { %1699 = vmatpush1.bf16.msra.mxu1 %v4980_v60 }
 0x2dd   : > { %1700 = vmatprep.subr.bf16.mxu1 %v4985_v1 }
 0x2e0   : > { %1701 = vmatpush1.bf16.msra.mxu1 %v4983_v2 }
 0x2e1   : > { %1702 = vmatprep.subr.bf16.mxu1 %v4988_v5 }
 0x2e4   : > { %1703 = vmatpush1.bf16.msra.mxu1 %v4986_v6 }
 0x2e5   : > { %1704 = vmatprep.subr.bf16.mxu1 %v4991_v7  ;;  %v1118_v7 = vrot.slane %v6428_v14, %v6362_v4 }
 0x2e8   : > { %1705 = vmatpush1.bf16.msra.mxu1 %v4989_v8 }
 0x2e9   : > { %1706 = vmatprep.subr.bf16.mxu1 %v4994_v11 }
 0x2ec   : > { %1707 = vmatpush1.bf16.msra.mxu1 %v4992_v18 }
 0x2ed   : > { %1708 = vmatprep.subr.bf16.mxu1 %v4997_v13 }
 0x2f0   : > { %1709 = vmatpush1.bf16.msra.mxu1 %v4995_v19 }
 0x2f3   : > { %1711 = vmatmul.mubr.bf16.vlgmr.msra.gmra.mrb[8].mxu1 %v6387_v0 }
 0x2f4   : > { %1720 = vmatprep.mubr.bf16.mxu1 %v6392_v12 }
 0x2fb   : > { %1721 = vmatmul.mubr.bf16.gmra.mrb[12].mxu1 %v1111_v43 }
 0x386   : > { %v6435_v22 = vpop.f32.mrb[0].mxu1  ;;  %v1765_v23 = vpop.f32.mrb[0].mxu0 }
 0x387   : > { %v1661_v25 = vpop.f32.mrb[1].mxu1  ;;  %v1767_v62 = vpop.f32.mrb[1].mxu0  ;;  %v1766_v28 = vadd.f32 %v1765_v23, %v1134_v21  ;;  %v6482_v18 = vadd.f32 %v6435_v22, %v1118_v7  ;;  %v901_v23 = vld [vmem:[#allocation7 + $0x8] sm:$0xff] }
 0x388   : > { %v6438_v26 = vadd.f32 %v1661_v25, %v1122_v20  ;;  %v1663_v61 = vpop.f32.mrb[2].mxu1  ;;  %v1769_v27 = vpop.f32.mrb[2].mxu0  ;;  %v1768_v32 = vadd.f32 %v1767_v62, %v1138_v24 }
 0x389   : > { %v1770_v29 = vadd.f32 %v1769_v27, %v1134_v21  ;;  %v1665_v30 = vpop.f32.mrb[3].mxu1  ;;  %v1771_v31 = vpop.f32.mrb[3].mxu0  ;;  %v6490_v19 = vadd.f32 %v1663_v61, %v1118_v7 }
 0x38a   : > { %v6440_v33 = vadd.f32 %v1665_v30, %v1122_v20  ;;  %v1772_v10 = vadd.f32 %v1771_v31, %v1138_v24  ;;  %1985 = vrot.lane.b32.xlu0 %v6438_v26, %s5712_s18 }
 0x38b   : > { %v6444_v9 = vpack.c.bf16 %v1770_v29, %v1766_v28 }
 0x38c   : > { %v6446_v0 = vpack.c.bf16 %v1772_v10, %v1768_v32  ;;  %1987 = vrot.lane.b32.xlu1 %v6440_v33, %s5712_s18 }
 0x38e   : > { %v1669_v34 = vpop.f32.mrb[4].mxu1  ;;  %v1775_v35 = vpop.f32.mrb[4].mxu0 }
 0x38f   : > { %v1671_v36 = vpop.f32.mrb[5].mxu1  ;;  %v1777_v37 = vpop.f32.mrb[5].mxu0  ;;  %v1776_v15 = vadd.f32 %v1775_v35, %v1134_v21  ;;  %v6496_v14 = vadd.f32 %v1669_v34, %v1118_v7 }
 0x390   : > { %v6450_v38 = vadd.f32 %v1671_v36, %v1122_v20  ;;  %v1673_v63 = vpop.f32.mrb[6].mxu1  ;;  %v1779_v12 = vpop.f32.mrb[6].mxu0  ;;  %v1778_v42 = vadd.f32 %v1777_v37, %v1138_v24 }
 0x391   : > { %v1780_v39 = vadd.f32 %v1779_v12, %v1134_v21  ;;  %v1675_v40 = vpop.f32.mrb[7].mxu1  ;;  %v1781_v41 = vpop.f32.mrb[7].mxu0  ;;  %v6502_v16 = vadd.f32 %v1673_v63, %v1118_v7  ;;  %v897_v21 = vld [vmem:[#allocation5 + $0x8] sm:$0xff] }
 0x392   : > { %v6452_v43 = vadd.f32 %v1675_v40, %v1122_v20  ;;  %v1782_v44 = vadd.f32 %v1781_v41, %v1138_v24  ;;  %v896_v20 = vld [vmem:[#allocation5] sm:$0xff]  ;;  %v1982_v61 = vmul.f32 %v6440_v33, %v897_v21  ;;  %v902_v40 = vld [vmem:[#allocation7 + $0x10] sm:$0xff] }
 0x393   : > { %v6454_v45 = vpack.c.bf16 %v1780_v39, %v1776_v15  ;;  %v1981_v62 = vmul.f32 %v6438_v26, %v896_v20 }
 0x394   : > { %v6456_v46 = vpack.c.bf16 %v1782_v44, %v1778_v42 }
 0x3c6   : > { %v1712_v51 = vpop.f32.mrb[8].mxu1 }
 0x3c7   : > { %v1713_v52 = vadd.f32 %v1712_v51, %v1126_v49  ;;  %v1714_v53 = vpop.f32.mrb[9].mxu1 }
 0x3c8   : > { %v1715_v54 = vadd.f32 %v1714_v53, %v1130_v50  ;;  %v1716_v55 = vpop.f32.mrb[10].mxu1 }
 0x3c9   : > { %v1718_v56 = vpop.f32.mrb[11].mxu1  ;;  %1808 = vrot.lane.b32.xlu1 %v1713_v52, %s5712_s18  ;;  %v1717_v57 = vadd.f32 %v1716_v55, %v1126_v49  ;;  %v1804_v35 = vmul.f32 %v1713_v52, %v896_v20  ;;  %v898_v55 = vld [vmem:[#allocation5 + $0x10] sm:$0xff] }
 0x3ca   : > { %2005 = vrot.lane.b32.xlu0 %v1715_v54, %s5712_s18  ;;  %v1719_v60 = vadd.f32 %v1718_v56, %v1130_v50  ;;  %v2001_v41 = vmul.f32 %v1715_v54, %v896_v20  ;;  %v899_v56 = vld [vmem:[#allocation5 + $0x18] sm:$0xff] }
 0x3cb   : > { %v1805_v36 = vmul.f32 %v1717_v57, %v897_v21 }
 0x3cc   : > { %v2002_v33 = vmul.f32 %v1719_v60, %v897_v21 }
 0x3cd   : > { %1810 = vrot.lane.b32.xlu1 %v1717_v57, %s5712_s18 }
 0x3ce   : > { %v1722_v58 = vpop.f32.mrb[12].mxu1 }
 0x3cf   : > { %v6469_v1 = vadd.f32 %v1722_v58, %v1126_v49  ;;  %v1724_v2 = vpop.f32.mrb[13].mxu1 }
 0x3d0   : > { %v1726_v5 = vpop.f32.mrb[14].mxu1  ;;  %v6476_v8 = vadd.f32 %v1724_v2, %v1130_v50 }
 0x3d1   : > { %v1728_v6 = vpop.f32.mrb[15].mxu1  ;;  %1812 = vrot.lane.b32.xlu0 %v6469_v1, %s5712_s18  ;;  %2007 = vrot.lane.b32.xlu1 %v1719_v60, %s5712_s18  ;;  %v1727_v11 = vadd.f32 %v1726_v5, %v1126_v49  ;;  %v903_v49 = vld [vmem:[#allocation7 + $0x18] sm:$0xff]  ;;  %v1806_v58 = vmul.f32 %v6469_v1, %v898_v55 }
 0x3d2   : > { %v6484_v13 = vadd.f32 %v1728_v6, %v1130_v50 }
 0x3d3   : > { %v1807_v2 = vmul.f32 %v1727_v11, %v899_v56 }
 0x3d5   : > { %2009 = vrot.lane.b32.xlu0 %v6476_v8, %s5712_s18  ;;  %1814 = vrot.lane.b32.xlu1 %v1727_v11, %s5712_s18 }
 0x3d9   : > { %1788 = vrot.lane.b32.xlu0 %v6482_v18, %s5712_s18  ;;  %2011 = vrot.lane.b32.xlu1 %v6484_v13, %s5712_s18 }
 0x3dd   : > { %1790 = vrot.lane.b32.xlu1 %v6490_v19, %s5712_s18  ;;  %1989 = vrot.lane.b32.xlu0 %v6450_v38, %s5712_s18 }
 0x3e1   : > { %1991 = vrot.lane.b32.xlu1 %v6452_v43, %s5712_s18  ;;  %1792 = vrot.lane.b32.xlu0 %v6496_v14, %s5712_s18 }
 0x3e5   : > { %1794 = vrot.lane.b32.xlu1 %v6502_v16, %s5712_s18 }
 0x3fc   : > { %v1986_v22 = vpop.permute.xlu0 %1985 }
 0x3fd   : > { %v1993_v24 = vmul.f32 %v1986_v22, %v900_v17 }
 0x3fe   : > { %v1988_v25 = vpop.permute.xlu1 %1987 }
 0x3ff   : > { %v1994_v27 = vmul.f32 %v1988_v25, %v901_v23  ;;  %v1997_v28 = vadd.f32 %v1993_v24, %v1981_v62  ;;  %v2003_v25 = vmul.f32 %v6476_v8, %v898_v55  ;;  %v2004_v62 = vmul.f32 %v6484_v13, %v899_v56 }
 0x401   : > { %v1998_v29 = vadd.f32 %v1994_v27, %v1982_v61 }
 0x403   : > { %v2021_v30 = vpack.c.bf16 %v1998_v29, %v1997_v28 }
 0x405   : > { %4709 = vmatprep.mubr.bf16.mxu0 %v2021_v30 }
 0x43b   : > { %v1809_v31 = vpop.permute.xlu1 %1808 }
 0x43c   : > { %v1816_v32 = vmul.f32 %v1809_v31, %v900_v17  ;;  %v2006_v10 = vpop.permute.xlu0 %2005  ;;  %v1784_v31 = vmul.f32 %v6482_v18, %v896_v20 }
 0x43d   : > { %v2013_v12 = vmul.f32 %v2006_v10, %v900_v17 }
 0x43e   : > { %v1820_v63 = vadd.f32 %v1816_v32, %v1804_v35  ;;  %v1785_v32 = vmul.f32 %v6490_v19, %v897_v21 }
 0x43f   : > { %v1811_v34 = vpop.permute.xlu1 %1810  ;;  %v2017_v50 = vadd.f32 %v2013_v12, %v2001_v41 }
 0x440   : > { %v1817_v37 = vmul.f32 %v1811_v34, %v901_v23 }
 0x442   : > { %v1821_v15 = vadd.f32 %v1817_v37, %v1805_v36 }
 0x443   : > { %v2008_v39 = vpop.permute.xlu1 %2007  ;;  %v1813_v26 = vpop.permute.xlu0 %1812 }
 0x444   : > { %v2014_v42 = vmul.f32 %v2008_v39, %v901_v23  ;;  %v1826_v44 = vpack.c.bf16 %v1821_v15, %v1820_v63  ;;  %v1818_v53 = vmul.f32 %v1813_v26, %v902_v40  ;;  %v1984_v63 = vmul.f32 %v6452_v43, %v899_v56 }
 0x445   : > { %v1786_v15 = vmul.f32 %v6496_v14, %v898_v55  ;;  %v1787_v39 = vmul.f32 %v6502_v16, %v899_v56  ;;  %v907_v14 = vld [vmem:[#allocation8 + $0x18] sm:$0xff] }
 0x446   : > { %v2018_v51 = vadd.f32 %v2014_v42, %v2002_v33  ;;  %4689 = vmatprep.subr.bf16.mxu1 %v1826_v44  ;;  %v1822_v7 = vadd.f32 %v1818_v53, %v1806_v58  ;;  %v904_v53 = vld [vmem:[#allocation8] sm:$0xff] }
 0x447   : > { %v1815_v52 = vpop.permute.xlu1 %1814  ;;  %4690 = vmatpush3.bf16.xpose.msra.mxu1 %v1826_v44  ;;  %v2010_v57 = vpop.permute.xlu0 %2009  ;;  %v905_v44 = vld [vmem:[#allocation8 + $0x8] sm:$0xff] }
 0x448   : > { %v1819_v5 = vmul.f32 %v1815_v52, %v903_v49  ;;  %v2023_v6 = vpack.c.bf16 %v2018_v51, %v2017_v50  ;;  %v2015_v60 = vmul.f32 %v2010_v57, %v902_v40  ;;  %v906_v51 = vld [vmem:[#allocation8 + $0x10] sm:$0xff] }
 0x44a   : > { %v1823_v54 = vadd.f32 %v1819_v5, %v1807_v2  ;;  %4705 = vmatprep.subr.bf16.mxu0 %v2023_v6  ;;  %v2019_v28 = vadd.f32 %v2015_v60, %v2003_v25 }
 0x44b   : > { %v2012_v22 = vpop.permute.xlu1 %2011  ;;  %4706 = vmatpush3.bf16.xpose.msra.mxu0 %v2023_v6  ;;  %v1789_v24 = vpop.permute.xlu0 %1788 }
 0x44c   : > { %v2016_v61 = vmul.f32 %v2012_v22, %v903_v49  ;;  %v1827_v27 = vpack.c.bf16 %v1823_v54, %v1822_v7  ;;  %v1796_v30 = vmul.f32 %v1789_v24, %v900_v17  ;;  %v1983_v17 = vmul.f32 %v6450_v38, %v898_v55 }
 0x44e   : > { %v2020_v29 = vadd.f32 %v2016_v61, %v2004_v62  ;;  %4691 = vmatprep.subr.bf16.mxu1 %v1827_v27  ;;  %v1800_v8 = vadd.f32 %v1796_v30, %v1784_v31 }
 0x44f   : > { %v1791_v1 = vpop.permute.xlu1 %1790  ;;  %4692 = vmatpush3.bf16.xpose.msra.mxu1 %v1827_v27  ;;  %v1990_v11 = vpop.permute.xlu0 %1989 }
 0x450   : > { %v1797_v10 = vmul.f32 %v1791_v1, %v901_v23  ;;  %4697 = vmatprep.subr.bf16.mxu1 %v6444_v9  ;;  %v2024_v34 = vpack.c.bf16 %v2020_v29, %v2019_v28  ;;  %v1995_v13 = vmul.f32 %v1990_v11, %v902_v40 }
 0x452   : > { %v1801_v35 = vadd.f32 %v1797_v10, %v1785_v32  ;;  %4707 = vmatprep.subr.bf16.mxu0 %v2024_v34  ;;  %v1999_v19 = vadd.f32 %v1995_v13, %v1983_v17 }
 0x453   : > { %v1992_v36 = vpop.permute.xlu1 %1991  ;;  %4708 = vmatpush3.bf16.xpose.msra.mxu0 %v2024_v34  ;;  %v1793_v37 = vpop.permute.xlu0 %1792 }
 0x454   : > { %v1996_v12 = vmul.f32 %v1992_v36, %v903_v49  ;;  %4713 = vmatprep.subr.bf16.mxu0 %v6446_v0  ;;  %v1824_v18 = vpack.c.bf16 %v1801_v35, %v1800_v8  ;;  %v1798_v21 = vmul.f32 %v1793_v37, %v902_v40 }
 0x456   : > { %v2000_v20 = vadd.f32 %v1996_v12, %v1984_v63  ;;  %4693 = vmatprep.mubr.bf16.mxu1 %v1824_v18  ;;  %v1802_v33 = vadd.f32 %v1798_v21, %v1786_v15 }
 0x457   : > { %v1795_v23 = vpop.permute.xlu1 %1794 }
 0x458   : > { %v2022_v26 = vpack.c.bf16 %v2000_v20, %v1999_v19  ;;  %v1799_v41 = vmul.f32 %v1795_v23, %v903_v49 }
 0x45a   : > { %v1803_v42 = vadd.f32 %v1799_v41, %v1787_v39  ;;  %4710 = vmatmul.mubr.bf16.vlgmr.msra.gmra.mrb[8].mxu0 %v2022_v26 }
 0x45b   : > { %4714 = vmatpush3.bf16.msra.mxu0 %v6446_v0 }
 0x45c   : > { %v1825_v38 = vpack.c.bf16 %v1803_v42, %v1802_v33  ;;  %4715 = vmatprep.subr.bf16.mxu0 %v6456_v46 }
 0x45e   : > { %4694 = vmatmul.mubr.bf16.vlgmr.msra.gmra.mrb[16].mxu1 %v1825_v38 }
 0x45f   : > { %4698 = vmatpush3.bf16.msra.mxu1 %v6444_v9  ;;  %4716 = vmatpush3.bf16.msra.mxu0 %v6456_v46 }
 0x460   : > { %4699 = vmatprep.subr.bf16.mxu1 %v6454_v45 }
 0x463   : > { %4700 = vmatpush3.bf16.msra.mxu1 %v6454_v45 }
 0x52d   : > { %v4711_v43 = vpop.f32.mrb[8].mxu0 }
 0x52e   : > { %v2059_v16 = vpop.f32.mrb[9].mxu0  ;;  %v2068_v45 = vadd.f32 %v4711_v43, %v906_v51 }
 0x52f   : > { %v4712_v40 = vpop.f32.mrb[10].mxu0  ;;  %v2060_v6 = vadd.f32 %v2059_v16, %v904_v53 }
 0x530   : > { %v2071_v49 = vadd.f32 %v4712_v40, %v907_v14  ;;  %v2062_v50 = vpop.f32.mrb[11].mxu0  ;;  %v2080_v7 = vsel %vm1877_vm0, %v2068_v45, -inf }
 0x531   : > { %v4695_v0 = vpop.f32.mrb[16].mxu1  ;;  %v2063_v55 = vadd.f32 %v2062_v50, %v905_v44  ;;  %v2074_v22 = vsel %vm1877_vm0, %v2060_v6, -inf }
 0x532   : > { %v1862_v56 = vpop.f32.mrb[17].mxu1  ;;  %v2083_v9 = vsel %vm1877_vm0, %v2071_v49, -inf  ;;  %v1871_v24 = vadd.f32 %v4695_v0, %v906_v51 }
 0x533   : > { %v1863_v46 = vadd.f32 %v1862_v56, %v904_v53  ;;  %2084 = vmax.xlane.f32.xlu1 %v2083_v9  ;;  %v4696_v52 = vpop.f32.mrb[18].mxu1  ;;  %v2077_v5 = vsel %vm1877_vm0, %v2063_v55, -inf  ;;  %v5000_v53 = vld [vmem:[%s6215_s5 + $0x4] ss:$8 sps:$4 sm:$0xff]  }
 0x534   : > { %v1865_v57 = vpop.f32.mrb[19].mxu1  ;;  %v1874_v2 = vadd.f32 %v4696_v52, %v907_v14  ;;  %v1884_v62 = vsel %vm1877_vm0, %v1871_v24, -inf  ;;  %2385 = vmatprep.subr.bf16.mxu1 %v5000_v53  ;;  %v5043_v53 = vld [vmem:[%s6215_s5 + $0xf0] ss:$8 sps:$4 sm:$0xff]  }
 0x535   : > { %v1878_v58 = vsel %vm1877_vm0, %v1863_v46, -inf  ;;  %v1866_v60 = vadd.f32 %v1865_v57, %v905_v44 }
 0x536   : > { %1879 = vmax.xlane.f32.xlu0 %v1878_v58  ;;  %v1887_v54 = vsel %vm1877_vm0, %v1874_v2, -inf }
 0x537   : > { %2078 = vmax.xlane.f32.xlu1 %v2077_v5  ;;  %v1881_v25 = vsel %vm1877_vm0, %v1866_v60, -inf }
 0x53a   : > { %2081 = vmax.xlane.f32.xlu0 %v2080_v7 }
 0x53b   : > { %1888 = vmax.xlane.f32.xlu1 %v1887_v54 }
 0x53e   : > { %2075 = vmax.xlane.f32.xlu0 %v2074_v22 }
 0x542   : > { %1882 = vmax.xlane.f32.xlu0 %v1881_v25 }
 0x546   : > { %1885 = vmax.xlane.f32.xlu0 %v1884_v62 }
 0x5c0   : > { %v2085_v29 = vpop.xlane.xlu1 %2084 }
 0x5c1   : > { %v2089_v34 = vsub.f32 %v2071_v49, %v2085_v29 }
 0x5c3   : > { %v1880_v61 = vpop.xlane.xlu0 %1879  ;;  %v2096_v37 = vmul.f32 1.442695, %v2089_v34 }
 0x5c4   : > { %v1890_v27 = vsub.f32 %v1863_v46, %v1880_v61  ;;  %v2079_v10 = vpop.xlane.xlu1 %2078 }
 0x5c5   : > { %v2087_v17 = vsub.f32 %v2063_v55, %v2079_v10  ;;  %v4998_v10 = vld [vmem:[%s6215_s5] ss:$8 sps:$4 sm:$0xff]  }
 0x5c6   : > { %v1894_v28 = vmul.f32 1.442695, %v1890_v27 }
 0x5c7   : > { %v2082_v30 = vpop.xlane.xlu0 %2081  ;;  %v2092_v23 = vmul.f32 1.442695, %v2087_v17  ;;  %v5007_v17 = vld [vmem:[%s6215_s5 + $0x30] ss:$8 sps:$4 sm:$0xff]  }
 0x5c8   : > { %5246 = vpow2.f32 %v1894_v28  ;;  %v2088_v1 = vsub.f32 %v2068_v45, %v2082_v30  ;;  %v1889_v12 = vpop.xlane.xlu1 %1888 }
 0x5c9   : > { %v1893_v15 = vsub.f32 %v1874_v2, %v1889_v12  ;;  %v5010_v12 = vld [vmem:[%s6215_s5 + $0x40] ss:$8 sps:$4 sm:$0xff]  }
 0x5ca   : > { %v2094_v11 = vmul.f32 1.442695, %v2088_v1 }
 0x5cb   : > { %v2076_v31 = vpop.xlane.xlu0 %2075  ;;  %v1900_v33 = vmul.f32 1.442695, %v1893_v15  ;;  %v5019_v15 = vld [vmem:[%s6215_s5 + $0x70] ss:$8 sps:$4 sm:$0xff]  }
 0x5cc   : > { %5248 = vpow2.f32 %v2094_v11  ;;  %v2086_v32 = vsub.f32 %v2060_v6, %v2076_v31 }
 0x5ce   : > { %v2090_v8 = vmul.f32 1.442695, %v2086_v32 }
 0x5cf   : > { %v1883_v35 = vpop.xlane.xlu0 %1882 }
 0x5d0   : > { %5250 = vpow2.f32 %v2090_v8  ;;  %v1891_v13 = vsub.f32 %v1866_v60, %v1883_v35  ;;  %v5003_v8 = vld [vmem:[%s6215_s5 + $0x14] ss:$8 sps:$4 sm:$0xff]   ;;  %v5001_v35 = vld [vmem:[%s6215_s5 + $0x10] ss:$8 sps:$4 sm:$0xff]  }
 0x5d2   : > { %v5247_v36 = vpop.eup %5246  ;;  %v1896_v63 = vmul.f32 1.442695, %v1891_v13  ;;  %v5006_v13 = vld [vmem:[%s6215_s5 + $0x24] ss:$8 sps:$4 sm:$0xff]  }
 0x5d3   : > { %v1886_v18 = vpop.xlane.xlu0 %1885  ;;  %v1902_v19 = vsel %vm1877_vm0, %v5247_v36, 0.0 }
 0x5d4   : > { %5252 = vpow2.f32 %v1896_v63  ;;  %v1892_v20 = vsub.f32 %v1871_v24, %v1886_v18  ;;  %1903 = vadd.xlane.f32.xlu0 %v1902_v19  ;;  %v5012_v63 = vld [vmem:[%s6215_s5 + $0x44] ss:$8 sps:$4 sm:$0xff]   ;;  %v5015_v18 = vld [vmem:[%s6215_s5 + $0x54] ss:$8 sps:$4 sm:$0xff]   ;;  %v5013_v19 = vld [vmem:[%s6215_s5 + $0x50] ss:$8 sps:$4 sm:$0xff]  }
 0x5d5   : > { %5254 = vpow2.f32 %v2096_v37  ;;  %v5009_v37 = vld [vmem:[%s6215_s5 + $0x34] ss:$8 sps:$4 sm:$0xff]  }
 0x5d6   : > { %v5249_v21 = vpop.eup %5248  ;;  %v1898_v39 = vmul.f32 1.442695, %v1892_v20  ;;  %v5018_v20 = vld [vmem:[%s6215_s5 + $0x64] ss:$8 sps:$4 sm:$0xff]  }
 0x5d7   : > { %v2104_v26 = vsel %vm1877_vm0, %v5249_v21, 0.0 }
 0x5d8   : > { %5256 = vpow2.f32 %v1898_v39  ;;  %2105 = vadd.xlane.f32.xlu0 %v2104_v26  ;;  %v5024_v39 = vld [vmem:[%s6215_s5 + $0x84] ss:$8 sps:$4 sm:$0xff]   ;;  %v5022_v26 = vld [vmem:[%s6215_s5 + $0x80] ss:$8 sps:$4 sm:$0xff]  }
 0x5d9   : > { %5258 = vpow2.f32 %v2092_v23  ;;  %v5021_v23 = vld [vmem:[%s6215_s5 + $0x74] ss:$8 sps:$4 sm:$0xff]  }
 0x5da   : > { %v5251_v41 = vpop.eup %5250  ;;  %5260 = vpow2.f32 %v1900_v33  ;;  %v5025_v33 = vld [vmem:[%s6215_s5 + $0x90] ss:$8 sps:$4 sm:$0xff]  }
 0x5db   : > { %v2098_v42 = vsel %vm1877_vm0, %v5251_v41, 0.0 }
 0x5dc   : > { %2099 = vadd.xlane.f32.xlu0 %v2098_v42  ;;  %v5030_v42 = vld [vmem:[%s6215_s5 + $0xa4] ss:$8 sps:$4 sm:$0xff]  }
 0x5de   : > { %v5253_v38 = vpop.eup %5252 }
 0x5df   : > { %v1905_v43 = vsel %vm1877_vm0, %v5253_v38, 0.0  ;;  %v5255_v14 = vpop.eup %5254 }
 0x5e0   : > { %1906 = vadd.xlane.f32.xlu1 %v1905_v43  ;;  %v2107_v40 = vsel %vm1877_vm0, %v5255_v14, 0.0  ;;  %v5033_v43 = vld [vmem:[%s6215_s5 + $0xb4] ss:$8 sps:$4 sm:$0xff]  }
 0x5e2   : > { %v5257_v16 = vpop.eup %5256 }
 0x5e3   : > { %v1908_v44 = vsel %vm1877_vm0, %v5257_v16, 0.0  ;;  %v5259_v49 = vpop.eup %5258 }
 0x5e4   : > { %2108 = vadd.xlane.f32.xlu1 %v2107_v40  ;;  %1909 = vadd.xlane.f32.xlu0 %v1908_v44  ;;  %v2101_v50 = vsel %vm1877_vm0, %v5259_v49, 0.0  ;;  %v5261_v0 = vpop.eup %5260  ;;  %v5034_v40 = vld [vmem:[%s6215_s5 + $0xc0] ss:$8 sps:$4 sm:$0xff]   ;;  %v5039_v44 = vld [vmem:[%s6215_s5 + $0xd4] ss:$8 sps:$4 sm:$0xff]  }
 0x5e5   : > { %v1911_v51 = vsel %vm1877_vm0, %v5261_v0, 0.0 }
 0x5e8   : > { %2102 = vadd.xlane.f32.xlu1 %v2101_v50  ;;  %v5042_v50 = vld [vmem:[%s6215_s5 + $0xe4] ss:$8 sps:$4 sm:$0xff]  }
 0x5ec   : > { %1912 = vadd.xlane.f32.xlu1 %v1911_v51  ;;  %v5045_v51 = vld [vmem:[%s6215_s5 + $0xf4] ss:$8 sps:$4 sm:$0xff]  }
 0x661   : > { %v1904_v55 = vpop.xlane.xlu0 %1903 }
 0x662   : > { %5262 = vrcp.f32 %v1904_v55 }
 0x665   : > { %v2106_v56 = vpop.xlane.xlu0 %2105 }
 0x669   : > { %v2100_v46 = vpop.xlane.xlu0 %2099 }
 0x66c   : > { %v5263_v58 = vpop.eup %5262 }
 0x66d   : > { %v1907_v9 = vpop.xlane.xlu1 %1906  ;;  %v1918_v6 = vmul.f32 %v5263_v58, %v5247_v36  ;;  %v5004_v36 = vld [vmem:[%s6215_s5 + $0x20] ss:$8 sps:$4 sm:$0xff]  }
 0x66e   : > { %5264 = vrcp.f32 %v1907_v9 }
 0x671   : > { %v2109_v52 = vpop.xlane.xlu1 %2108  ;;  %v1910_v57 = vpop.xlane.xlu0 %1909 }
 0x672   : > { %5266 = vrcp.f32 %v2109_v52 }
 0x673   : > { %5268 = vrcp.f32 %v2100_v46 }
 0x674   : > { %5270 = vrcp.f32 %v2106_v56 }
 0x675   : > { %v2103_v45 = vpop.xlane.xlu1 %2102 }
 0x676   : > { %5272 = vrcp.f32 %v2103_v45 }
 0x677   : > { %5274 = vrcp.f32 %v1910_v57 }
 0x678   : > { %v5265_v2 = vpop.eup %5264 }
 0x679   : > { %v1913_v5 = vpop.xlane.xlu1 %1912  ;;  %v1919_v7 = vmul.f32 %v5265_v2, %v5253_v38  ;;  %v5028_v38 = vld [vmem:[%s6215_s5 + $0xa0] ss:$8 sps:$4 sm:$0xff]  }
 0x67a   : > { %5276 = vrcp.f32 %v1913_v5 }
 0x67b   : > { %v1922_v54 = vpack.c.bf16 %v1919_v7, %v1918_v6 }
 0x67c   : > { %v5267_v60 = vpop.eup %5266 }
 0x67d   : > { %4701 = vmatprep.mubr.msk.bf16.mxu1 %vm1877_vm0, %v1922_v54  ;;  %v5269_v22 = vpop.eup %5268  ;;  %v2117_v62 = vmul.f32 %v5267_v60, %v5255_v14  ;;  %v5031_v14 = vld [vmem:[%s6215_s5 + $0xb0] ss:$8 sps:$4 sm:$0xff]   ;;  %v2213_v54 = vld [vmem:[%s6217_s23] sm:$0x3] }
 0x67e   : > { %v5271_v24 = vpop.eup %5270  ;;  %v2114_v61 = vmul.f32 %v5269_v22, %v5251_v41  ;;  %v5027_v41 = vld [vmem:[%s6215_s5 + $0x94] ss:$8 sps:$4 sm:$0xff]   ;;  %v2218_v60 = vrot.slane %v2213_v54, %v6362_v4  ;;  %v2222_v22 = vrot.slane %v2213_v54, %v6359_v3  ;;  %v5078_v54 = vld [vmem:[%s6219_s22 + $0xa4] ss:$16 sps:$4 sm:$0xff]  }
 0x67f   : > { %v2116_v29 = vmul.f32 %v5271_v24, %v5249_v21  ;;  %v5016_v21 = vld [vmem:[%s6215_s5 + $0x60] ss:$8 sps:$4 sm:$0xff]  }
 0x680   : > { %v5273_v25 = vpop.eup %5272 }
 0x681   : > { %v2115_v27 = vmul.f32 %v5273_v25, %v5259_v49  ;;  %v5275_v28 = vpop.eup %5274  ;;  %v2119_v11 = vpack.c.bf16 %v2117_v62, %v2116_v29  ;;  %v5037_v49 = vld [vmem:[%s6215_s5 + $0xd0] ss:$8 sps:$4 sm:$0xff]  }
 0x682   : > { %v1920_v31 = vmul.f32 %v5275_v28, %v5257_v16  ;;  %v5036_v16 = vld [vmem:[%s6215_s5 + $0xc4] ss:$8 sps:$4 sm:$0xff]  }
 0x683   : > { %v2118_v30 = vpack.c.bf16 %v2115_v27, %v2114_v61  ;;  %v5318_v28 = vld [vmem:[#allocation16] sm:$0xff] }
 0x684   : > { %v5277_v1 = vpop.eup %5276 }
 0x685   : > { %v1921_v32 = vmul.f32 %v5277_v1, %v5261_v0  ;;  %4717 = vmatprep.mubr.msk.bf16.mxu0 %vm1877_vm0, %v2118_v30  ;;  %v5040_v0 = vld [vmem:[%s6215_s5 + $0xe0] ss:$8 sps:$4 sm:$0xff]  }
 0x686   : > { %4718 = vmatmul.mubr.msk.bf16.vlgmr.msra.gmra.mrb[12].mxu0 %vm1877_vm0, %v2119_v11  ;;  %v5319_v11 = vld [vmem:[#allocation16 + $0x8] sm:$0xff] }
 0x687   : > { %v1923_v34 = vpack.c.bf16 %v1921_v32, %v1920_v31 }
 0x689   : > { %4702 = vmatmul.mubr.msk.bf16.vlgmr.msra.gmra.mrb[20].mxu1 %vm1877_vm0, %v1923_v34 }
 0x68a   : > { %2386 = vmatpush1.bf16.msra.mxu1 %v4998_v10  ;;  %v5320_v10 = vld [vmem:[#allocation16 + $0x10] sm:$0xff] }
 0x68b   : > { %2387 = vmatprep.subr.bf16.mxu1 %v5003_v8  ;;  %v5321_v8 = vld [vmem:[#allocation16 + $0x18] sm:$0xff] }
 0x68e   : > { %2388 = vmatpush1.bf16.msra.mxu1 %v5001_v35 }
 0x68f   : > { %2389 = vmatprep.subr.bf16.mxu1 %v5006_v13 }
 0x692   : > { %2390 = vmatpush1.bf16.msra.mxu1 %v5004_v36 }
 0x693   : > { %2391 = vmatprep.subr.bf16.mxu1 %v5009_v37 }
 0x696   : > { %2392 = vmatpush1.bf16.msra.mxu1 %v5007_v17 }
 0x697   : > { %2393 = vmatprep.subr.bf16.mxu1 %v5012_v63 }
 0x69a   : > { %2394 = vmatpush1.bf16.msra.mxu1 %v5010_v12 }
 0x69b   : > { %2395 = vmatprep.subr.bf16.mxu1 %v5015_v18 }
 0x69e   : > { %2396 = vmatpush1.bf16.msra.mxu1 %v5013_v19  ;;  %v5322_v19 = vld [vmem:[#allocation16 + $0x20] sm:$0xff] }
 0x69f   : > { %2397 = vmatprep.subr.bf16.mxu1 %v5018_v20 }
 0x6a2   : > { %2398 = vmatpush1.bf16.msra.mxu1 %v5016_v21 }
 0x6a3   : > { %2399 = vmatprep.subr.bf16.mxu1 %v5021_v23 }
 0x6a6   : > { %2400 = vmatpush1.bf16.msra.mxu1 %v5019_v15  ;;  %v5323_v15 = vld [vmem:[#allocation16 + $0x28] sm:$0xff] }
 0x6a7   : > { %2401 = vmatprep.subr.bf16.mxu1 %v5024_v39 }
 0x6aa   : > { %2402 = vmatpush1.bf16.msra.mxu1 %v5022_v26 }
 0x6ab   : > { %2403 = vmatprep.subr.bf16.mxu1 %v5027_v41  ;;  %v5324_v41 = vld [vmem:[#allocation16 + $0x30] sm:$0xff] }
 0x6ae   : > { %2404 = vmatpush1.bf16.msra.mxu1 %v5025_v33 }
 0x6af   : > { %2405 = vmatprep.subr.bf16.mxu1 %v5030_v42  ;;  %v5325_v42 = vld [vmem:[#allocation16 + $0x38] sm:$0xff] }
 0x6b2   : > { %2406 = vmatpush1.bf16.msra.mxu1 %v5028_v38 }
 0x6b3   : > { %2407 = vmatprep.subr.bf16.mxu1 %v5033_v43 }
 0x6b6   : > { %2408 = vmatpush1.bf16.msra.mxu1 %v5031_v14 }
 0x6b7   : > { %2409 = vmatprep.subr.bf16.mxu1 %v5036_v16  ;;  %v5046_v16 = vld [vmem:[%s6219_s22] ss:$16 sps:$4 sm:$0xff]  }
 0x6ba   : > { %2410 = vmatpush1.bf16.msra.mxu1 %v5034_v40  ;;  %v5048_v40 = vld [vmem:[%s6219_s22 + $0x4] ss:$16 sps:$4 sm:$0xff]  }
 0x6bb   : > { %2411 = vmatprep.subr.bf16.mxu1 %v5039_v44  ;;  %v5049_v44 = vld [vmem:[%s6219_s22 + $0x8] ss:$16 sps:$4 sm:$0xff]   ;;  %2960 = vmatprep.subr.bf16.mxu0 %v5048_v40 }
 0x6bc   : > { %2961 = vmatpush1.bf16.msra.mxu0 %v5046_v16 }
 0x6be   : > { %2412 = vmatpush1.bf16.msra.mxu1 %v5037_v49  ;;  %v5051_v49 = vld [vmem:[%s6219_s22 + $0xc] ss:$16 sps:$4 sm:$0xff]  }
 0x6bf   : > { %2413 = vmatprep.subr.bf16.mxu1 %v5042_v50  ;;  %v5054_v50 = vld [vmem:[%s6219_s22 + $0x24] ss:$16 sps:$4 sm:$0xff]  }
 0x6c0   : > { %2962 = vmatprep.subr.bf16.mxu0 %v5054_v50 }
 0x6c2   : > { %2414 = vmatpush1.bf16.msra.mxu1 %v5040_v0  ;;  %v5057_v0 = vld [vmem:[%s6219_s22 + $0x2c] ss:$16 sps:$4 sm:$0xff]  }
 0x6c3   : > { %2415 = vmatprep.subr.bf16.mxu1 %v5045_v51  ;;  %v5052_v51 = vld [vmem:[%s6219_s22 + $0x20] ss:$16 sps:$4 sm:$0xff]  }
 0x6c4   : > { %2963 = vmatpush1.bf16.msra.mxu0 %v5052_v51 }
 0x6c6   : > { %2416 = vmatpush1.bf16.msra.mxu1 %v5043_v53  ;;  %v5055_v53 = vld [vmem:[%s6219_s22 + $0x28] ss:$16 sps:$4 sm:$0xff]  }
 0x6c7   : > { %3013 = vmatprep.subr.bf16.mxu1 %v5051_v49 }
 0x759   : > { %v4719_v55 = vpop.f32.mrb[12].mxu0 }
 0x75a   : > { %v2162_v56 = vpop.f32.mrb[13].mxu0 }
 0x75b   : > { %v4720_v9 = vpop.f32.mrb[14].mxu0 }
 0x75c   : > { %v2212_v46 = vpack.c.bf16 %v4720_v9, %v4719_v55  ;;  %v4703_v52 = vpop.f32.mrb[20].mxu1  ;;  %v2165_v57 = vpop.f32.mrb[15].mxu0  ;;  %v5060_v55 = vld [vmem:[%s6219_s22 + $0x44] ss:$16 sps:$4 sm:$0xff]   ;;  %v5058_v9 = vld [vmem:[%s6219_s22 + $0x40] ss:$16 sps:$4 sm:$0xff]  }
 0x75d   : > { %v2210_v45 = vpack.c.bf16 %v2165_v57, %v2162_v56  ;;  %v1966_v58 = vpop.f32.mrb[21].mxu1  ;;  %v5063_v56 = vld [vmem:[%s6219_s22 + $0x4c] ss:$16 sps:$4 sm:$0xff]   ;;  %2964 = vmatprep.subr.bf16.mxu0 %v5060_v55 }
 0x75e   : > { %v4704_v2 = vpop.f32.mrb[22].mxu1  ;;  %v5069_v57 = vld [vmem:[%s6219_s22 + $0x6c] ss:$16 sps:$4 sm:$0xff]   ;;  %2965 = vmatpush1.bf16.msra.mxu0 %v5058_v9 }
 0x75f   : > { %v2211_v5 = vpack.c.bf16 %v4704_v2, %v4703_v52  ;;  %v1969_v6 = vpop.f32.mrb[23].mxu1  ;;  %2417 = vmatprep.mubr.bf16.mxu1 %v2210_v45  ;;  %v5066_v52 = vld [vmem:[%s6219_s22 + $0x64] ss:$16 sps:$4 sm:$0xff]   ;;  %v5064_v45 = vld [vmem:[%s6219_s22 + $0x60] ss:$16 sps:$4 sm:$0xff]  }
 0x760   : > { %v2209_v7 = vpack.c.bf16 %v1969_v6, %v1966_v58  ;;  %2966 = vmatprep.subr.bf16.mxu0 %v5066_v52  ;;  %v5067_v58 = vld [vmem:[%s6219_s22 + $0x68] ss:$16 sps:$4 sm:$0xff]   ;;  %v5072_v2 = vld [vmem:[%s6219_s22 + $0x84] ss:$16 sps:$4 sm:$0xff]   ;;  %v5070_v6 = vld [vmem:[%s6219_s22 + $0x80] ss:$16 sps:$4 sm:$0xff]  }
 0x762   : > { %2418 = vmatmul.mubr.bf16.vlgmr.msra.gmra.mrb[24].mxu1 %v2209_v7  ;;  %2967 = vmatpush1.bf16.msra.mxu0 %v5064_v45  ;;  %v5073_v7 = vld [vmem:[%s6219_s22 + $0x88] ss:$16 sps:$4 sm:$0xff]  }
 0x763   : > { %2427 = vmatprep.mubr.bf16.mxu1 %v2212_v46  ;;  %3014 = vmatpush1.bf16.msra.mxu1 %v5049_v44  ;;  %v5061_v46 = vld [vmem:[%s6219_s22 + $0x48] ss:$16 sps:$4 sm:$0xff]  }
 0x764   : > { %3015 = vmatprep.subr.bf16.mxu1 %v5057_v0  ;;  %2968 = vmatprep.subr.bf16.mxu0 %v5072_v2 }
 0x766   : > { %2969 = vmatpush1.bf16.msra.mxu0 %v5070_v6  ;;  %v5111_v6 = vld [vmem:[%s6219_s22 + $0x14c] ss:$16 sps:$4 sm:$0xff]  }
 0x767   : > { %3016 = vmatpush1.bf16.msra.mxu1 %v5055_v53  ;;  %2970 = vmatprep.subr.bf16.mxu0 %v5078_v54  ;;  %v5109_v54 = vld [vmem:[%s6219_s22 + $0x148] ss:$16 sps:$4 sm:$0xff]  }
 0x768   : > { %3017 = vmatprep.subr.bf16.mxu1 %v5063_v56 }
 0x76a   : > { %2428 = vmatmul.mubr.bf16.gmra.mrb[28].mxu1 %v2211_v5  ;;  %v5075_v5 = vld [vmem:[%s6219_s22 + $0x8c] ss:$16 sps:$4 sm:$0xff]  }
 0x76b   : > { %3018 = vmatpush1.bf16.msra.mxu1 %v5061_v46 }
 0x76c   : > { %3019 = vmatprep.subr.bf16.mxu1 %v5069_v57 }
 0x76f   : > { %3020 = vmatpush1.bf16.msra.mxu1 %v5067_v58 }
 0x770   : > { %3021 = vmatprep.subr.bf16.mxu1 %v5075_v5  ;;  %v5108_v5 = vld [vmem:[%s6219_s22 + $0x144] ss:$16 sps:$4 sm:$0xff]  }
 0x773   : > { %3022 = vmatpush1.bf16.msra.mxu1 %v5073_v7  ;;  %v5106_v7 = vld [vmem:[%s6219_s22 + $0x140] ss:$16 sps:$4 sm:$0xff]  }
 0x835   : > { %v2419_v24 = vpop.f32.mrb[24].mxu1 }
 0x836   : > { %v2420_v25 = vadd.f32 %v2419_v24, %v2218_v60  ;;  %v2421_v62 = vpop.f32.mrb[25].mxu1  ;;  %v5079_v24 = vld [vmem:[%s6219_s22 + $0xa8] ss:$16 sps:$4 sm:$0xff]  }
 0x837   : > { %v2422_v61 = vadd.f32 %v2421_v62, %v2222_v22  ;;  %v2423_v27 = vpop.f32.mrb[26].mxu1  ;;  %v5087_v62 = vld [vmem:[%s6219_s22 + $0xcc] ss:$16 sps:$4 sm:$0xff]  }
 0x838   : > { %v6580_v29 = vadd.f32 %v5318_v28, %v2420_v25  ;;  %v2424_v30 = vadd.f32 %v2423_v27, %v2218_v60  ;;  %v2425_v1 = vpop.f32.mrb[27].mxu1  ;;  %v5084_v25 = vld [vmem:[%s6219_s22 + $0xc4] ss:$16 sps:$4 sm:$0xff]   ;;  %v5085_v27 = vld [vmem:[%s6219_s22 + $0xc8] ss:$16 sps:$4 sm:$0xff]  }
 0x839   : > { %v6582_v31 = vadd.f32 %v5319_v11, %v2422_v61  ;;  %v2426_v32 = vadd.f32 %v2425_v1, %v2222_v22  ;;  %v5082_v61 = vld [vmem:[%s6219_s22 + $0xc0] ss:$16 sps:$4 sm:$0xff]   ;;  %v5090_v28 = vld [vmem:[%s6219_s22 + $0xe4] ss:$16 sps:$4 sm:$0xff]   ;;  %v5091_v11 = vld [vmem:[%s6219_s22 + $0xe8] ss:$16 sps:$4 sm:$0xff]  }
 0x83a   : > { %v6584_v34 = vadd.f32 %v5320_v10, %v2424_v30  ;;  %v5093_v30 = vld [vmem:[%s6219_s22 + $0xec] ss:$16 sps:$4 sm:$0xff]   ;;  %v5088_v1 = vld [vmem:[%s6219_s22 + $0xe0] ss:$16 sps:$4 sm:$0xff]  }
 0x83b   : > { %v6586_v35 = vadd.f32 %v5321_v8, %v2426_v32  ;;  %v2448_v13 = vadd.f32 %v6582_v31, %v6580_v29  ;;  %v5096_v32 = vld [vmem:[%s6219_s22 + $0x104] ss:$16 sps:$4 sm:$0xff]   ;;  %v5099_v10 = vld [vmem:[%s6219_s22 + $0x10c] ss:$16 sps:$4 sm:$0xff]   ;;  %v5094_v8 = vld [vmem:[%s6219_s22 + $0x100] ss:$16 sps:$4 sm:$0xff]  }
 0x83d   : > { %v2429_v36 = vpop.f32.mrb[28].mxu1  ;;  %2449 = vadd.xlane.f32.xlu0 %v2448_v13  ;;  %v2451_v37 = vadd.f32 %v6586_v35, %v6584_v34  ;;  %v5097_v13 = vld [vmem:[%s6219_s22 + $0x108] ss:$16 sps:$4 sm:$0xff]  }
 0x83e   : > { %v2430_v17 = vadd.f32 %v2429_v36, %v2218_v60  ;;  %v2431_v63 = vpop.f32.mrb[29].mxu1  ;;  %v5102_v36 = vld [vmem:[%s6219_s22 + $0x124] ss:$16 sps:$4 sm:$0xff]  }
 0x83f   : > { %v2432_v12 = vadd.f32 %v2431_v63, %v2222_v22  ;;  %v2433_v18 = vpop.f32.mrb[30].mxu1  ;;  %2452 = vadd.xlane.f32.xlu1 %v2451_v37  ;;  %v5105_v37 = vld [vmem:[%s6219_s22 + $0x12c] ss:$16 sps:$4 sm:$0xff]   ;;  %v5103_v63 = vld [vmem:[%s6219_s22 + $0x128] ss:$16 sps:$4 sm:$0xff]  }
 0x840   : > { %v6592_v20 = vadd.f32 %v5322_v19, %v2430_v17  ;;  %v2434_v21 = vadd.f32 %v2433_v18, %v2218_v60  ;;  %v2435_v23 = vpop.f32.mrb[31].mxu1  ;;  %v5081_v60 = vld [vmem:[%s6219_s22 + $0xac] ss:$16 sps:$4 sm:$0xff]   ;;  %v5100_v17 = vld [vmem:[%s6219_s22 + $0x120] ss:$16 sps:$4 sm:$0xff]  }
 0x841   : > { %v6594_v39 = vadd.f32 %v5323_v15, %v2432_v12  ;;  %v2436_v26 = vadd.f32 %v2435_v23, %v2222_v22  ;;  %v5076_v22 = vld [vmem:[%s6219_s22 + $0xa0] ss:$16 sps:$4 sm:$0xff]   ;;  %3023 = vmatprep.subr.bf16.mxu1 %v5081_v60  ;;  %v5114_v60 = vld [vmem:[%s6219_s22 + $0x164] ss:$16 sps:$4 sm:$0xff]  }
 0x842   : > { %v6596_v33 = vadd.f32 %v5324_v41, %v2434_v21  ;;  %2971 = vmatpush1.bf16.msra.mxu0 %v5076_v22  ;;  %3024 = vmatpush1.bf16.msra.mxu1 %v5079_v24  ;;  %v5117_v22 = vld [vmem:[%s6219_s22 + $0x16c] ss:$16 sps:$4 sm:$0xff]   ;;  %v5112_v24 = vld [vmem:[%s6219_s22 + $0x160] ss:$16 sps:$4 sm:$0xff]  }
 0x843   : > { %v6598_v38 = vadd.f32 %v5325_v42, %v2436_v26  ;;  %v2454_v43 = vadd.f32 %v6594_v39, %v6592_v20  ;;  %2972 = vmatprep.subr.bf16.mxu0 %v5084_v25  ;;  %3025 = vmatprep.subr.bf16.mxu1 %v5087_v62  ;;  %v5115_v25 = vld [vmem:[%s6219_s22 + $0x168] ss:$16 sps:$4 sm:$0xff]   ;;  %v5120_v62 = vld [vmem:[%s6219_s22 + $0x184] ss:$16 sps:$4 sm:$0xff]  }
 0x844   : > { %7415 = vst [vmem:[#allocation27_spill] sm:$0xff] %v6596_v33 }
 0x845   : > { %7416 = vst [vmem:[#allocation28_spill] sm:$0xff] %v6598_v38  ;;  %2455 = vadd.xlane.f32.xlu0 %v2454_v43  ;;  %v2457_v14 = vadd.f32 %v6598_v38, %v6596_v33 }
 0x846   : > { %2973 = vmatpush1.bf16.msra.mxu0 %v5082_v61  ;;  %3026 = vmatpush1.bf16.msra.mxu1 %v5085_v27  ;;  %v5123_v61 = vld [vmem:[%s6219_s22 + $0x18c] ss:$16 sps:$4 sm:$0xff]   ;;  %v5118_v27 = vld [vmem:[%s6219_s22 + $0x180] ss:$16 sps:$4 sm:$0xff]  }
 0x847   : > { %2458 = vadd.xlane.f32.xlu1 %v2457_v14  ;;  %2974 = vmatprep.subr.bf16.mxu0 %v5090_v28  ;;  %v5121_v28 = vld [vmem:[%s6219_s22 + $0x188] ss:$16 sps:$4 sm:$0xff]  }
 0x848   : > { %3027 = vmatprep.subr.bf16.mxu1 %v5093_v30  ;;  %v5126_v30 = vld [vmem:[%s6219_s22 + $0x1a4] ss:$16 sps:$4 sm:$0xff]  }
 0x84a   : > { %2975 = vmatpush1.bf16.msra.mxu0 %v5088_v1  ;;  %3028 = vmatpush1.bf16.msra.mxu1 %v5091_v11  ;;  %v5129_v1 = vld [vmem:[%s6219_s22 + $0x1ac] ss:$16 sps:$4 sm:$0xff]   ;;  %v5124_v11 = vld [vmem:[%s6219_s22 + $0x1a0] ss:$16 sps:$4 sm:$0xff]  }
 0x84b   : > { %2976 = vmatprep.subr.bf16.mxu0 %v5096_v32  ;;  %3029 = vmatprep.subr.bf16.mxu1 %v5099_v10  ;;  %v5127_v32 = vld [vmem:[%s6219_s22 + $0x1a8] ss:$16 sps:$4 sm:$0xff]   ;;  %v5130_v10 = vld [vmem:[%s6219_s22 + $0x1c0] ss:$16 sps:$4 sm:$0xff]  }
 0x84e   : > { %2977 = vmatpush1.bf16.msra.mxu0 %v5094_v8  ;;  %3030 = vmatpush1.bf16.msra.mxu1 %v5097_v13  ;;  %v5132_v8 = vld [vmem:[%s6219_s22 + $0x1c4] ss:$16 sps:$4 sm:$0xff]   ;;  %v5133_v13 = vld [vmem:[%s6219_s22 + $0x1c8] ss:$16 sps:$4 sm:$0xff]  }
 0x84f   : > { %2978 = vmatprep.subr.bf16.mxu0 %v5102_v36  ;;  %3031 = vmatprep.subr.bf16.mxu1 %v5105_v37  ;;  %v5135_v36 = vld [vmem:[%s6219_s22 + $0x1cc] ss:$16 sps:$4 sm:$0xff]   ;;  %v5138_v37 = vld [vmem:[%s6219_s22 + $0x1e4] ss:$16 sps:$4 sm:$0xff]  }
 0x852   : > { %2979 = vmatpush1.bf16.msra.mxu0 %v5100_v17  ;;  %3032 = vmatpush1.bf16.msra.mxu1 %v5103_v63  ;;  %v5141_v17 = vld [vmem:[%s6219_s22 + $0x1ec] ss:$16 sps:$4 sm:$0xff]   ;;  %v5136_v63 = vld [vmem:[%s6219_s22 + $0x1e0] ss:$16 sps:$4 sm:$0xff]  }
 0x853   : > { %2980 = vmatprep.subr.bf16.mxu0 %v5108_v5  ;;  %3033 = vmatprep.subr.bf16.mxu1 %v5111_v6 }
 0x856   : > { %2981 = vmatpush1.bf16.msra.mxu0 %v5106_v7  ;;  %3034 = vmatpush1.bf16.msra.mxu1 %v5109_v54 }
 0x857   : > { %2982 = vmatprep.subr.bf16.mxu0 %v5114_v60  ;;  %3035 = vmatprep.subr.bf16.mxu1 %v5117_v22 }
 0x85a   : > { %2983 = vmatpush1.bf16.msra.mxu0 %v5112_v24  ;;  %3036 = vmatpush1.bf16.msra.mxu1 %v5115_v25 }
 0x85b   : > { %2984 = vmatprep.subr.bf16.mxu0 %v5120_v62  ;;  %3037 = vmatprep.subr.bf16.mxu1 %v5123_v61 }
 0x85e   : > { %2985 = vmatpush1.bf16.msra.mxu0 %v5118_v27  ;;  %3038 = vmatpush1.bf16.msra.mxu1 %v5121_v28 }
 0x85f   : > { %2986 = vmatprep.subr.bf16.mxu0 %v5126_v30  ;;  %3039 = vmatprep.subr.bf16.mxu1 %v5129_v1 }
 0x862   : > { %2987 = vmatpush1.bf16.msra.mxu0 %v5124_v11  ;;  %3040 = vmatpush1.bf16.msra.mxu1 %v5127_v32 }
 0x863   : > { %2988 = vmatprep.subr.bf16.mxu0 %v5132_v8  ;;  %3041 = vmatprep.subr.bf16.mxu1 %v5135_v36  ;;  %v5147_v8 = vld [vmem:[%s6221_s27 + $0x14] ss:$8 sps:$4 sm:$0xff]  }
 0x866   : > { %2989 = vmatpush1.bf16.msra.mxu0 %v5130_v10  ;;  %3042 = vmatpush1.bf16.msra.mxu1 %v5133_v13 }
 0x867   : > { %2990 = vmatprep.subr.bf16.mxu0 %v5138_v37  ;;  %3043 = vmatprep.subr.bf16.mxu1 %v5141_v17 }
 0x86a   : > { %2991 = vmatpush1.bf16.msra.mxu0 %v5136_v63 }
 0x8ca   : > { %v2450_v12 = vpop.xlane.xlu0 %2449 }
 0x8cb   : > { %v2460_v18 = vmul.f32 0.00390625, %v2450_v12  ;;  %v5139_v12 = vld [vmem:[%s6219_s22 + $0x1e8] ss:$16 sps:$4 sm:$0xff]  }
 0x8cc   : > { %v2453_v19 = vpop.xlane.xlu1 %2452  ;;  %3044 = vmatpush1.bf16.msra.mxu1 %v5139_v12  ;;  %v5150_v12 = vld [vmem:[%s6221_s27 + $0x24] ss:$8 sps:$4 sm:$0xff]  }
 0x8cd   : > { %v6645_v21 = vsub.f32 %v6580_v29, %v2460_v18  ;;  %v6648_v23 = vsub.f32 %v6582_v31, %v2460_v18  ;;  %v2461_v15 = vmul.f32 0.00390625, %v2453_v19  ;;  %v5144_v18 = vld [vmem:[%s6221_s27 + $0x4] ss:$8 sps:$4 sm:$0xff]  }
 0x8ce   : > { %3938 = vmatprep.subr.bf16.mxu0 %v5144_v18 }
 0x8cf   : > { %v6651_v26 = vsub.f32 %v6584_v34, %v2461_v15  ;;  %v6654_v41 = vsub.f32 %v6586_v35, %v2461_v15  ;;  %v2472_v42 = vmul.f32 %v6645_v21, %v6645_v21  ;;  %v2473_v43 = vmul.f32 %v6648_v23, %v6648_v23 }
 0x8d1   : > { %v2480_v14 = vadd.f32 %v2473_v43, %v2472_v42  ;;  %v2474_v16 = vmul.f32 %v6651_v26, %v6651_v26  ;;  %v2475_v40 = vmul.f32 %v6654_v41, %v6654_v41 }
 0x8d2   : > { %v2456_v44 = vpop.xlane.xlu0 %2455 }
 0x8d3   : > { %v2462_v49 = vmul.f32 0.00390625, %v2456_v44  ;;  %2481 = vadd.xlane.f32.xlu0 %v2480_v14  ;;  %v2483_v50 = vadd.f32 %v2475_v40, %v2474_v16 }
 0x8d4   : > { %v2459_v0 = vpop.xlane.xlu1 %2458 }
 0x8d5   : > { %v6665_v51 = vsub.f32 %v6592_v20, %v2462_v49  ;;  %v6668_v53 = vsub.f32 %v6594_v39, %v2462_v49  ;;  %v2463_v55 = vmul.f32 0.00390625, %v2459_v0  ;;  %2484 = vadd.xlane.f32.xlu1 %v2483_v50 }
 0x8d7   : > { %v6671_v56 = vsub.f32 %v6596_v33, %v2463_v55  ;;  %v6674_v9 = vsub.f32 %v6598_v38, %v2463_v55  ;;  %v2476_v46 = vmul.f32 %v6665_v51, %v6665_v51  ;;  %v2477_v52 = vmul.f32 %v6668_v53, %v6668_v53  ;;  %v2446_v55 = vld [vmem:[%s858_s7] sm:$0x3] }
 0x8d9   : > { %v2486_v57 = vadd.f32 %v2477_v52, %v2476_v46  ;;  %v2478_v45 = vmul.f32 %v6671_v56, %v6671_v56  ;;  %v2479_v58 = vmul.f32 %v6674_v9, %v6674_v9  ;;  %v2447_v52 = vld [vmem:[%s862_s9] sm:$0x3]  ;;  %s5713_s9 = smov [#allocation16]  }
 0x8da   : > { %v2535_v7 = vrot.slane %v2447_v52, %v6362_v4  ;;  %v2539_v54 = vrot.slane %v2447_v52, %v6359_v3  ;;  %v5163_v52 = vld [vmem:[%s6221_s27 + $0x70] ss:$8 sps:$4 sm:$0xff]   ;;  %s4086_s20 = sshll.u32 %s5713_s9, 4  ;;  %s4087_s20 = int_to_ptr.vmem [resolvable:$true] %s4086_s20 }
 0x8db   : > { %2487 = vadd.xlane.f32.xlu0 %v2486_v57  ;;  %v2489_v2 = vadd.f32 %v2479_v58, %v2478_v45  ;;  %v2516_v57 = vrot.slane %v2446_v55, %v6362_v4  ;;  %v2520_v45 = vrot.slane %v2446_v55, %v6359_v3  ;;  %v5160_v55 = vld [vmem:[%s6221_s27 + $0x60] ss:$8 sps:$4 sm:$0xff]   ;;  %p5625_p6 = scmp.lt.s32.totalorder %s4087_s20, %s4087_s20 }
 0x8dd   : > { %2490 = vadd.xlane.f32.xlu1 %v2489_v2 }
 0x960   : > { %v2482_v19 = vpop.xlane.xlu0 %2481 }
 0x961   : > { %v2492_v15 = vmul.f32 0.00390625, %v2482_v19 }
 0x962   : > { %v2485_v42 = vpop.xlane.xlu1 %2484 }
 0x963   : > { %v2496_v43 = vadd.f32 1e-05, %v2492_v15  ;;  %v2493_v14 = vmul.f32 0.00390625, %v2485_v42 }
 0x965   : > { %5278 = vrsqrt.f32 %v2496_v43  ;;  %v2497_v16 = vadd.f32 1e-05, %v2493_v14  ;;  %v5148_v43 = vld [vmem:[%s6221_s27 + $0x20] ss:$8 sps:$4 sm:$0xff]   ;;  %v5153_v14 = vld [vmem:[%s6221_s27 + $0x34] ss:$8 sps:$4 sm:$0xff]  }
 0x967   : > { %5280 = vrsqrt.f32 %v2497_v16  ;;  %v5151_v16 = vld [vmem:[%s6221_s27 + $0x30] ss:$8 sps:$4 sm:$0xff]  }
 0x968   : > { %v2488_v40 = vpop.xlane.xlu0 %2487 }
 0x969   : > { %v2494_v44 = vmul.f32 0.00390625, %v2488_v40  ;;  %v5156_v40 = vld [vmem:[%s6221_s27 + $0x44] ss:$8 sps:$4 sm:$0xff]  }
 0x96a   : > { %v2491_v49 = vpop.xlane.xlu1 %2490 }
 0x96b   : > { %v2498_v50 = vadd.f32 1e-05, %v2494_v44  ;;  %v2495_v0 = vmul.f32 0.00390625, %v2491_v49  ;;  %v5154_v44 = vld [vmem:[%s6221_s27 + $0x40] ss:$8 sps:$4 sm:$0xff]  }
 0x96c   : > { %v5159_v49 = vld [vmem:[%s6221_s27 + $0x54] ss:$8 sps:$4 sm:$0xff]  }
 0x96d   : > { %5282 = vrsqrt.f32 %v2498_v50  ;;  %v2499_v46 = vadd.f32 1e-05, %v2495_v0  ;;  %v5157_v50 = vld [vmem:[%s6221_s27 + $0x50] ss:$8 sps:$4 sm:$0xff]   ;;  %v5162_v0 = vld [vmem:[%s6221_s27 + $0x64] ss:$8 sps:$4 sm:$0xff]  }
 0x96f   : > { %v5279_v58 = vpop.eup %5278  ;;  %5284 = vrsqrt.f32 %v2499_v46  ;;  %v5165_v46 = vld [vmem:[%s6221_s27 + $0x74] ss:$8 sps:$4 sm:$0xff]  }
 0x970   : > { %v2504_v2 = vmul.f32 %v5279_v58, %v6645_v21  ;;  %v2505_v5 = vmul.f32 %v5279_v58, %v6648_v23  ;;  %v5171_v58 = vld [vmem:[%s6221_s27 + $0x94] ss:$8 sps:$4 sm:$0xff]  }
 0x971   : > { %v5281_v6 = vpop.eup %5280 }
 0x972   : > { %v2506_v60 = vmul.f32 %v5281_v6, %v6651_v26  ;;  %v2507_v22 = vmul.f32 %v5281_v6, %v6654_v41  ;;  %v2524_v24 = vmul.f32 %v2520_v45, %v2505_v5  ;;  %v2523_v25 = vmul.f32 %v2516_v57, %v2504_v2  ;;  %v5142_v26 = vld [vmem:[%s6221_s27] ss:$8 sps:$4 sm:$0xff]   ;;  %v5169_v2 = vld [vmem:[%s6221_s27 + $0x90] ss:$8 sps:$4 sm:$0xff]   ;;  %v5174_v5 = vld [vmem:[%s6221_s27 + $0xa4] ss:$8 sps:$4 sm:$0xff]  }
 0x973   : > { %v5172_v6 = vld [vmem:[%s6221_s27 + $0xa0] ss:$8 sps:$4 sm:$0xff]  }
 0x974   : > { %v2526_v62 = vmul.f32 %v2520_v45, %v2507_v22  ;;  %v2525_v61 = vmul.f32 %v2516_v57, %v2506_v60  ;;  %v2543_v27 = vadd.f32 %v2539_v54, %v2524_v24  ;;  %v2542_v21 = vadd.f32 %v2535_v7, %v2523_v25  ;;  %v5180_v60 = vld [vmem:[%s6221_s27 + $0xc4] ss:$8 sps:$4 sm:$0xff]   ;;  %v5178_v22 = vld [vmem:[%s6221_s27 + $0xc0] ss:$8 sps:$4 sm:$0xff]   ;;  %v2618_v24 = vld [vmem:[%s6213_s4] sm:$0xf] }
 0x975   : > { %v5183_v25 = vld [vmem:[%s6221_s27 + $0xd4] ss:$8 sps:$4 sm:$0xff]   ;;  %s5618_s4 = scalar_lea.vmem %s4087_s20, 1024 }
 0x976   : > { %v2545_v28 = vadd.f32 %v2539_v54, %v2526_v62  ;;  %v2544_v30 = vadd.f32 %v2535_v7, %v2525_v61  ;;  %v5181_v62 = vld [vmem:[%s6221_s27 + $0xd0] ss:$8 sps:$4 sm:$0xff]   ;;  %v6760_v61 = vrot.slane %v2618_v24, %v6362_v4  ;;  %p5619_p11 = scmp.ne.s32.totalorder %s4087_s20, %s5618_s4  ;;  %p5626_p12 = scmp.lt.s32.totalorder %s5618_s4, %s5618_s4 }
 0x977   : > { %v5283_v23 = vpop.eup %5282 }
 0x978   : > { %v2615_v1 = vpack.c.bf16 %v2545_v28, %v2543_v27  ;;  %v2614_v11 = vpack.c.bf16 %v2544_v30, %v2542_v21  ;;  %v2509_v32 = vmul.f32 %v5283_v23, %v6668_v53  ;;  %v2508_v10 = vmul.f32 %v5283_v23, %v6665_v51  ;;  %v5145_v51 = vld [vmem:[%s6221_s27 + $0x10] ss:$8 sps:$4 sm:$0xff]   ;;  %v5186_v30 = vld [vmem:[%s6221_s27 + $0xe4] ss:$8 sps:$4 sm:$0xff]   ;;  %p5620_p4 = pnand %p5619_p11, %p4806_p10  ;;  %p5627_p5 = por %p5626_p12, %p5625_p6 }
 0x979   : > { %v5285_v41 = vpop.eup %5284  ;;  %v6764_v27 = vrot.slane %v2618_v24, %v1125_v47  ;;  %v6767_v28 = vrot.slane %v2618_v24, %v6359_v3  ;;  %v6771_v21 = vrot.slane %v2618_v24, %v1129_v48 }
 0x97a   : > { %2992 = vmatprep.mubr.bf16.mxu0 %v2615_v1  ;;  %3045 = vmatprep.mubr.bf16.mxu1 %v2615_v1  ;;  %v2511_v13 = vmul.f32 %v5285_v41, %v6674_v9  ;;  %v2528_v36 = vmul.f32 %v2520_v45, %v2509_v32  ;;  %v2510_v37 = vmul.f32 %v5285_v41, %v6671_v56  ;;  %p5621_p13 = pneg %p5620_p4 }
 0x97b   : > { %2993 = vmatmul.mubr.bf16.vlgmr.msra.gmra.mrb[16].mxu0 %v2614_v11  ;;  %3046 = vmatmul.mubr.bf16.vlgmr.msra.gmra.mrb[32].mxu1 %v2614_v11  ;;  %v2527_v17 = vmul.f32 %v2516_v57, %v2508_v10  ;;  %v5184_v11 = vld [vmem:[%s6221_s27 + $0xe0] ss:$8 sps:$4 sm:$0xff]  }
 0x97c   : > { %v2530_v53 = vmul.f32 %v2520_v45, %v2511_v13  ;;  %v2529_v63 = vmul.f32 %v2516_v57, %v2510_v37  ;;  %3939 = vmatpush1.bf16.msra.mxu0 %v5142_v26  ;;  %v2547_v18 = vadd.f32 %v2539_v54, %v2528_v36  ;;  %v5168_v57 = vld [vmem:[%s6221_s27 + $0x84] ss:$8 sps:$4 sm:$0xff]   ;;  %v5166_v45 = vld [vmem:[%s6221_s27 + $0x80] ss:$8 sps:$4 sm:$0xff]   ;;  %p5628_p9 = pnand %p5627_p5, %p5621_p13 }
 0x97d   : > { %3940 = vmatprep.subr.bf16.mxu0 %v5147_v8  ;;  %v2546_v15 = vadd.f32 %v2535_v7, %v2527_v17 }
 0x97e   : > { %v2549_v19 = vadd.f32 %v2539_v54, %v2530_v53  ;;  %v2548_v9 = vadd.f32 %v2535_v7, %v2529_v63  ;;  %v5177_v7 = vld [vmem:[%s6221_s27 + $0xb4] ss:$8 sps:$4 sm:$0xff]   ;;  %v5175_v54 = vld [vmem:[%s6221_s27 + $0xb0] ss:$8 sps:$4 sm:$0xff]  }
 0x980   : > { %v2617_v42 = vpack.c.bf16 %v2549_v19, %v2547_v18  ;;  %v2616_v56 = vpack.c.bf16 %v2548_v9, %v2546_v15  ;;  %3941 = vmatpush1.bf16.msra.mxu0 %v5145_v51  ;;  %v5187_v18 = vld [vmem:[%s6221_s27 + $0xf0] ss:$8 sps:$4 sm:$0xff]   ;;  %v5189_v9 = vld [vmem:[%s6221_s27 + $0xf4] ss:$8 sps:$4 sm:$0xff]  }
 0x981   : > { %3942 = vmatprep.subr.bf16.mxu0 %v5150_v12 }
 0x982   : > { %3002 = vmatprep.mubr.bf16.mxu0 %v2617_v42  ;;  %3055 = vmatprep.mubr.bf16.mxu1 %v2617_v42 }
 0x983   : > { %3003 = vmatmul.mubr.bf16.gmra.mrb[20].mxu0 %v2616_v56  ;;  %3056 = vmatmul.mubr.bf16.gmra.mrb[36].mxu1 %v2616_v56 }
 0x984   : > { %3943 = vmatpush1.bf16.msra.mxu0 %v5148_v43  ;;  %v5192_v43 = vld [vmem:[%s6221_s27 + $0x104] ss:$8 sps:$4 sm:$0xff]  }
 0x985   : > { %3944 = vmatprep.subr.bf16.mxu0 %v5153_v14 }
 0x988   : > { %3945 = vmatpush1.bf16.msra.mxu0 %v5151_v16 }
 0x989   : > { %3946 = vmatprep.subr.bf16.mxu0 %v5156_v40 }
 0x98c   : > { %3947 = vmatpush1.bf16.msra.mxu0 %v5154_v44 }
 0x98d   : > { %3948 = vmatprep.subr.bf16.mxu0 %v5159_v49 }
 0x990   : > { %3949 = vmatpush1.bf16.msra.mxu0 %v5157_v50 }
 0x991   : > { %3950 = vmatprep.subr.bf16.mxu0 %v5162_v0 }
 0x994   : > { %3951 = vmatpush1.bf16.msra.mxu0 %v5160_v55 }
 0x995   : > { %3952 = vmatprep.subr.bf16.mxu0 %v5165_v46 }
 0x998   : > { %3953 = vmatpush1.bf16.msra.mxu0 %v5163_v52 }
 0x999   : > { %3954 = vmatprep.subr.bf16.mxu0 %v5168_v57 }
 0x99c   : > { %3955 = vmatpush1.bf16.msra.mxu0 %v5166_v45 }
 0x99d   : > { %3956 = vmatprep.subr.bf16.mxu0 %v5171_v58 }
 0x9a0   : > { %3957 = vmatpush1.bf16.msra.mxu0 %v5169_v2 }
 0x9a1   : > { %3958 = vmatprep.subr.bf16.mxu0 %v5174_v5 }
 0x9a4   : > { %3959 = vmatpush1.bf16.msra.mxu0 %v5172_v6 }
 0x9a5   : > { %3960 = vmatprep.subr.bf16.mxu0 %v5177_v7 }
 0x9a8   : > { %3961 = vmatpush1.bf16.msra.mxu0 %v5175_v54 }
 0x9a9   : > { %3962 = vmatprep.subr.bf16.mxu0 %v5180_v60 }
 0x9ac   : > { %3963 = vmatpush1.bf16.msra.mxu0 %v5178_v22 }
 0x9ad   : > { %3964 = vmatprep.subr.bf16.mxu0 %v5183_v25 }
 0x9b0   : > { %3965 = vmatpush1.bf16.msra.mxu0 %v5181_v62 }
 0x9b1   : > { %3966 = vmatprep.subr.bf16.mxu0 %v5186_v30 }
 0x9b4   : > { %3967 = vmatpush1.bf16.msra.mxu0 %v5184_v11 }
 0x9b5   : > { %3968 = vmatprep.subr.bf16.mxu0 %v5189_v9 }
 0x9b8   : > { %3969 = vmatpush1.bf16.msra.mxu0 %v5187_v18 }
 0x9b9   : > { %3991 = vmatprep.subr.bf16.mxu0 %v5192_v43 }
 0xa4e   : > { %v2994_v23 = vpop.f32.mrb[16].mxu0  ;;  %v3047_v1 = vpop.f32.mrb[32].mxu1 }
 0xa4f   : > { %v6776_v32 = vadd.f32 %v2994_v23, %v6760_v61  ;;  %v6779_v10 = vadd.f32 %v3047_v1, %v6764_v27  ;;  %v2996_v47 = vpop.f32.mrb[17].mxu0  ;;  %v3049_v26 = vpop.f32.mrb[33].mxu1 }
 0xa50   : > { %v6782_v41 = vadd.f32 %v2996_v47, %v6767_v28  ;;  %v6785_v59 = vadd.f32 %v3049_v26, %v6771_v21  ;;  %v2998_v48 = vpop.f32.mrb[18].mxu0  ;;  %v6787_v8 = vpop.f32.mrb[34].mxu1 }
 0xa51   : > { %v3082_v13 = vmul.f32 0.70710677, %v6776_v32  ;;  %v3084_v36 = vmul.f32 0.70710677, %v6779_v10  ;;  %v6797_v51 = vpop.f32.mrb[19].mxu0  ;;  %v6799_v12 = vpop.f32.mrb[35].mxu1  ;;  %v2999_v9 = vadd.f32 %v2998_v48, %v6760_v61 }
 0xa52   : > { %v3083_v37 = vmul.f32 0.70710677, %v6782_v41  ;;  %v3085_v17 = vmul.f32 0.70710677, %v6785_v59 }
 0xa53   : > { %v6793_v53 = vclamps-f32 %v3082_v13, 4.0  ;;  %v6795_v63 = vclamps-f32 %v3084_v36, 4.0 }
 0xa54   : > { %v6802_v19 = vclamps-f32 %v3083_v37, 4.0  ;;  %v6804_v15 = vclamps-f32 %v3085_v17, 4.0 }
 0xa55   : > { %v6809_v42 = vmul.f32 %v6793_v53, %v6793_v53  ;;  %v6813_v56 = vmul.f32 %v6795_v63, %v6795_v63 }
 0xa56   : > { %v6818_v14 = vmul.f32 %v6802_v19, %v6802_v19  ;;  %v6820_v16 = vpop.f32.mrb[20].mxu0  ;;  %v6822_v40 = vpop.f32.mrb[36].mxu1  ;;  %v6829_v0 = vmul.f32 %v6804_v15, %v6804_v15 }
 0xa57   : > { %v3146_v44 = vmul.f32 -2.7261424e-10, %v6809_v42  ;;  %v3354_v49 = vmul.f32 -1.45660715e-05, %v6809_v42  ;;  %v3148_v50 = vmul.f32 -2.7261424e-10, %v6813_v56 }
 0xa58   : > { %v3356_v55 = vmul.f32 -1.45660715e-05, %v6813_v56  ;;  %v3147_v46 = vmul.f32 -2.7261424e-10, %v6818_v14  ;;  %v3355_v52 = vmul.f32 -1.45660715e-05, %v6818_v14 }
 0xa59   : > { %v3162_v57 = vadd.f32 2.7706815e-08, %v3146_v44  ;;  %v3370_v45 = vadd.f32 -0.00021337405, %v3354_v49  ;;  %v3164_v58 = vadd.f32 2.7706815e-08, %v3148_v50 }
 0xa5a   : > { %v3372_v2 = vadd.f32 -0.00021337405, %v3356_v55  ;;  %v3163_v5 = vadd.f32 2.7706815e-08, %v3147_v46  ;;  %v3371_v6 = vadd.f32 -0.00021337405, %v3355_v52 }
 0xa5b   : > { %v3178_v7 = vmul.f32 %v3162_v57, %v6809_v42  ;;  %v3386_v54 = vmul.f32 %v3370_v45, %v6809_v42  ;;  %v3180_v60 = vmul.f32 %v3164_v58, %v6813_v56  ;;  %v3149_v22 = vmul.f32 -2.7261424e-10, %v6829_v0  ;;  %v6838_v24 = vpop.f32.mrb[21].mxu0  ;;  %v6840_v25 = vpop.f32.mrb[37].mxu1 }
 0xa5c   : > { %v3388_v62 = vmul.f32 %v3372_v2, %v6813_v56  ;;  %v3179_v30 = vmul.f32 %v3163_v5, %v6818_v14  ;;  %v3387_v23 = vmul.f32 %v3371_v6, %v6818_v14  ;;  %v3357_v1 = vmul.f32 -1.45660715e-05, %v6829_v0  ;;  %v6846_v11 = vpop.f32.mrb[22].mxu0  ;;  %v6848_v47 = vpop.f32.mrb[38].mxu1 }
 0xa5d   : > { %v3194_v26 = vadd.f32 -2.101024e-06, %v3178_v7  ;;  %v3402_v13 = vadd.f32 -0.001682827, %v3386_v54  ;;  %v3196_v36 = vadd.f32 -2.101024e-06, %v3180_v60  ;;  %v3052_v58 = vadd.f32 %v6787_v8, %v6764_v27 }
 0xa5e   : > { %v3404_v37 = vadd.f32 -0.001682827, %v3388_v62  ;;  %v3195_v17 = vadd.f32 -2.101024e-06, %v3179_v30  ;;  %v3403_v18 = vadd.f32 -0.001682827, %v3387_v23 }
 0xa5f   : > { %v3210_v43 = vmul.f32 %v3194_v26, %v6809_v42  ;;  %v3418_v44 = vmul.f32 %v3402_v13, %v6809_v42  ;;  %v3212_v49 = vmul.f32 %v3196_v36, %v6813_v56  ;;  %v3165_v50 = vadd.f32 2.7706815e-08, %v3149_v22  ;;  %v6854_v55 = vpop.f32.mrb[23].mxu0  ;;  %v6856_v46 = vpop.f32.mrb[39].mxu1 }
 0xa60   : > { %v3420_v52 = vmul.f32 %v3404_v37, %v6813_v56  ;;  %v3211_v57 = vmul.f32 %v3195_v17, %v6818_v14  ;;  %v3373_v45 = vadd.f32 -0.00021337405, %v3357_v1  ;;  %v3419_v60 = vmul.f32 %v3403_v18, %v6818_v14 }
 0xa61   : > { %v3226_v48 = vadd.f32 -5.6925062e-05, %v3210_v43  ;;  %v3434_v2 = vadd.f32 -0.0073733293, %v3418_v44  ;;  %v3228_v5 = vadd.f32 -5.6925062e-05, %v3212_v49  ;;  %v3181_v6 = vmul.f32 %v3165_v50, %v6829_v0 }
 0xa62   : > { %v3436_v7 = vadd.f32 -0.0073733293, %v3420_v52  ;;  %v3227_v54 = vadd.f32 -5.6925062e-05, %v3211_v57  ;;  %v3389_v22 = vmul.f32 %v3373_v45, %v6829_v0  ;;  %v6866_v62 = vmul.f32 0.5, %v6776_v32 }
 0xa63   : > { %v3242_v30 = vmul.f32 %v3226_v48, %v6809_v42  ;;  %v3244_v23 = vmul.f32 %v3228_v5, %v6813_v56  ;;  %v3197_v1 = vadd.f32 -2.101024e-06, %v3181_v6  ;;  %v3450_v8 = vmul.f32 %v3434_v2, %v6809_v42 }
 0xa64   : > { %v3243_v26 = vmul.f32 %v3227_v54, %v6818_v14  ;;  %v3405_v13 = vadd.f32 -0.001682827, %v3389_v22  ;;  %v3086_v36 = vmul.f32 0.70710677, %v2999_v9  ;;  %v3452_v18 = vmul.f32 %v3436_v7, %v6813_v56 }
 0xa65   : > { %v3258_v37 = vadd.f32 -0.00073499064, %v3242_v30  ;;  %v3260_v17 = vadd.f32 -0.00073499064, %v3244_v23  ;;  %v3213_v43 = vmul.f32 %v3197_v1, %v6829_v0  ;;  %v3435_v32 = vadd.f32 -0.0073733293, %v3419_v60 }
 0xa66   : > { %v3259_v44 = vadd.f32 -0.00073499064, %v3243_v26  ;;  %v3421_v49 = vmul.f32 %v3405_v13, %v6829_v0  ;;  %v3088_v50 = vmul.f32 0.70710677, %v3052_v58  ;;  %v6877_v57 = vmul.f32 0.5, %v6779_v10 }
 0xa67   : > { %v3274_v52 = vmul.f32 %v3258_v37, %v6809_v42  ;;  %v3276_v45 = vmul.f32 %v3260_v17, %v6813_v56  ;;  %v3229_v48 = vadd.f32 -5.6925062e-05, %v3213_v43  ;;  %v3466_v2 = vadd.f32 -0.014264739, %v3450_v8 }
 0xa68   : > { %v3275_v5 = vmul.f32 %v3259_v44, %v6818_v14  ;;  %v3437_v6 = vadd.f32 -0.0073733293, %v3421_v49  ;;  %v6881_v7 = vclamps-f32 %v3086_v36, 4.0  ;;  %v3468_v60 = vadd.f32 -0.014264739, %v3452_v18 }
 0xa69   : > { %v3290_v54 = vadd.f32 -0.0029546, %v3274_v52  ;;  %v3292_v22 = vadd.f32 -0.0029546, %v3276_v45  ;;  %v3245_v30 = vmul.f32 %v3229_v48, %v6829_v0  ;;  %v3451_v23 = vmul.f32 %v3435_v32, %v6818_v14 }
 0xa6a   : > { %v6887_v10 = vmul.f32 %v6881_v7, %v6881_v7  ;;  %v6889_v1 = vclamps-f32 %v3088_v50, 4.0  ;;  %v6893_v8 = vadd.f32 %v6797_v51, %v6767_v28  ;;  %v3291_v26 = vadd.f32 -0.0029546, %v3275_v5 }
 0xa6b   : > { %v3261_v13 = vadd.f32 -0.00073499064, %v3245_v30  ;;  %v3453_v36 = vmul.f32 %v3437_v6, %v6829_v0  ;;  %v6896_v37 = vmul.f32 0.5, %v2999_v9  ;;  %v3306_v17 = vmul.f32 %v3290_v54, %v6809_v42 }
 0xa6c   : > { %5286 = vrcp.f32 %v3466_v2  ;;  %v3150_v18 = vmul.f32 -2.7261424e-10, %v6887_v10  ;;  %v3358_v43 = vmul.f32 -1.45660715e-05, %v6887_v10  ;;  %v3308_v44 = vmul.f32 %v3292_v22, %v6813_v56 }
 0xa6d   : > { %5288 = vrcp.f32 %v3468_v60  ;;  %v6902_v32 = vmul.f32 0.5, %v3052_v58  ;;  %v6906_v51 = vmul.f32 %v6889_v1, %v6889_v1  ;;  %v3467_v49 = vadd.f32 -0.014264739, %v3451_v23 }
 0xa6e   : > { %v3166_v50 = vadd.f32 2.7706815e-08, %v3150_v18  ;;  %v3374_v9 = vadd.f32 -0.00021337405, %v3358_v43  ;;  %v3307_v52 = vmul.f32 %v3291_v26, %v6818_v14  ;;  %v3277_v42 = vmul.f32 %v3261_v13, %v6829_v0 }
 0xa6f   : > { %v3469_v45 = vadd.f32 -0.014264739, %v3453_v36  ;;  %v3152_v48 = vmul.f32 -2.7261424e-10, %v6906_v51  ;;  %v3322_v2 = vadd.f32 -0.016096033, %v3306_v17  ;;  %v6917_v60 = vadd.f32 %v6799_v12, %v6771_v21 }
 0xa70   : > { %v3182_v56 = vmul.f32 %v3166_v50, %v6887_v10  ;;  %v3390_v58 = vmul.f32 %v3374_v9, %v6887_v10  ;;  %v3360_v5 = vmul.f32 -1.45660715e-05, %v6906_v51  ;;  %v3324_v6 = vadd.f32 -0.016096033, %v3308_v44 }
 0xa71   : > { %v3168_v54 = vadd.f32 2.7706815e-08, %v3152_v48  ;;  %v3087_v22 = vmul.f32 0.70710677, %v6893_v8  ;;  %v6921_v26 = vadd.f32 %v6820_v16, %v6760_v61  ;;  %v3293_v13 = vadd.f32 -0.0029546, %v3277_v42 }
 0xa72   : > { %v3198_v14 = vadd.f32 -2.101024e-06, %v3182_v56  ;;  %v3406_v30 = vadd.f32 -0.001682827, %v3390_v58  ;;  %v3376_v23 = vadd.f32 -0.00021337405, %v3360_v5  ;;  %v6928_v18 = vadd.f32 %v6822_v40, %v6764_v27 }
 0xa73   : > { %v3184_v36 = vmul.f32 %v3168_v54, %v6906_v51  ;;  %v6924_v17 = vclamps-f32 %v3087_v22, 4.0  ;;  %v3323_v43 = vadd.f32 -0.016096033, %v3307_v52  ;;  %v6934_v50 = vadd.f32 %v6838_v24, %v6767_v28 }
 0xa74   : > { %v3214_v12 = vmul.f32 %v3198_v14, %v6887_v10  ;;  %v3422_v44 = vmul.f32 %v3406_v30, %v6887_v10  ;;  %v3338_v16 = vmul.f32 %v6793_v53, %v3322_v2  ;;  %5290 = vrcp.f32 %v3467_v49 }
 0xa75   : > { %v3200_v9 = vadd.f32 -2.101024e-06, %v3184_v36  ;;  %v3392_v42 = vmul.f32 %v3376_v23, %v6906_v51  ;;  %v3340_v56 = vmul.f32 %v6795_v63, %v3324_v6  ;;  %5292 = vrcp.f32 %v3469_v45 }
 0xa76   : > { %v5287_v48 = vpop.eup %5286  ;;  %v3230_v40 = vadd.f32 -5.6925062e-05, %v3214_v12  ;;  %v3438_v52 = vadd.f32 -0.0073733293, %v3422_v44  ;;  %v3309_v5 = vmul.f32 %v3293_v13, %v6829_v0  ;;  %v6943_v24 = vmul.f32 %v6924_v17, %v6924_v17 }
 0xa77   : > { %v5289_v58 = vpop.eup %5288  ;;  %v3216_v54 = vmul.f32 %v3200_v9, %v6906_v51  ;;  %v3408_v22 = vadd.f32 -0.001682827, %v3392_v42  ;;  %v6946_v53 = vmul.f32 %v6802_v19, %v3323_v43  ;;  %v3089_v45 = vmul.f32 0.70710677, %v6917_v60 }
 0xa78   : > { %v3246_v49 = vmul.f32 %v3230_v40, %v6887_v10  ;;  %v3454_v63 = vmul.f32 %v3438_v52, %v6887_v10  ;;  %v3498_v2 = vmul.f32 %v5287_v48, %v3338_v16  ;;  %v3151_v14 = vmul.f32 -2.7261424e-10, %v6943_v24 }
 0xa79   : > { %v3232_v6 = vadd.f32 -5.6925062e-05, %v3216_v54  ;;  %v3424_v0 = vmul.f32 %v3408_v22, %v6906_v51  ;;  %v3500_v30 = vmul.f32 %v5289_v58, %v3340_v56  ;;  %v3359_v36 = vmul.f32 -1.45660715e-05, %v6943_v24 }
 0xa7a   : > { %v3262_v23 = vadd.f32 -0.00073499064, %v3246_v49  ;;  %v3470_v13 = vadd.f32 -0.014264739, %v3454_v63  ;;  %v6954_v12 = vadd.f32 -0.016096033, %v3309_v5 }
 0xa7b   : > { %v3248_v19 = vmul.f32 %v3232_v6, %v6906_v51  ;;  %v3440_v43 = vadd.f32 -0.0073733293, %v3424_v0  ;;  %v3167_v44 = vadd.f32 2.7706815e-08, %v3151_v14  ;;  %v3375_v16 = vadd.f32 -0.00021337405, %v3359_v36 }
 0xa7c   : > { %v3278_v9 = vmul.f32 %v3262_v23, %v6887_v10  ;;  %5294 = vrcp.f32 %v3470_v13  ;;  %v6958_v42 = vclamps-f32 %v3089_v45, 4.0  ;;  %v3514_v48 = vadd.f32 1.0, %v3498_v2 }
 0xa7d   : > { %v3264_v40 = vadd.f32 -0.00073499064, %v3248_v19  ;;  %v3456_v56 = vmul.f32 %v3440_v43, %v6906_v51  ;;  %v3183_v52 = vmul.f32 %v3167_v44, %v6943_v24  ;;  %v6962_v58 = vadd.f32 1.0, %v3500_v30 }
 0xa7e   : > { %v3294_v5 = vadd.f32 -0.0029546, %v3278_v9  ;;  %v3391_v54 = vmul.f32 %v3375_v16, %v6943_v24  ;;  %v6967_v22 = vmul.f32 %v6958_v42, %v6958_v42  ;;  %v6969_v49 = vpop.eup %5290  ;;  %v3090_v6 = vmul.f32 0.70710677, %v6921_v26 }
 0xa7f   : > { %v3280_v63 = vmul.f32 %v3264_v40, %v6906_v51  ;;  %v3472_v45 = vadd.f32 -0.014264739, %v3456_v56  ;;  %v3199_v2 = vadd.f32 -2.101024e-06, %v3183_v52  ;;  %v6973_v0 = vpop.eup %5292  ;;  %v6983_v56 = vmul.f32 %v3514_v48, %v6866_v62 }
 0xa80   : > { %v3310_v14 = vmul.f32 %v3294_v5, %v6887_v10  ;;  %v3407_v30 = vadd.f32 -0.001682827, %v3391_v54  ;;  %v3153_v23 = vmul.f32 -2.7261424e-10, %v6967_v22  ;;  %v3361_v13 = vmul.f32 -1.45660715e-05, %v6967_v22 }
 0xa81   : > { %v3296_v36 = vadd.f32 -0.0029546, %v3280_v63  ;;  %5296 = vrcp.f32 %v3472_v45  ;;  %v3215_v19 = vmul.f32 %v3199_v2, %v6943_v24  ;;  %v6979_v43 = vclamps-f32 %v3090_v6, 4.0 }
 0xa82   : > { %v3326_v44 = vadd.f32 -0.016096033, %v3310_v14  ;;  %v3423_v9 = vmul.f32 %v3407_v30, %v6943_v24  ;;  %v3169_v16 = vadd.f32 2.7706815e-08, %v3153_v23  ;;  %v3377_v40 = vadd.f32 -0.00021337405, %v3361_v13 }
 0xa83   : > { %v3312_v10 = vmul.f32 %v3296_v36, %v6906_v51  ;;  %v3231_v52 = vadd.f32 -5.6925062e-05, %v3215_v19  ;;  %v6988_v5 = vmul.f32 %v6979_v43, %v6979_v43  ;;  %v3092_v36 = vmul.f32 0.70710677, %v6928_v18 }
 0xa84   : > { %v3342_v54 = vmul.f32 %v6881_v7, %v3326_v44  ;;  %v3439_v63 = vadd.f32 -0.0073733293, %v3423_v9  ;;  %v3185_v45 = vmul.f32 %v3169_v16, %v6967_v22  ;;  %v3393_v2 = vmul.f32 %v3377_v40, %v6967_v22 }
 0xa85   : > { %v3328_v6 = vadd.f32 -0.016096033, %v3312_v10  ;;  %v3247_v14 = vmul.f32 %v3231_v52, %v6943_v24  ;;  %v3154_v62 = vmul.f32 -2.7261424e-10, %v6988_v5  ;;  %v3362_v48 = vmul.f32 -1.45660715e-05, %v6988_v5 }
 0xa86   : > { %v5295_v51 = vpop.eup %5294  ;;  %v3455_v30 = vmul.f32 %v3439_v63, %v6943_v24  ;;  %v3201_v23 = vadd.f32 -2.101024e-06, %v3185_v45  ;;  %v3409_v13 = vadd.f32 -0.001682827, %v3393_v2  ;;  %v7003_v45 = vclamps-f32 %v3092_v36, 4.0 }
 0xa87   : > { %v3502_v7 = vmul.f32 %v5295_v51, %v3342_v54  ;;  %v3344_v19 = vmul.f32 %v6889_v1, %v3328_v6  ;;  %v3263_v44 = vadd.f32 -0.00073499064, %v3247_v14  ;;  %v3170_v9 = vadd.f32 2.7706815e-08, %v3154_v62 }
 0xa88   : > { %v3471_v16 = vadd.f32 -0.014264739, %v3455_v30  ;;  %v3217_v40 = vmul.f32 %v3201_v23, %v6967_v22  ;;  %v3425_v10 = vmul.f32 %v3409_v13, %v6967_v22  ;;  %v3378_v52 = vadd.f32 -0.00021337405, %v3362_v48 }
 0xa89   : > { %v3518_v38 = vadd.f32 1.0, %v3502_v7  ;;  %v3279_v33 = vmul.f32 %v3263_v44, %v6943_v24  ;;  %v3186_v63 = vmul.f32 %v3170_v9, %v6988_v5  ;;  %v7011_v48 = vmul.f32 %v7003_v45, %v7003_v45 }
 0xa8a   : > { %5298 = vrcp.f32 %v3471_v16  ;;  %v3233_v2 = vadd.f32 -5.6925062e-05, %v3217_v40  ;;  %v3441_v54 = vadd.f32 -0.0073733293, %v3425_v10  ;;  %v3394_v1 = vmul.f32 %v3378_v52, %v6988_v5 }
 0xa8b   : > { %v5297_v6 = vpop.eup %5296  ;;  %v7007_v14 = vmul.f32 %v3518_v38, %v6896_v37  ;;  %v3295_v62 = vadd.f32 -0.0029546, %v3279_v33  ;;  %v3202_v51 = vadd.f32 -2.101024e-06, %v3186_v63  ;;  %v3156_v33 = vmul.f32 -2.7261424e-10, %v7011_v48 }
 0xa8c   : > { %v3504_v30 = vmul.f32 %v5297_v6, %v3344_v19  ;;  %v3249_v23 = vmul.f32 %v3233_v2, %v6967_v22  ;;  %v3457_v13 = vmul.f32 %v3441_v54, %v6967_v22  ;;  %v3410_v36 = vadd.f32 -0.001682827, %v3394_v1 }
 0xa8d   : > { %v3610_v7 = vpack.c.bf16 %v7007_v14, %v6983_v56  ;;  %v3311_v44 = vmul.f32 %v3295_v62, %v6943_v24  ;;  %v3218_v38 = vmul.f32 %v3202_v51, %v6988_v5  ;;  %v7023_v19 = vmul.f32 %v6962_v58, %v6877_v57 }
 0xa8e   : > { %v3520_v37 = vadd.f32 1.0, %v3504_v30  ;;  %v3265_v9 = vadd.f32 -0.00073499064, %v3249_v23  ;;  %v3473_v16 = vadd.f32 -0.014264739, %v3457_v13  ;;  %v3426_v40 = vmul.f32 %v3410_v36, %v6988_v5 }
 0xa8f   : > { %v3327_v10 = vadd.f32 -0.016096033, %v3311_v44  ;;  %v3234_v52 = vadd.f32 -5.6925062e-05, %v3218_v38  ;;  %v3172_v63 = vadd.f32 2.7706815e-08, %v3156_v33  ;;  %v3499_v30 = vmul.f32 %v6969_v49, %v6946_v53 }
 0xa90   : > { %v7026_v2 = vmul.f32 %v3520_v37, %v6902_v32  ;;  %v3281_v24 = vmul.f32 %v3265_v9, %v6967_v22  ;;  %5300 = vrcp.f32 %v3473_v16  ;;  %v3442_v54 = vadd.f32 -0.0073733293, %v3426_v40 }
 0xa91   : > { %v3343_v1 = vmul.f32 %v6924_v17, %v3327_v10  ;;  %v3250_v6 = vmul.f32 %v3234_v52, %v6988_v5  ;;  %v3188_v62 = vmul.f32 %v3172_v63, %v7011_v48  ;;  %v3364_v51 = vmul.f32 -1.45660715e-05, %v7011_v48 }
 0xa92   : > { %v3612_v57 = vpack.c.bf16 %v7026_v2, %v7023_v19  ;;  %v3297_v58 = vadd.f32 -0.0029546, %v3281_v24  ;;  %v7037_v32 = vadd.f32 %v6840_v25, %v6771_v21  ;;  %v3341_v36 = vmul.f32 %v6804_v15, %v6954_v12 }
 0xa93   : > { %v3266_v23 = vadd.f32 -0.00073499064, %v3250_v6  ;;  %v3204_v13 = vadd.f32 -2.101024e-06, %v3188_v62  ;;  %v3091_v38 = vmul.f32 0.70710677, %v6934_v50  ;;  %v7047_v33 = vadd.f32 %v6846_v11, %v6760_v61 }
 0xa94   : > { %v5299_v17 = vpop.eup %5298  ;;  %v3313_v44 = vmul.f32 %v3297_v58, %v6967_v22  ;;  %v3458_v25 = vmul.f32 %v3442_v54, %v6988_v5  ;;  %v3380_v53 = vadd.f32 -0.00021337405, %v3364_v51  ;;  %v3093_v15 = vmul.f32 0.70710677, %v7037_v32 }
 0xa95   : > { %v3503_v37 = vmul.f32 %v5299_v17, %v3343_v1  ;;  %v3220_v9 = vmul.f32 %v3204_v13, %v7011_v48  ;;  %v3282_v16 = vmul.f32 %v3266_v23, %v6988_v5  ;;  %v7052_v40 = vclamps-f32 %v3091_v38, 4.0 }
 0xa96   : > { %v3329_v49 = vadd.f32 -0.016096033, %v3313_v44  ;;  %v3071_v12 = vmul.f32 0.5, %v6893_v8  ;;  %v7061_v52 = vclamps-f32 %v3093_v15, 4.0  ;;  %v3515_v63 = vadd.f32 1.0, %v3499_v30 }
 0xa97   : > { %v3519_v22 = vadd.f32 1.0, %v3503_v37  ;;  %v3236_v61 = vadd.f32 -5.6925062e-05, %v3220_v9  ;;  %v7059_v11 = vmul.f32 %v7052_v40, %v7052_v40  ;;  %v3474_v24 = vadd.f32 -0.014264739, %v3458_v25 }
 0xa98   : > { %v3345_v10 = vmul.f32 %v6958_v42, %v3329_v49  ;;  %v3396_v54 = vmul.f32 %v3380_v53, %v7011_v48  ;;  %v3094_v1 = vmul.f32 0.70710677, %v7047_v33  ;;  %v3501_v62 = vmul.f32 %v6973_v0, %v3341_v36 }
 0xa99   : > { %v3298_v8 = vadd.f32 -0.0029546, %v3282_v16  ;;  %v3155_v51 = vmul.f32 -2.7261424e-10, %v7059_v11  ;;  %v7069_v42 = vmul.f32 %v7061_v52, %v7061_v52  ;;  %v3363_v23 = vmul.f32 -1.45660715e-05, %v7059_v11 }
 0xa9a   : > { %v5301_v6 = vpop.eup %5300  ;;  %v7072_v13 = vclamps-f32 %v3094_v1, 4.0  ;;  %v3067_v30 = vmul.f32 0.5, %v6782_v41  ;;  %v3535_v17 = vmul.f32 %v3519_v22, %v3071_v12  ;;  %v3252_v44 = vmul.f32 %v3236_v61, %v7011_v48 }
 0xa9b   : > { %v3505_v58 = vmul.f32 %v5301_v6, %v3345_v10  ;;  %v3171_v38 = vadd.f32 2.7706815e-08, %v3155_v51  ;;  %5302 = vrcp.f32 %v3474_v24  ;;  %v3412_v36 = vadd.f32 -0.001682827, %v3396_v54  ;;  %v5190_v24 = vld [vmem:[%s6221_s27 + $0x100] ss:$8 sps:$4 sm:$0xff]  }
 0xa9c   : > { %v3157_v37 = vmul.f32 -2.7261424e-10, %v7069_v42  ;;  %v3531_v25 = vmul.f32 %v3515_v63, %v3067_v30  ;;  %v3517_v9 = vadd.f32 1.0, %v3501_v62  ;;  %v3073_v53 = vmul.f32 0.5, %v6917_v60  ;;  %v5195_v54 = vld [vmem:[%s6221_s27 + $0x114] ss:$8 sps:$4 sm:$0xff]  }
 0xa9d   : > { %v3521_v0 = vadd.f32 1.0, %v3505_v58  ;;  %v3314_v49 = vmul.f32 %v3298_v8, %v6988_v5  ;;  %v3187_v16 = vmul.f32 %v3171_v38, %v7059_v11  ;;  %v3379_v41 = vadd.f32 -0.00021337405, %v3363_v23  ;;  %v5193_v30 = vld [vmem:[%s6221_s27 + $0x110] ss:$8 sps:$4 sm:$0xff]  }
 0xa9e   : > { %v7082_v15 = vmul.f32 %v7072_v13, %v7072_v13  ;;  %v3069_v12 = vmul.f32 0.5, %v6785_v59  ;;  %v3268_v10 = vadd.f32 -0.00073499064, %v3252_v44  ;;  %v3611_v61 = vpack.c.bf16 %v3535_v17, %v3531_v25 }
 0xa9f   : > { %v7085_v22 = vmul.f32 %v3521_v0, %v3073_v53  ;;  %v3428_v63 = vmul.f32 %v3412_v36, %v7011_v48  ;;  %v3173_v60 = vadd.f32 2.7706815e-08, %v3157_v37  ;;  %v3330_v1 = vadd.f32 -0.016096033, %v3314_v49 }
 0xaa0   : > { %v7090_v5 = vmul.f32 %v3517_v9, %v3069_v12  ;;  %v3158_v6 = vmul.f32 -2.7261424e-10, %v7082_v15  ;;  %3970 = vmatprep.mubr.bf16.mxu0 %v3611_v61  ;;  %v3203_v62 = vadd.f32 -2.101024e-06, %v3187_v16  ;;  %v3395_v59 = vmul.f32 %v3379_v41, %v7059_v11  ;;  %v5201_v9 = vld [vmem:[%s6221_s27 + $0x134] ss:$8 sps:$4 sm:$0xff]  }
 0xaa1   : > { %v7096_v8 = vadd.f32 %v6848_v47, %v6764_v27  ;;  %3971 = vmatmul.mubr.bf16.vlgmr.msra.gmra.mrb[24].mxu0 %v3610_v7  ;;  %v3284_v51 = vmul.f32 %v3268_v10, %v7011_v48  ;;  %v3365_v58 = vmul.f32 -1.45660715e-05, %v7069_v42  ;;  %v3444_v44 = vadd.f32 -0.0073733293, %v3428_v63  ;;  %v5198_v27 = vld [vmem:[%s6221_s27 + $0x124] ss:$8 sps:$4 sm:$0xff]  }
 0xaa2   : > { %v3174_v23 = vadd.f32 2.7706815e-08, %v3158_v6  ;;  %3992 = vmatpush1.bf16.msra.mxu0 %v5190_v24  ;;  %v3613_v17 = vpack.c.bf16 %v7085_v22, %v7090_v5  ;;  %v3189_v38 = vmul.f32 %v3173_v60, %v7069_v42  ;;  %v3346_v47 = vmul.f32 %v6979_v43, %v3330_v1  ;;  %v5196_v7 = vld [vmem:[%s6221_s27 + $0x120] ss:$8 sps:$4 sm:$0xff]  }
 0xaa3   : > { %3993 = vmatprep.subr.bf16.mxu0 %v5195_v54  ;;  %v3366_v14 = vmul.f32 -1.45660715e-05, %v7082_v15  ;;  %v3219_v36 = vmul.f32 %v3203_v62, %v7059_v11  ;;  %v3411_v37 = vadd.f32 -0.001682827, %v3395_v59  ;;  %v3096_v25 = vmul.f32 0.70710677, %v7096_v8 }
 0xaa4   : > { %v3190_v56 = vmul.f32 %v3174_v23, %v7082_v15  ;;  %v3300_v53 = vadd.f32 -0.0029546, %v3284_v51  ;;  %v3381_v49 = vadd.f32 -0.00021337405, %v3365_v58  ;;  %v3460_v41 = vmul.f32 %v3444_v44, %v7011_v48 }
 0xaa5   : > { %v5303_v0 = vpop.eup %5302  ;;  %v3205_v12 = vadd.f32 -2.101024e-06, %v3189_v38  ;;  %v3382_v43 = vadd.f32 -0.00021337405, %v3366_v14  ;;  %v7116_v10 = vclamps-f32 %v3096_v25, 4.0  ;;  %v7121_v63 = vadd.f32 %v6854_v55, %v6767_v28 }
 0xaa6   : > { %v3206_v16 = vadd.f32 -2.101024e-06, %v3190_v56  ;;  %3994 = vmatpush1.bf16.msra.mxu0 %v5193_v30  ;;  %v3506_v61 = vmul.f32 %v5303_v0, %v3346_v47  ;;  %v3235_v60 = vadd.f32 -5.6925062e-05, %v3219_v36  ;;  %v3427_v54 = vmul.f32 %v3411_v37, %v7059_v11  ;;  %v5199_v55 = vld [vmem:[%s6221_s27 + $0x130] ss:$8 sps:$4 sm:$0xff]  }
 0xaa7   : > { %3995 = vmatprep.subr.bf16.mxu0 %v5198_v27  ;;  %v3398_v1 = vmul.f32 %v3382_v43, %v7082_v15  ;;  %v7127_v6 = vmul.f32 %v7116_v10, %v7116_v10  ;;  %v3074_v62 = vmul.f32 0.5, %v6921_v26  ;;  %v3397_v59 = vmul.f32 %v3381_v49, %v7069_v42  ;;  %v5204_v38 = vld [vmem:[%s6221_s27 + $0x144] ss:$8 sps:$4 sm:$0xff]   ;;  %v5202_v56 = vld [vmem:[%s6221_s27 + $0x140] ss:$8 sps:$4 sm:$0xff]  }
 0xaa8   : > { %v3222_v24 = vmul.f32 %v3206_v16, %v7082_v15  ;;  %v7132_v51 = vmul.f32 0.5, %v7047_v33  ;;  %v3316_v58 = vmul.f32 %v3300_v53, %v7011_v48  ;;  %v3476_v23 = vadd.f32 -0.014264739, %v3460_v41  ;;  %v5207_v36 = vld [vmem:[%s6221_s27 + $0x154] ss:$8 sps:$4 sm:$0xff]  }
 0xaa9   : > { %v3221_v30 = vmul.f32 %v3205_v12, %v7069_v42  ;;  %v3414_v44 = vadd.f32 -0.001682827, %v3398_v1  ;;  %v3160_v27 = vmul.f32 -2.7261424e-10, %v7127_v6  ;;  %v3368_v47 = vmul.f32 -1.45660715e-05, %v7127_v6 }
 0xaaa   : > { %v3238_v28 = vadd.f32 -5.6925062e-05, %v3222_v24  ;;  %3996 = vmatpush1.bf16.msra.mxu0 %v5196_v7  ;;  %v3095_v33 = vmul.f32 0.70710677, %v7121_v63  ;;  %v3522_v14 = vadd.f32 1.0, %v3506_v61  ;;  %v3251_v7 = vmul.f32 %v3235_v60, %v7059_v11 }
 0xaab   : > { %3997 = vmatprep.subr.bf16.mxu0 %v5201_v9  ;;  %v3443_v0 = vadd.f32 -0.0073733293, %v3427_v54  ;;  %v3430_v48 = vmul.f32 %v3414_v44, %v7082_v15  ;;  %v3413_v37 = vadd.f32 -0.001682827, %v3397_v59  ;;  %v3176_v9 = vadd.f32 2.7706815e-08, %v3160_v27 }
 0xaac   : > { %v3254_v26 = vmul.f32 %v3238_v28, %v7082_v15  ;;  %v7148_v53 = vadd.f32 %v6856_v46, %v6771_v21  ;;  %5304 = vrcp.f32 %v3476_v23  ;;  %v3237_v49 = vadd.f32 -5.6925062e-05, %v3221_v30  ;;  %v5205_v1 = vld [vmem:[%s6221_s27 + $0x150] ss:$8 sps:$4 sm:$0xff]  }
 0xaad   : > { %v3446_v16 = vadd.f32 -0.0073733293, %v3430_v48  ;;  %v3384_v41 = vadd.f32 -0.00021337405, %v3368_v47  ;;  %v3332_v12 = vadd.f32 -0.016096033, %v3316_v58  ;;  %v3192_v61 = vmul.f32 %v3176_v9, %v7127_v6 }
 0xaae   : > { %v3270_v25 = vadd.f32 -0.00073499064, %v3254_v26  ;;  %3998 = vmatpush1.bf16.msra.mxu0 %v5199_v55  ;;  %v7152_v24 = vclamps-f32 %v3095_v33, 4.0  ;;  %v3267_v60 = vadd.f32 -0.00073499064, %v3251_v7  ;;  %v3459_v54 = vmul.f32 %v3443_v0, %v7059_v11 }
 0xaaf   : > { %3999 = vmatprep.subr.bf16.mxu0 %v5204_v38  ;;  %v3462_v21 = vmul.f32 %v3446_v16, %v7082_v15  ;;  %v3400_v46 = vmul.f32 %v3384_v41, %v7127_v6  ;;  %v3208_v28 = vadd.f32 -2.101024e-06, %v3192_v61  ;;  %v3097_v58 = vmul.f32 0.70710677, %v7148_v53  ;;  %v5210_v26 = vld [vmem:[%s6221_s27 + $0x164] ss:$8 sps:$4 sm:$0xff]  }
 0xab0   : > { %v3286_v43 = vmul.f32 %v3270_v25, %v7082_v15  ;;  %v7160_v55 = vmul.f32 %v7152_v24, %v7152_v24  ;;  %v3253_v23 = vmul.f32 %v3237_v49, %v7069_v42  ;;  %v3429_v30 = vmul.f32 %v3413_v37, %v7069_v42  ;;  %v5208_v37 = vld [vmem:[%s6221_s27 + $0x160] ss:$8 sps:$4 sm:$0xff]   ;;  %v5213_v25 = vld [vmem:[%s6221_s27 + $0x174] ss:$8 sps:$4 sm:$0xff]  }
 0xab1   : > { %v3478_v44 = vadd.f32 -0.014264739, %v3462_v21  ;;  %v3416_v38 = vadd.f32 -0.001682827, %v3400_v46  ;;  %v3224_v47 = vmul.f32 %v3208_v28, %v7127_v6  ;;  %v7170_v0 = vmul.f32 %v3522_v14, %v3074_v62 }
 0xab2   : > { %v3302_v59 = vadd.f32 -0.0029546, %v3286_v43  ;;  %4000 = vmatpush1.bf16.msra.mxu0 %v5202_v56  ;;  %v3159_v33 = vmul.f32 -2.7261424e-10, %v7160_v55  ;;  %v3367_v7 = vmul.f32 -1.45660715e-05, %v7160_v55 }
 0xab3   : > { %4001 = vmatprep.subr.bf16.mxu0 %v5207_v36  ;;  %5306 = vrcp.f32 %v3478_v44  ;;  %v3432_v56 = vmul.f32 %v3416_v38, %v7127_v6  ;;  %v7173_v48 = vclamps-f32 %v3097_v58, 4.0  ;;  %v3283_v36 = vmul.f32 %v3267_v60, %v7059_v11  ;;  %v5211_v60 = vld [vmem:[%s6221_s27 + $0x170] ss:$8 sps:$4 sm:$0xff]  }
 0xab4   : > { %v3318_v27 = vmul.f32 %v3302_v59, %v7082_v15  ;;  %v3475_v9 = vadd.f32 -0.014264739, %v3459_v54  ;;  %v3240_v15 = vadd.f32 -5.6925062e-05, %v3224_v47  ;;  %v3175_v49 = vadd.f32 2.7706815e-08, %v3159_v33 }
 0xab5   : > { %v3445_v16 = vadd.f32 -0.0073733293, %v3429_v30  ;;  %v3448_v41 = vadd.f32 -0.0073733293, %v3432_v56  ;;  %v3383_v43 = vadd.f32 -0.00021337405, %v3367_v7  ;;  %v7180_v62 = vmul.f32 %v7173_v48, %v7173_v48 }
 0xab6   : > { %4002 = vmatpush1.bf16.msra.mxu0 %v5205_v1  ;;  %v3269_v14 = vadd.f32 -0.00073499064, %v3253_v23  ;;  %v3334_v61 = vadd.f32 -0.016096033, %v3318_v27  ;;  %v3256_v21 = vmul.f32 %v3240_v15, %v7127_v6  ;;  %v3191_v46 = vmul.f32 %v3175_v49, %v7160_v55  ;;  %v5305_v54 = vpop.eup %5304  ;;  %v5216_v30 = vld [vmem:[%s6221_s27 + $0x184] ss:$8 sps:$4 sm:$0xff]  }
 0xab7   : > { %4003 = vmatprep.subr.bf16.mxu0 %v5210_v26  ;;  %v3464_v59 = vmul.f32 %v3448_v41, %v7127_v6  ;;  %v3399_v1 = vmul.f32 %v3383_v43, %v7160_v55  ;;  %v3161_v28 = vmul.f32 -2.7261424e-10, %v7180_v62  ;;  %v3369_v58 = vmul.f32 -1.45660715e-05, %v7180_v62 }
 0xab8   : > { %v3348_v44 = vmul.f32 %v7003_v45, %v3332_v12  ;;  %v3299_v38 = vadd.f32 -0.0029546, %v3283_v36  ;;  %v3272_v23 = vadd.f32 -0.00073499064, %v3256_v21  ;;  %v3207_v26 = vadd.f32 -2.101024e-06, %v3191_v46 }
 0xab9   : > { %v3461_v27 = vmul.f32 %v3445_v16, %v7069_v42  ;;  %v3480_v47 = vadd.f32 -0.014264739, %v3464_v59  ;;  %v3415_v33 = vadd.f32 -0.001682827, %v3399_v1  ;;  %v3177_v7 = vadd.f32 2.7706815e-08, %v3161_v28 }
 0xaba   : > { %4004 = vmatpush1.bf16.msra.mxu0 %v5208_v37  ;;  %v3350_v56 = vmul.f32 %v7072_v13, %v3334_v61  ;;  %v3288_v15 = vmul.f32 %v3272_v23, %v7127_v6  ;;  %v3223_v49 = vmul.f32 %v3207_v26, %v7160_v55  ;;  %v3385_v41 = vadd.f32 -0.00021337405, %v3369_v58  ;;  %v5214_v36 = vld [vmem:[%s6221_s27 + $0x180] ss:$8 sps:$4 sm:$0xff]   ;;  %v5219_v13 = vld [vmem:[%s6221_s27 + $0x194] ss:$8 sps:$4 sm:$0xff]  }
 0xabb   : > { %4005 = vmatprep.subr.bf16.mxu0 %v5213_v25  ;;  %v3285_v45 = vmul.f32 %v3269_v14, %v7069_v42  ;;  %5308 = vrcp.f32 %v3480_v47  ;;  %v3431_v12 = vmul.f32 %v3415_v33, %v7160_v55  ;;  %v3193_v37 = vmul.f32 %v3177_v7, %v7180_v62  ;;  %v5217_v33 = vld [vmem:[%s6221_s27 + $0x190] ss:$8 sps:$4 sm:$0xff]   ;;  %v5222_v7 = vld [vmem:[%s6221_s27 + $0x1a4] ss:$8 sps:$4 sm:$0xff]  }
 0xabc   : > { %5310 = vrcp.f32 %v3475_v9  ;;  %v3304_v16 = vadd.f32 -0.0029546, %v3288_v15  ;;  %v3239_v43 = vadd.f32 -5.6925062e-05, %v3223_v49  ;;  %v3401_v25 = vmul.f32 %v3385_v41, %v7180_v62 }
 0xabd   : > { %v5307_v61 = vpop.eup %5306  ;;  %v3315_v21 = vmul.f32 %v3299_v38, %v7059_v11  ;;  %v3477_v46 = vadd.f32 -0.014264739, %v3461_v27  ;;  %v3447_v14 = vadd.f32 -0.0073733293, %v3431_v12  ;;  %v3209_v59 = vadd.f32 -2.101024e-06, %v3193_v37 }
 0xabe   : > { %4006 = vmatpush1.bf16.msra.mxu0 %v5211_v60  ;;  %v3510_v1 = vmul.f32 %v5307_v61, %v3350_v56  ;;  %v3320_v28 = vmul.f32 %v3304_v16, %v7127_v6  ;;  %v3255_v9 = vmul.f32 %v3239_v43, %v7160_v55  ;;  %v3417_v58 = vadd.f32 -0.001682827, %v3401_v25 }
 0xabf   : > { %4007 = vmatprep.subr.bf16.mxu0 %v5216_v30  ;;  %v3508_v23 = vmul.f32 %v5305_v54, %v3348_v44  ;;  %v3301_v26 = vadd.f32 -0.0029546, %v3285_v45  ;;  %v3463_v60 = vmul.f32 %v3447_v14, %v7160_v55  ;;  %v3225_v47 = vmul.f32 %v3209_v59, %v7180_v62 }
 0xac0   : > { %v3526_v15 = vadd.f32 1.0, %v3510_v1  ;;  %v3336_v11 = vadd.f32 -0.016096033, %v3320_v28  ;;  %v3271_v38 = vadd.f32 -0.00073499064, %v3255_v9  ;;  %v3433_v27 = vmul.f32 %v3417_v58, %v7180_v62 }
 0xac1   : > { %v3331_v30 = vadd.f32 -0.016096033, %v3315_v21  ;;  %5312 = vrcp.f32 %v3477_v46  ;;  %v3479_v6 = vadd.f32 -0.014264739, %v3463_v60  ;;  %v3241_v56 = vadd.f32 -5.6925062e-05, %v3225_v47 }
 0xac2   : > { %4008 = vmatpush1.bf16.msra.mxu0 %v5214_v36  ;;  %v7210_v54 = vmul.f32 %v3526_v15, %v7132_v51  ;;  %v3352_v44 = vmul.f32 %v7116_v10, %v3336_v11  ;;  %v3287_v49 = vmul.f32 %v3271_v38, %v7160_v55  ;;  %v3449_v41 = vadd.f32 -0.0073733293, %v3433_v27  ;;  %v5220_v51 = vld [vmem:[%s6221_s27 + $0x1a0] ss:$8 sps:$4 sm:$0xff]   ;;  %v5225_v10 = vld [vmem:[%s6221_s27 + $0x1b4] ss:$8 sps:$4 sm:$0xff]  }
 0xac3   : > { %4009 = vmatprep.subr.bf16.mxu0 %v5219_v13  ;;  %v3317_v45 = vmul.f32 %v3301_v26, %v7069_v42  ;;  %5314 = vrcp.f32 %v3479_v6  ;;  %v3257_v12 = vmul.f32 %v3241_v56, %v7180_v62  ;;  %v3524_v25 = vadd.f32 1.0, %v3508_v23  ;;  %v5223_v26 = vld [vmem:[%s6221_s27 + $0x1b0] ss:$8 sps:$4 sm:$0xff]   ;;  %v5226_v11 = vld [vmem:[%s6221_s27 + $0x1c0] ss:$8 sps:$4 sm:$0xff]  }
 0xac4   : > { %v3303_v37 = vadd.f32 -0.0029546, %v3287_v49  ;;  %v3465_v36 = vmul.f32 %v3449_v41, %v7180_v62  ;;  %v3614_v16 = vpack.c.bf16 %v7210_v54, %v7170_v0  ;;  %v3347_v42 = vmul.f32 %v7052_v40, %v3331_v30  ;;  %v5228_v40 = vld [vmem:[%s6221_s27 + $0x1c4] ss:$8 sps:$4 sm:$0xff]   ;;  %v5231_v6 = vld [vmem:[%s6221_s27 + $0x1d4] ss:$8 sps:$4 sm:$0xff]  }
 0xac5   : > { %v5309_v43 = vpop.eup %5308  ;;  %v3273_v13 = vadd.f32 -0.00073499064, %v3257_v12  ;;  %v3076_v59 = vmul.f32 0.5, %v6928_v18  ;;  %v3333_v1 = vadd.f32 -0.016096033, %v3317_v45  ;;  %v3080_v9 = vmul.f32 0.5, %v7096_v8 }
 0xac6   : > { %4010 = vmatpush1.bf16.msra.mxu0 %v5217_v33  ;;  %v5311_v61 = vpop.eup %5310  ;;  %v3512_v21 = vmul.f32 %v5309_v43, %v3352_v44  ;;  %v3319_v46 = vmul.f32 %v3303_v37, %v7160_v55  ;;  %v3481_v14 = vadd.f32 -0.014264739, %v3465_v36  ;;  %v3075_v41 = vmul.f32 0.5, %v6934_v50  ;;  %v5229_v45 = vld [vmem:[%s6221_s27 + $0x1d0] ss:$8 sps:$4 sm:$0xff]  }
 0xac7   : > { %4011 = vmatprep.subr.bf16.mxu0 %v5222_v7  ;;  %v3289_v28 = vmul.f32 %v3273_v13, %v7180_v62  ;;  %v3540_v47 = vmul.f32 %v3524_v25, %v3076_v59  ;;  %v3507_v55 = vmul.f32 %v5311_v61, %v3347_v42  ;;  %v3349_v15 = vmul.f32 %v7061_v52, %v3333_v1  ;;  %v5234_v12 = vld [vmem:[%s6221_s27 + $0x1e4] ss:$8 sps:$4 sm:$0xff]   ;;  %v5237_v61 = vld [vmem:[%s6221_s27 + $0x1f4] ss:$8 sps:$4 sm:$0xff]  }
 0xac8   : > { %v3528_v58 = vadd.f32 1.0, %v3512_v21  ;;  %v3335_v23 = vadd.f32 -0.016096033, %v3319_v46  ;;  %5316 = vrcp.f32 %v3481_v14  ;;  %v3079_v52 = vmul.f32 0.5, %v7121_v63  ;;  %v5235_v46 = vld [vmem:[%s6221_s27 + $0x1f0] ss:$8 sps:$4 sm:$0xff]  }
 0xac9   : > { %v3305_v60 = vadd.f32 -0.0029546, %v3289_v28  ;;  %v3523_v56 = vadd.f32 1.0, %v3507_v55  ;;  %v3081_v50 = vmul.f32 0.5, %v7148_v53  ;;  %v4052_v53 = vld [vmem:[%s6223_s16] sm:$0x3] }
 0xaca   : > { %4012 = vmatpush1.bf16.msra.mxu0 %v5220_v51  ;;  %v3544_v33 = vmul.f32 %v3528_v58, %v3080_v9  ;;  %v3351_v18 = vmul.f32 %v7152_v24, %v3335_v23  ;;  %v4057_v14 = vrot.slane %v4052_v53, %v6362_v4  ;;  %v4061_v54 = vrot.slane %v4052_v53, %v6359_v3 }
 0xacb   : > { %4013 = vmatprep.subr.bf16.mxu0 %v5225_v10  ;;  %v5313_v7 = vpop.eup %5312  ;;  %v3321_v8 = vmul.f32 %v3305_v60, %v7180_v62  ;;  %v3539_v36 = vmul.f32 %v3523_v56, %v3075_v41  ;;  %v5232_v10 = vld [vmem:[%s6221_s27 + $0x1e0] ss:$8 sps:$4 sm:$0xff]  }
 0xacc   : > { %v3616_v38 = vpack.c.bf16 %v3544_v33, %v3540_v47  ;;  %v3509_v49 = vmul.f32 %v5313_v7, %v3349_v15 }
 0xacd   : > { %v5315_v27 = vpop.eup %5314  ;;  %v3337_v30 = vadd.f32 -0.016096033, %v3321_v8 }
 0xace   : > { %4014 = vmatpush1.bf16.msra.mxu0 %v5223_v26  ;;  %v3511_v44 = vmul.f32 %v5315_v27, %v3351_v18  ;;  %v3525_v43 = vadd.f32 1.0, %v3509_v49 }
 0xacf   : > { %4015 = vmatprep.subr.bf16.mxu0 %v5228_v40  ;;  %v3353_v24 = vmul.f32 %v7173_v48, %v3337_v30  ;;  %v3077_v48 = vmul.f32 0.5, %v7037_v32  ;;  %v7420_v40 = vld [vmem:[#allocation28_spill] sm:$0xff] }
 0xad0   : > { %v3527_v62 = vadd.f32 1.0, %v3511_v44 }
 0xad1   : > { %v3541_v42 = vmul.f32 %v3525_v43, %v3077_v48 }
 0xad2   : > { %4016 = vmatpush1.bf16.msra.mxu0 %v5226_v11  ;;  %v5317_v37 = vpop.eup %5316  ;;  %v3543_v51 = vmul.f32 %v3527_v62, %v3079_v52 }
 0xad3   : > { %4017 = vmatprep.subr.bf16.mxu0 %v5231_v6  ;;  %v3513_v25 = vmul.f32 %v5317_v37, %v3353_v24 }
 0xad4   : > { %v3615_v13 = vpack.c.bf16 %v3543_v51, %v3539_v36 }
 0xad5   : > { %v3529_v63 = vadd.f32 1.0, %v3513_v25 }
 0xad6   : > { %4018 = vmatpush1.bf16.msra.mxu0 %v5229_v45  ;;  %3980 = vmatprep.mubr.bf16.mxu0 %v3615_v13 }
 0xad7   : > { %4019 = vmatprep.subr.bf16.mxu0 %v5234_v12  ;;  %v3545_v21 = vmul.f32 %v3529_v63, %v3081_v50  ;;  %3981 = vmatmul.mubr.bf16.gmra.mrb[28].mxu0 %v3614_v16 }
 0xad8   : > { %4023 = vmatprep.mubr.bf16.mxu0 %v3613_v17 }
 0xad9   : > { %v3617_v32 = vpack.c.bf16 %v3545_v21, %v3541_v42 }
 0xada   : > { %4020 = vmatpush1.bf16.msra.mxu0 %v5232_v10 }
 0xadb   : > { %4021 = vmatprep.subr.bf16.mxu0 %v5237_v61 }
 0xade   : > { %4022 = vmatpush1.bf16.msra.mxu0 %v5235_v46 }
 0xae1   : > { %4024 = vmatmul.mubr.bf16.vlgmr.msra.gmra.mrb[24].mxu0 %v3612_v57 }
 0xae2   : > { %4033 = vmatprep.mubr.bf16.mxu0 %v3617_v32 }
 0xae9   : > { %4034 = vmatmul.mubr.bf16.gmra.mrb[28].mxu0 %v3616_v38 }
 0xbb4   : > { %v4025_v0 = vpop.f32.mrb[24].mxu0 }
 0xbb5   : > { %v4044_v22 = vadd.f32 %v4025_v0, %v6580_v29  ;;  %v4027_v5 = vpop.f32.mrb[25].mxu0 }
 0xbb6   : > { %v4045_v17 = vadd.f32 %v4027_v5, %v6582_v31  ;;  %v4029_v16 = vpop.f32.mrb[26].mxu0 }
 0xbb7   : > { %v4064_v59 = vadd.f32 %v4057_v14, %v4044_v22  ;;  %v4046_v1 = vadd.f32 %v4029_v16, %v6584_v34  ;;  %v4031_v28 = vpop.f32.mrb[27].mxu0  ;;  %v7419_v34 = vld [vmem:[#allocation27_spill] sm:$0xff] }
 0xbb8   : > { %v4065_v19 = vadd.f32 %v4061_v54, %v4045_v17  ;;  %v4047_v2 = vadd.f32 %v4031_v28, %v6586_v35 }
 0xbb9   : > { %4072 = vst [vmem:[#allocation16] sm:$0xff] %v4064_v59  ;;  %v4066_v57 = vadd.f32 %v4057_v14, %v4046_v1 }
 0xbba   : > { %4073 = vst [vmem:[#allocation16 + $0x8] sm:$0xff] %v4065_v19  ;;  %v4067_v4 = vadd.f32 %v4061_v54, %v4047_v2 }
 0xbbb   : > { %4074 = vst [vmem:[#allocation16 + $0x10] sm:$0xff] %v4066_v57 }
 0xbbc   : > { %4075 = vst [vmem:[#allocation16 + $0x18] sm:$0xff] %v4067_v4  ;;  %v4035_v3 = vpop.f32.mrb[28].mxu0 }
 0xbbd   : > { %v4048_v29 = vadd.f32 %v4035_v3, %v6592_v20  ;;  %v4037_v9 = vpop.f32.mrb[29].mxu0 }
 0xbbe   : > { %v4049_v31 = vadd.f32 %v4037_v9, %v6594_v39  ;;  %v4039_v58 = vpop.f32.mrb[30].mxu0 }
 0xbbf   : > { %v4068_v23 = vadd.f32 %v4057_v14, %v4048_v29  ;;  %v4050_v26 = vadd.f32 %v4039_v58, %v7419_v34  ;;  %v4041_v60 = vpop.f32.mrb[31].mxu0 }
 0xbc0   : > { %v4069_v35 = vadd.f32 %v4061_v54, %v4049_v31  ;;  %v4051_v47 = vadd.f32 %v4041_v60, %v7420_v40 }
 0xbc1   : > { %4076 = vst [vmem:[#allocation16 + $0x20] sm:$0xff] %v4068_v23  ;;  %v4070_v55 = vadd.f32 %v4057_v14, %v4050_v26 }
 0xbc2   : > { %4077 = vst [vmem:[#allocation16 + $0x28] sm:$0xff] %v4069_v35  ;;  %v4071_v33 = vadd.f32 %v4061_v54, %v4051_v47 }
 0xbc3   : > { %4078 = vst [vmem:[#allocation16 + $0x30] sm:$0xff] %v4070_v55 }
 0xbc4   : > { %4079 = vst [vmem:[#allocation16 + $0x38] sm:$0xff] %v4071_v33 }
 0xbc5   : > { %5631 = shalt.err (!%p5628_p9)
}
 0xbc6   : > { %s7421_s7 = sld [smem:[#allocation43_spill]] }
 0xbcc   : > { %s5632_s21 = scalar_lea.hbm %s7421_s7, 1024 }
 0xbcd   : > { %p5633_p2 = scmp.ne.s32.totalorder %s7421_s7, %s5632_s21  ;;  %p5638_p1 = scmp.lt.u32.totalorder %s5632_s21, %s7421_s7 }
 0xbcf   : > { %p5634_p3 = pnand %p5633_p2, %p4806_p10 }
 0xbd1   : > { %p5635_p8 = pneg %p5634_p3 }
 0xbd3   : > { %p5640_p7 = pnand %p5638_p1, %p5635_p8 }
 0xbd5   : > { %5643 = shalt.err (!%p5640_p7)
}
 0xbd6   : > { %s5714_s22 = smov 256   ;;  %s5715_s27 = smov 16  }
 0xbd7   : > { %4762 = dma.vmem_to_hbm [thread:$0]  (%p4806_p10), %s4087_s20, 1024, %s7421_s7, [#allocation4], %s5714_s22, %s5714_s22, %s5715_s27  }
 0xbd8   : > { %5677 = dma.done.wait (%p4806_p10), [#allocation4], 1024  }
 0xbd9   : > { %5679 = vsyncadd (%p4806_p10), [#allocation4], 4294966272 }
 0xbda PF: > { %s7422_s24 = sld [smem:[#allocation24_spill]]  ;;  %s7423_s21 = sld [smem:[#allocation22_spill]] }
 0xbdb   : > { %s7424_s22 = sld [smem:[#allocation23_spill]]  ;;  %s7425_s23 = sld [smem:[#allocation25_spill]] }
 0xbe0   : > { %p27_p0 = scmp.ge.s32.totalorder %s7422_s24, 4  }
 0xbe2   :  { %29 = sbr.rel (!%p27_p0) target bundleno = 21 (0x15), region = 213 }
 0xbe9   :  { %4102 = vsyncpa [#allocation3], 1 }
 0xbea   :  { %4104 = vsyncpa [#allocation3 + $0x1], 1 }
 0xbeb   :  { %4105 = vsyncpa [#allocation6], 1 }
 0xbec   :  { %4106 = vsyncpa [#allocation9], 1 }
 0xbed   :  { %4107 = vsyncpa [#allocation4], 1 }
 0xbee   :  { %4109 = vsyncpa [#allocation4 + $0x1], 1 }

</bundles_post_ra>
